<compile_context>
chip_gen: v7x
topology: tpu7x:2x2x1
jax: 0.10.0
libtpu: 0.0.40
codegen_flags: <defaults>
</compile_context>

<pallas_src>
import functools

import jax
import jax.numpy as jnp
from jax.experimental import pallas as pl
from jax.experimental.pallas import tpu as pltpu


# --------------------------- Pallas kernel -----------------------------------


def _lstm_kernel(
    seq_ref,    # (T*B, D)        VMEM  rows ordered (t, b), src followed by tgt
    wih0_ref,   # (D, 4H)         VMEM
    whh0_ref,   # (H, 4H)         VMEM
    b0_ref,     # (1, 4H)         VMEM  (b_ih + b_hh, layer 0)
    wih1_ref,   # (H, 4H)         VMEM
    whh1_ref,   # (H, 4H)         VMEM
    b1_ref,     # (1, 4H)         VMEM  (b_ih + b_hh, layer 1)
    fcw_ref,    # (H, O)          VMEM
    fcb_ref,    # (1, O)          VMEM
    out_ref,    # (tgt_len*B, O)  VMEM
    dech_scr,   # (tgt_len*B, H)  VMEM scratch: decoder top hidden states
    *,
    batch: int,
    hidden_dim: int,
    src_len: int,
    tgt_len: int,
):
    H = hidden_dim
    B = batch
    T = src_len + tgt_len
    O = fcw_ref.shape[1]

    # Hoist invariant weight loads / bias broadcasts out of the time loop.
    wih0 = wih0_ref[...]
    whh0 = whh0_ref[...]
    wih1 = wih1_ref[...]
    whh1 = whh1_ref[...]
    fcw = fcw_ref[...]
    b1b = jnp.broadcast_to(b1_ref[...], (B, 4 * H))

    # --- phase 1 (non-recurrent): layer-0 input projection for ALL steps -----
    # One big MXU matmul over the whole flattened sequence; bias folded in.
    xall = (
        jnp.dot(seq_ref[...], wih0, preferred_element_type=jnp.float32)
        + jnp.broadcast_to(b0_ref[...], (T * B, 4 * H))
    )

    def gates_to_hc(gates, c_prev):
        # PyTorch LSTM gate order: i, f, g, o. Evaluate each transcendental once
        # over the full (B, 4H) vreg, then slice -> fewer serial EUP passes.
        sig = jax.nn.sigmoid(gates)
        tan = jnp.tanh(gates)
        i_g = sig[:, 0 * H : 1 * H]
        f_g = sig[:, 1 * H : 2 * H]
        g_g = tan[:, 2 * H : 3 * H]
        o_g = sig[:, 3 * H : 4 * H]
        c_new = f_g * c_prev + i_g * g_g
        h_new = o_g * jnp.tanh(c_new)
        return h_new, c_new

    zeros = jnp.zeros((B, H), jnp.float32)  # matches torch.zeros h0/c0 init
    h0, c0, h1, c1 = zeros, zeros, zeros, zeros

    # --- phase 2: the serial recurrence (fully unrolled, static offsets) ------
    for t in range(T):
        # Layer-1 hidden contribution depends only on the previous step's h1,
        # so this matmul overlaps with layer-0 work (off the critical path).
        g1_hh = jnp.dot(h1, whh1, preferred_element_type=jnp.float32) + b1b

        # Layer 0: input projection (incl. bias) precomputed in phase 1.
        g0 = xall[t * B : (t + 1) * B, :] + jnp.dot(
            h0, whh0, preferred_element_type=jnp.float32
        )
        h0, c0 = gates_to_hc(g0, c0)

        # Layer 1.
        g1 = jnp.dot(h0, wih1, preferred_element_type=jnp.float32) + g1_hh
        h1, c1 = gates_to_hc(g1, c1)

        # Teacher-forced decode steps: stage top hidden for the deferred fc.
        if t >= src_len:
            td = t - src_len
            dech_scr[pl.ds(td * B, B), :] = h1

    # --- phase 3 (non-recurrent): deferred fc head, one matmul + one store ----
    pred = (
        jnp.dot(dech_scr[...], fcw, preferred_element_type=jnp.float32)
        + jnp.broadcast_to(fcb_ref[...], (tgt_len * B, O))
    )
    out_ref[...] = pred.astype(out_ref.dtype)


# ------------------------------ wrapper ---------------------------------------


def lstm_forward_pallas(src, tgt, params, *, hidden_dim):
    """src: (B, src_len, D), tgt: (B, tgt_len, O) with O == D. Returns (B, tgt_len, O)."""
    B, src_len, in_dim = src.shape
    _, tgt_len, out_dim = tgt.shape
    H = hidden_dim
    assert in_dim == out_dim, "teacher forcing feeds tgt back into the LSTM"

    # time-major, src ++ tgt along time, flattened to rows ordered (t, b).
    src_tm = jnp.transpose(src, (1, 0, 2))
    tgt_tm = jnp.transpose(tgt, (1, 0, 2))
    seq2d = jnp.concatenate([src_tm, tgt_tm], axis=0).reshape(-1, in_dim)
    T = src_len + tgt_len

    weights = (
        params["wih0"], params["whh0"], params["b0"],
        params["wih1"], params["whh1"], params["b1"],
        params["fcw"], params["fcb"],
    )

    kernel = functools.partial(
        _lstm_kernel, batch=B, hidden_dim=H, src_len=src_len, tgt_len=tgt_len
    )

    vmem_spec = pl.BlockSpec(memory_space=pltpu.MemorySpace.VMEM)
    n_inputs = 1 + len(weights)

    # Advisory cost estimate so XLA treats this long serial call as expensive.
    flops = (
        2 * T * B * (in_dim * 4 * H)          # layer-0 input projection (phase 1)
        + 2 * T * B * (H * 4 * H) * 3         # per-step hh0, hh1, ih1 matmuls
        + 2 * tgt_len * B * H * out_dim       # fc head (phase 3)
    )
    transcendentals = 2 * T * B * (4 * H + 4 * H + H)  # sigmoid + tanh + tanh(c), 2 layers
    bytes_accessed = 4 * int(
        seq2d.size + sum(int(w.size) for w in weights) + tgt_len * B * out_dim
    )

    out2d = pl.pallas_call(
        kernel,
        out_shape=jax.ShapeDtypeStruct((tgt_len * B, out_dim), jnp.float32),
        in_specs=[vmem_spec] * n_inputs,
        out_specs=vmem_spec,
        scratch_shapes=[
            pltpu.VMEM((tgt_len * B, H), jnp.float32),  # decoder top hidden states
        ],
        cost_estimate=pl.CostEstimate(
            flops=int(flops),
            transcendentals=int(transcendentals),
            bytes_accessed=bytes_accessed,
        ),
    )(seq2d, *weights)

    # TODO(synk): for large batches add a 'parallel' batch grid axis (megacore /
    # v7x dual TensorCore); at B=2 a single invocation is optimal.
    out_tm = out2d.reshape(tgt_len, B, out_dim)
    return jnp.transpose(out_tm, (1, 0, 2))


# ------------------------- pure-JAX reference ---------------------------------


def lstm_forward_ref(src, tgt, params, *, hidden_dim):
    H = hidden_dim
    B, src_len, _ = src.shape
    _, tgt_len, _ = tgt.shape

    def cell(x, h, c, wih, whh, b):
        gates = x @ wih + h @ whh + b
        i = jax.nn.sigmoid(gates[:, 0 * H : 1 * H])
        f = jax.nn.sigmoid(gates[:, 1 * H : 2 * H])
        g = jnp.tanh(gates[:, 2 * H : 3 * H])
        o = jax.nn.sigmoid(gates[:, 3 * H : 4 * H])
        c = f * c + i * g
        h = o * jnp.tanh(c)
        return h, c

    h = [jnp.zeros((B, H), jnp.float32) for _ in range(2)]
    c = [jnp.zeros((B, H), jnp.float32) for _ in range(2)]

    def step(x, h, c):
        h[0], c[0] = cell(x, h[0], c[0], params["wih0"], params["whh0"], params["b0"])
        h[1], c[1] = cell(h[0], h[1], c[1], params["wih1"], params["whh1"], params["b1"])
        return h, c

    for t in range(src_len):
        h, c = step(src[:, t], h, c)

    outs = []
    for t in range(tgt_len):
        h, c = step(tgt[:, t], h, c)
        outs.append(h[1] @ params["fcw"] + params["fcb"])
    return jnp.stack(outs, axis=1)


# ------------------------------ main ------------------------------------------


if __name__ == "__main__":
    # Small shapes. NOTE: the PyTorch forward feeds tgt slices (output_dim) back
    # into the LSTM, so input_dim must equal output_dim.
    B = 2
    src_len = 8
    tgt_len = 8
    input_dim = 8
    hidden_dim = 32
    output_dim = 8
    num_layers = 2  # kernel is specialized for 2 layers

    key = jax.random.PRNGKey(0)
    keys = jax.random.split(key, 12)
    k = 1.0 / jnp.sqrt(hidden_dim)

    def u(key, shape):
        return jax.random.uniform(key, shape, jnp.float32, minval=-k, maxval=k)

    # PyTorch nn.LSTM weights: W_ih_l0 (4H, D), W_hh_l0 (4H, H), biases (4H,);
    # layer 1 takes hidden_dim input. Stored transposed (in, 4H) for the kernel;
    # the two biases per layer are pre-summed.
    params = {
        "wih0": u(keys[0], (4 * hidden_dim, input_dim)).T,
        "whh0": u(keys[1], (4 * hidden_dim, hidden_dim)).T,
        "b0": (u(keys[2], (4 * hidden_dim,)) + u(keys[3], (4 * hidden_dim,))).reshape(1, -1),
        "wih1": u(keys[4], (4 * hidden_dim, hidden_dim)).T,
        "whh1": u(keys[5], (4 * hidden_dim, hidden_dim)).T,
        "b1": (u(keys[6], (4 * hidden_dim,)) + u(keys[7], (4 * hidden_dim,))).reshape(1, -1),
        "fcw": u(keys[8], (output_dim, hidden_dim)).T,
        "fcb": u(keys[9], (output_dim,)).reshape(1, -1),
    }

    src = jax.random.normal(keys[10], (B, src_len, input_dim), jnp.float32)
    tgt = jax.random.normal(keys[11], (B, tgt_len, output_dim), jnp.float32)

    out = lstm_forward_pallas(src, tgt, params, hidden_dim=hidden_dim)
    out = jax.block_until_ready(out)

    ref = lstm_forward_ref(src, tgt, params, hidden_dim=hidden_dim)
    assert out.shape == (B, tgt_len, output_dim)
    assert jnp.allclose(out, ref, atol=1e-5, rtol=1e-5), "mismatch vs JAX reference"

    print("KERNEL_OK")
</pallas_src>

<mosaic_0001>
module attributes {stable_mosaic.version = 11 : i64} {
  func.func @_lstm_kernel(%arg0: memref<32x8xf32, #tpu.memory_space<vmem>>, %arg1: memref<8x128xf32, #tpu.memory_space<vmem>>, %arg2: memref<32x128xf32, #tpu.memory_space<vmem>>, %arg3: memref<1x128xf32, #tpu.memory_space<vmem>>, %arg4: memref<32x128xf32, #tpu.memory_space<vmem>>, %arg5: memref<32x128xf32, #tpu.memory_space<vmem>>, %arg6: memref<1x128xf32, #tpu.memory_space<vmem>>, %arg7: memref<32x8xf32, #tpu.memory_space<vmem>>, %arg8: memref<1x8xf32, #tpu.memory_space<vmem>>, %arg9: memref<16x8xf32, #tpu.memory_space<vmem>>, %arg10: memref<16x32xf32, #tpu.memory_space<vmem>>) attributes {dimension_semantics = [], scalar_prefetch = 0 : i64, scratch_operands = 1 : i64, tpu.core_type = #tpu.core_type<tc>} {
    %c0 = arith.constant 0 : index
    %c0_0 = arith.constant 0 : index
    %0 = vector.load %arg1[%c0, %c0_0] : memref<8x128xf32, #tpu.memory_space<vmem>>, vector<8x128xf32>
    %c0_1 = arith.constant 0 : index
    %c0_2 = arith.constant 0 : index
    %1 = vector.load %arg2[%c0_1, %c0_2] : memref<32x128xf32, #tpu.memory_space<vmem>>, vector<32x128xf32>
    %c0_3 = arith.constant 0 : index
    %c0_4 = arith.constant 0 : index
    %2 = vector.load %arg4[%c0_3, %c0_4] : memref<32x128xf32, #tpu.memory_space<vmem>>, vector<32x128xf32>
    %c0_5 = arith.constant 0 : index
    %c0_6 = arith.constant 0 : index
    %3 = vector.load %arg5[%c0_5, %c0_6] : memref<32x128xf32, #tpu.memory_space<vmem>>, vector<32x128xf32>
    %c0_7 = arith.constant 0 : index
    %c0_8 = arith.constant 0 : index
    %4 = vector.load %arg7[%c0_7, %c0_8] : memref<32x8xf32, #tpu.memory_space<vmem>>, vector<32x8xf32>
    %c0_9 = arith.constant 0 : index
    %c0_10 = arith.constant 0 : index
    %5 = vector.load %arg6[%c0_9, %c0_10] : memref<1x128xf32, #tpu.memory_space<vmem>>, vector<1x128xf32>
    %6 = vector.shape_cast %5 : vector<1x128xf32> to vector<1x128xf32>
    %7 = vector.broadcast %6 : vector<1x128xf32> to vector<2x128xf32>
    %c0_11 = arith.constant 0 : index
    %c0_12 = arith.constant 0 : index
    %8 = vector.load %arg0[%c0_11, %c0_12] : memref<32x8xf32, #tpu.memory_space<vmem>>, vector<32x8xf32>
    %cst = arith.constant dense<0.000000e+00> : vector<32x128xf32>
    %9 = tpu.matmul %8, %0, %cst {dimension_numbers = #tpu.dot_dimension_numbers<[1], [0], [0], [1], [0, 0, 1, 1], [], []>} : vector<32x8xf32>, vector<8x128xf32>, vector<32x128xf32> -> vector<32x128xf32>
    %c0_13 = arith.constant 0 : index
    %c0_14 = arith.constant 0 : index
    %10 = vector.load %arg3[%c0_13, %c0_14] : memref<1x128xf32, #tpu.memory_space<vmem>>, vector<1x128xf32>
    %11 = vector.shape_cast %10 : vector<1x128xf32> to vector<1x128xf32>
    %12 = vector.broadcast %11 : vector<1x128xf32> to vector<32x128xf32>
    %13 = arith.addf %9, %12 : vector<32x128xf32>
    %cst_15 = arith.constant 0.000000e+00 : f32
    %14 = vector.broadcast %cst_15 : f32 to vector<2x32xf32>
    %cst_16 = arith.constant dense<0.000000e+00> : vector<2x128xf32>
    %15 = tpu.matmul %14, %3, %cst_16 {dimension_numbers = #tpu.dot_dimension_numbers<[1], [0], [0], [1], [0, 0, 1, 1], [], []>} : vector<2x32xf32>, vector<32x128xf32>, vector<2x128xf32> -> vector<2x128xf32>
    %16 = arith.addf %15, %7 : vector<2x128xf32>
    %17 = vector.extract_strided_slice %13 {offsets = [0, 0], sizes = [2, 128], strides = [1, 1]} : vector<32x128xf32> to vector<2x128xf32>
    %cst_17 = arith.constant dense<0.000000e+00> : vector<2x128xf32>
    %18 = tpu.matmul %14, %1, %cst_17 {dimension_numbers = #tpu.dot_dimension_numbers<[1], [0], [0], [1], [0, 0, 1, 1], [], []>} : vector<2x32xf32>, vector<32x128xf32>, vector<2x128xf32> -> vector<2x128xf32>
    %19 = arith.addf %17, %18 : vector<2x128xf32>
    %20 = arith.negf %19 : vector<2x128xf32>
    %21 = math.exp %20 : vector<2x128xf32>
    %cst_18 = arith.constant 1.000000e+00 : f32
    %22 = vector.broadcast %cst_18 : f32 to vector<2x128xf32>
    %23 = arith.addf %22, %21 : vector<2x128xf32>
    %24 = arith.divf %22, %23 : vector<2x128xf32>
    %25 = math.tanh %19 : vector<2x128xf32>
    %26 = vector.extract_strided_slice %24 {offsets = [0, 0], sizes = [2, 32], strides = [1, 1]} : vector<2x128xf32> to vector<2x32xf32>
    %27 = vector.extract_strided_slice %24 {offsets = [0, 32], sizes = [2, 32], strides = [1, 1]} : vector<2x128xf32> to vector<2x32xf32>
    %28 = vector.extract_strided_slice %25 {offsets = [0, 64], sizes = [2, 32], strides = [1, 1]} : vector<2x128xf32> to vector<2x32xf32>
    %29 = vector.extract_strided_slice %24 {offsets = [0, 96], sizes = [2, 32], strides = [1, 1]} : vector<2x128xf32> to vector<2x32xf32>
    %30 = arith.mulf %27, %14 : vector<2x32xf32>
    %31 = arith.mulf %26, %28 : vector<2x32xf32>
    %32 = arith.addf %30, %31 : vector<2x32xf32>
    %33 = math.tanh %32 : vector<2x32xf32>
    %34 = arith.mulf %29, %33 : vector<2x32xf32>
    %cst_19 = arith.constant dense<0.000000e+00> : vector<2x128xf32>
    %35 = tpu.matmul %34, %2, %cst_19 {dimension_numbers = #tpu.dot_dimension_numbers<[1], [0], [0], [1], [0, 0, 1, 1], [], []>} : vector<2x32xf32>, vector<32x128xf32>, vector<2x128xf32> -> vector<2x128xf32>
    %36 = arith.addf %35, %16 : vector<2x128xf32>
    %37 = arith.negf %36 : vector<2x128xf32>
    %38 = math.exp %37 : vector<2x128xf32>
    %cst_20 = arith.constant 1.000000e+00 : f32
    %39 = vector.broadcast %cst_20 : f32 to vector<2x128xf32>
    %40 = arith.addf %39, %38 : vector<2x128xf32>
    %41 = arith.divf %39, %40 : vector<2x128xf32>
    %42 = math.tanh %36 : vector<2x128xf32>
    %43 = vector.extract_strided_slice %41 {offsets = [0, 0], sizes = [2, 32], strides = [1, 1]} : vector<2x128xf32> to vector<2x32xf32>
    %44 = vector.extract_strided_slice %41 {offsets = [0, 32], sizes = [2, 32], strides = [1, 1]} : vector<2x128xf32> to vector<2x32xf32>
    %45 = vector.extract_strided_slice %42 {offsets = [0, 64], sizes = [2, 32], strides = [1, 1]} : vector<2x128xf32> to vector<2x32xf32>
    %46 = vector.extract_strided_slice %41 {offsets = [0, 96], sizes = [2, 32], strides = [1, 1]} : vector<2x128xf32> to vector<2x32xf32>
    %47 = arith.mulf %44, %14 : vector<2x32xf32>
    %48 = arith.mulf %43, %45 : vector<2x32xf32>
    %49 = arith.addf %47, %48 : vector<2x32xf32>
    %50 = math.tanh %49 : vector<2x32xf32>
    %51 = arith.mulf %46, %50 : vector<2x32xf32>
    %cst_21 = arith.constant dense<0.000000e+00> : vector<2x128xf32>
    %52 = tpu.matmul %51, %3, %cst_21 {dimension_numbers = #tpu.dot_dimension_numbers<[1], [0], [0], [1], [0, 0, 1, 1], [], []>} : vector<2x32xf32>, vector<32x128xf32>, vector<2x128xf32> -> vector<2x128xf32>
    %53 = arith.addf %52, %7 : vector<2x128xf32>
    %54 = vector.extract_strided_slice %13 {offsets = [2, 0], sizes = [2, 128], strides = [1, 1]} : vector<32x128xf32> to vector<2x128xf32>
    %cst_22 = arith.constant dense<0.000000e+00> : vector<2x128xf32>
    %55 = tpu.matmul %34, %1, %cst_22 {dimension_numbers = #tpu.dot_dimension_numbers<[1], [0], [0], [1], [0, 0, 1, 1], [], []>} : vector<2x32xf32>, vector<32x128xf32>, vector<2x128xf32> -> vector<2x128xf32>
    %56 = arith.addf %54, %55 : vector<2x128xf32>
    %57 = arith.negf %56 : vector<2x128xf32>
    %58 = math.exp %57 : vector<2x128xf32>
    %cst_23 = arith.constant 1.000000e+00 : f32
    %59 = vector.broadcast %cst_23 : f32 to vector<2x128xf32>
    %60 = arith.addf %59, %58 : vector<2x128xf32>
    %61 = arith.divf %59, %60 : vector<2x128xf32>
    %62 = math.tanh %56 : vector<2x128xf32>
    %63 = vector.extract_strided_slice %61 {offsets = [0, 0], sizes = [2, 32], strides = [1, 1]} : vector<2x128xf32> to vector<2x32xf32>
    %64 = vector.extract_strided_slice %61 {offsets = [0, 32], sizes = [2, 32], strides = [1, 1]} : vector<2x128xf32> to vector<2x32xf32>
    %65 = vector.extract_strided_slice %62 {offsets = [0, 64], sizes = [2, 32], strides = [1, 1]} : vector<2x128xf32> to vector<2x32xf32>
    %66 = vector.extract_strided_slice %61 {offsets = [0, 96], sizes = [2, 32], strides = [1, 1]} : vector<2x128xf32> to vector<2x32xf32>
    %67 = arith.mulf %64, %32 : vector<2x32xf32>
    %68 = arith.mulf %63, %65 : vector<2x32xf32>
    %69 = arith.addf %67, %68 : vector<2x32xf32>
    %70 = math.tanh %69 : vector<2x32xf32>
    %71 = arith.mulf %66, %70 : vector<2x32xf32>
    %cst_24 = arith.constant dense<0.000000e+00> : vector<2x128xf32>
    %72 = tpu.matmul %71, %2, %cst_24 {dimension_numbers = #tpu.dot_dimension_numbers<[1], [0], [0], [1], [0, 0, 1, 1], [], []>} : vector<2x32xf32>, vector<32x128xf32>, vector<2x128xf32> -> vector<2x128xf32>
    %73 = arith.addf %72, %53 : vector<2x128xf32>
    %74 = arith.negf %73 : vector<2x128xf32>
    %75 = math.exp %74 : vector<2x128xf32>
    %cst_25 = arith.constant 1.000000e+00 : f32
    %76 = vector.broadcast %cst_25 : f32 to vector<2x128xf32>
    %77 = arith.addf %76, %75 : vector<2x128xf32>
    %78 = arith.divf %76, %77 : vector<2x128xf32>
    %79 = math.tanh %73 : vector<2x128xf32>
    %80 = vector.extract_strided_slice %78 {offsets = [0, 0], sizes = [2, 32], strides = [1, 1]} : vector<2x128xf32> to vector<2x32xf32>
    %81 = vector.extract_strided_slice %78 {offsets = [0, 32], sizes = [2, 32], strides = [1, 1]} : vector<2x128xf32> to vector<2x32xf32>
    %82 = vector.extract_strided_slice %79 {offsets = [0, 64], sizes = [2, 32], strides = [1, 1]} : vector<2x128xf32> to vector<2x32xf32>
    %83 = vector.extract_strided_slice %78 {offsets = [0, 96], sizes = [2, 32], strides = [1, 1]} : vector<2x128xf32> to vector<2x32xf32>
    %84 = arith.mulf %81, %49 : vector<2x32xf32>
    %85 = arith.mulf %80, %82 : vector<2x32xf32>
    %86 = arith.addf %84, %85 : vector<2x32xf32>
    %87 = math.tanh %86 : vector<2x32xf32>
    %88 = arith.mulf %83, %87 : vector<2x32xf32>
    %cst_26 = arith.constant dense<0.000000e+00> : vector<2x128xf32>
    %89 = tpu.matmul %88, %3, %cst_26 {dimension_numbers = #tpu.dot_dimension_numbers<[1], [0], [0], [1], [0, 0, 1, 1], [], []>} : vector<2x32xf32>, vector<32x128xf32>, vector<2x128xf32> -> vector<2x128xf32>
    %90 = arith.addf %89, %7 : vector<2x128xf32>
    %91 = vector.extract_strided_slice %13 {offsets = [4, 0], sizes = [2, 128], strides = [1, 1]} : vector<32x128xf32> to vector<2x128xf32>
    %cst_27 = arith.constant dense<0.000000e+00> : vector<2x128xf32>
    %92 = tpu.matmul %71, %1, %cst_27 {dimension_numbers = #tpu.dot_dimension_numbers<[1], [0], [0], [1], [0, 0, 1, 1], [], []>} : vector<2x32xf32>, vector<32x128xf32>, vector<2x128xf32> -> vector<2x128xf32>
    %93 = arith.addf %91, %92 : vector<2x128xf32>
    %94 = arith.negf %93 : vector<2x128xf32>
    %95 = math.exp %94 : vector<2x128xf32>
    %cst_28 = arith.constant 1.000000e+00 : f32
    %96 = vector.broadcast %cst_28 : f32 to vector<2x128xf32>
    %97 = arith.addf %96, %95 : vector<2x128xf32>
    %98 = arith.divf %96, %97 : vector<2x128xf32>
    %99 = math.tanh %93 : vector<2x128xf32>
    %100 = vector.extract_strided_slice %98 {offsets = [0, 0], sizes = [2, 32], strides = [1, 1]} : vector<2x128xf32> to vector<2x32xf32>
    %101 = vector.extract_strided_slice %98 {offsets = [0, 32], sizes = [2, 32], strides = [1, 1]} : vector<2x128xf32> to vector<2x32xf32>
    %102 = vector.extract_strided_slice %99 {offsets = [0, 64], sizes = [2, 32], strides = [1, 1]} : vector<2x128xf32> to vector<2x32xf32>
    %103 = vector.extract_strided_slice %98 {offsets = [0, 96], sizes = [2, 32], strides = [1, 1]} : vector<2x128xf32> to vector<2x32xf32>
    %104 = arith.mulf %101, %69 : vector<2x32xf32>
    %105 = arith.mulf %100, %102 : vector<2x32xf32>
    %106 = arith.addf %104, %105 : vector<2x32xf32>
    %107 = math.tanh %106 : vector<2x32xf32>
    %108 = arith.mulf %103, %107 : vector<2x32xf32>
    %cst_29 = arith.constant dense<0.000000e+00> : vector<2x128xf32>
    %109 = tpu.matmul %108, %2, %cst_29 {dimension_numbers = #tpu.dot_dimension_numbers<[1], [0], [0], [1], [0, 0, 1, 1], [], []>} : vector<2x32xf32>, vector<32x128xf32>, vector<2x128xf32> -> vector<2x128xf32>
    %110 = arith.addf %109, %90 : vector<2x128xf32>
    %111 = arith.negf %110 : vector<2x128xf32>
    %112 = math.exp %111 : vector<2x128xf32>
    %cst_30 = arith.constant 1.000000e+00 : f32
    %113 = vector.broadcast %cst_30 : f32 to vector<2x128xf32>
    %114 = arith.addf %113, %112 : vector<2x128xf32>
    %115 = arith.divf %113, %114 : vector<2x128xf32>
    %116 = math.tanh %110 : vector<2x128xf32>
    %117 = vector.extract_strided_slice %115 {offsets = [0, 0], sizes = [2, 32], strides = [1, 1]} : vector<2x128xf32> to vector<2x32xf32>
    %118 = vector.extract_strided_slice %115 {offsets = [0, 32], sizes = [2, 32], strides = [1, 1]} : vector<2x128xf32> to vector<2x32xf32>
    %119 = vector.extract_strided_slice %116 {offsets = [0, 64], sizes = [2, 32], strides = [1, 1]} : vector<2x128xf32> to vector<2x32xf32>
    %120 = vector.extract_strided_slice %115 {offsets = [0, 96], sizes = [2, 32], strides = [1, 1]} : vector<2x128xf32> to vector<2x32xf32>
    %121 = arith.mulf %118, %86 : vector<2x32xf32>
    %122 = arith.mulf %117, %119 : vector<2x32xf32>
    %123 = arith.addf %121, %122 : vector<2x32xf32>
    %124 = math.tanh %123 : vector<2x32xf32>
    %125 = arith.mulf %120, %124 : vector<2x32xf32>
    %cst_31 = arith.constant dense<0.000000e+00> : vector<2x128xf32>
    %126 = tpu.matmul %125, %3, %cst_31 {dimension_numbers = #tpu.dot_dimension_numbers<[1], [0], [0], [1], [0, 0, 1, 1], [], []>} : vector<2x32xf32>, vector<32x128xf32>, vector<2x128xf32> -> vector<2x128xf32>
    %127 = arith.addf %126, %7 : vector<2x128xf32>
    %128 = vector.extract_strided_slice %13 {offsets = [6, 0], sizes = [2, 128], strides = [1, 1]} : vector<32x128xf32> to vector<2x128xf32>
    %cst_32 = arith.constant dense<0.000000e+00> : vector<2x128xf32>
    %129 = tpu.matmul %108, %1, %cst_32 {dimension_numbers = #tpu.dot_dimension_numbers<[1], [0], [0], [1], [0, 0, 1, 1], [], []>} : vector<2x32xf32>, vector<32x128xf32>, vector<2x128xf32> -> vector<2x128xf32>
    %130 = arith.addf %128, %129 : vector<2x128xf32>
    %131 = arith.negf %130 : vector<2x128xf32>
    %132 = math.exp %131 : vector<2x128xf32>
    %cst_33 = arith.constant 1.000000e+00 : f32
    %133 = vector.broadcast %cst_33 : f32 to vector<2x128xf32>
    %134 = arith.addf %133, %132 : vector<2x128xf32>
    %135 = arith.divf %133, %134 : vector<2x128xf32>
    %136 = math.tanh %130 : vector<2x128xf32>
    %137 = vector.extract_strided_slice %135 {offsets = [0, 0], sizes = [2, 32], strides = [1, 1]} : vector<2x128xf32> to vector<2x32xf32>
    %138 = vector.extract_strided_slice %135 {offsets = [0, 32], sizes = [2, 32], strides = [1, 1]} : vector<2x128xf32> to vector<2x32xf32>
    %139 = vector.extract_strided_slice %136 {offsets = [0, 64], sizes = [2, 32], strides = [1, 1]} : vector<2x128xf32> to vector<2x32xf32>
    %140 = vector.extract_strided_slice %135 {offsets = [0, 96], sizes = [2, 32], strides = [1, 1]} : vector<2x128xf32> to vector<2x32xf32>
    %141 = arith.mulf %138, %106 : vector<2x32xf32>
    %142 = arith.mulf %137, %139 : vector<2x32xf32>
    %143 = arith.addf %141, %142 : vector<2x32xf32>
    %144 = math.tanh %143 : vector<2x32xf32>
    %145 = arith.mulf %140, %144 : vector<2x32xf32>
    %cst_34 = arith.constant dense<0.000000e+00> : vector<2x128xf32>
    %146 = tpu.matmul %145, %2, %cst_34 {dimension_numbers = #tpu.dot_dimension_numbers<[1], [0], [0], [1], [0, 0, 1, 1], [], []>} : vector<2x32xf32>, vector<32x128xf32>, vector<2x128xf32> -> vector<2x128xf32>
    %147 = arith.addf %146, %127 : vector<2x128xf32>
    %148 = arith.negf %147 : vector<2x128xf32>
    %149 = math.exp %148 : vector<2x128xf32>
    %cst_35 = arith.constant 1.000000e+00 : f32
    %150 = vector.broadcast %cst_35 : f32 to vector<2x128xf32>
    %151 = arith.addf %150, %149 : vector<2x128xf32>
    %152 = arith.divf %150, %151 : vector<2x128xf32>
    %153 = math.tanh %147 : vector<2x128xf32>
    %154 = vector.extract_strided_slice %152 {offsets = [0, 0], sizes = [2, 32], strides = [1, 1]} : vector<2x128xf32> to vector<2x32xf32>
    %155 = vector.extract_strided_slice %152 {offsets = [0, 32], sizes = [2, 32], strides = [1, 1]} : vector<2x128xf32> to vector<2x32xf32>
    %156 = vector.extract_strided_slice %153 {offsets = [0, 64], sizes = [2, 32], strides = [1, 1]} : vector<2x128xf32> to vector<2x32xf32>
    %157 = vector.extract_strided_slice %152 {offsets = [0, 96], sizes = [2, 32], strides = [1, 1]} : vector<2x128xf32> to vector<2x32xf32>
    %158 = arith.mulf %155, %123 : vector<2x32xf32>
    %159 = arith.mulf %154, %156 : vector<2x32xf32>
    %160 = arith.addf %158, %159 : vector<2x32xf32>
    %161 = math.tanh %160 : vector<2x32xf32>
    %162 = arith.mulf %157, %161 : vector<2x32xf32>
    %cst_36 = arith.constant dense<0.000000e+00> : vector<2x128xf32>
    %163 = tpu.matmul %162, %3, %cst_36 {dimension_numbers = #tpu.dot_dimension_numbers<[1], [0], [0], [1], [0, 0, 1, 1], [], []>} : vector<2x32xf32>, vector<32x128xf32>, vector<2x128xf32> -> vector<2x128xf32>
    %164 = arith.addf %163, %7 : vector<2x128xf32>
    %165 = vector.extract_strided_slice %13 {offsets = [8, 0], sizes = [2, 128], strides = [1, 1]} : vector<32x128xf32> to vector<2x128xf32>
    %cst_37 = arith.constant dense<0.000000e+00> : vector<2x128xf32>
    %166 = tpu.matmul %145, %1, %cst_37 {dimension_numbers = #tpu.dot_dimension_numbers<[1], [0], [0], [1], [0, 0, 1, 1], [], []>} : vector<2x32xf32>, vector<32x128xf32>, vector<2x128xf32> -> vector<2x128xf32>
    %167 = arith.addf %165, %166 : vector<2x128xf32>
    %168 = arith.negf %167 : vector<2x128xf32>
    %169 = math.exp %168 : vector<2x128xf32>
    %cst_38 = arith.constant 1.000000e+00 : f32
    %170 = vector.broadcast %cst_38 : f32 to vector<2x128xf32>
    %171 = arith.addf %170, %169 : vector<2x128xf32>
    %172 = arith.divf %170, %171 : vector<2x128xf32>
    %173 = math.tanh %167 : vector<2x128xf32>
    %174 = vector.extract_strided_slice %172 {offsets = [0, 0], sizes = [2, 32], strides = [1, 1]} : vector<2x128xf32> to vector<2x32xf32>
    %175 = vector.extract_strided_slice %172 {offsets = [0, 32], sizes = [2, 32], strides = [1, 1]} : vector<2x128xf32> to vector<2x32xf32>
    %176 = vector.extract_strided_slice %173 {offsets = [0, 64], sizes = [2, 32], strides = [1, 1]} : vector<2x128xf32> to vector<2x32xf32>
    %177 = vector.extract_strided_slice %172 {offsets = [0, 96], sizes = [2, 32], strides = [1, 1]} : vector<2x128xf32> to vector<2x32xf32>
    %178 = arith.mulf %175, %143 : vector<2x32xf32>
    %179 = arith.mulf %174, %176 : vector<2x32xf32>
    %180 = arith.addf %178, %179 : vector<2x32xf32>
    %181 = math.tanh %180 : vector<2x32xf32>
    %182 = arith.mulf %177, %181 : vector<2x32xf32>
    %cst_39 = arith.constant dense<0.000000e+00> : vector<2x128xf32>
    %183 = tpu.matmul %182, %2, %cst_39 {dimension_numbers = #tpu.dot_dimension_numbers<[1], [0], [0], [1], [0, 0, 1, 1], [], []>} : vector<2x32xf32>, vector<32x128xf32>, vector<2x128xf32> -> vector<2x128xf32>
    %184 = arith.addf %183, %164 : vector<2x128xf32>
    %185 = arith.negf %184 : vector<2x128xf32>
    %186 = math.exp %185 : vector<2x128xf32>
    %cst_40 = arith.constant 1.000000e+00 : f32
    %187 = vector.broadcast %cst_40 : f32 to vector<2x128xf32>
    %188 = arith.addf %187, %186 : vector<2x128xf32>
    %189 = arith.divf %187, %188 : vector<2x128xf32>
    %190 = math.tanh %184 : vector<2x128xf32>
    %191 = vector.extract_strided_slice %189 {offsets = [0, 0], sizes = [2, 32], strides = [1, 1]} : vector<2x128xf32> to vector<2x32xf32>
    %192 = vector.extract_strided_slice %189 {offsets = [0, 32], sizes = [2, 32], strides = [1, 1]} : vector<2x128xf32> to vector<2x32xf32>
    %193 = vector.extract_strided_slice %190 {offsets = [0, 64], sizes = [2, 32], strides = [1, 1]} : vector<2x128xf32> to vector<2x32xf32>
    %194 = vector.extract_strided_slice %189 {offsets = [0, 96], sizes = [2, 32], strides = [1, 1]} : vector<2x128xf32> to vector<2x32xf32>
    %195 = arith.mulf %192, %160 : vector<2x32xf32>
    %196 = arith.mulf %191, %193 : vector<2x32xf32>
    %197 = arith.addf %195, %196 : vector<2x32xf32>
    %198 = math.tanh %197 : vector<2x32xf32>
    %199 = arith.mulf %194, %198 : vector<2x32xf32>
    %cst_41 = arith.constant dense<0.000000e+00> : vector<2x128xf32>
    %200 = tpu.matmul %199, %3, %cst_41 {dimension_numbers = #tpu.dot_dimension_numbers<[1], [0], [0], [1], [0, 0, 1, 1], [], []>} : vector<2x32xf32>, vector<32x128xf32>, vector<2x128xf32> -> vector<2x128xf32>
    %201 = arith.addf %200, %7 : vector<2x128xf32>
    %202 = vector.extract_strided_slice %13 {offsets = [10, 0], sizes = [2, 128], strides = [1, 1]} : vector<32x128xf32> to vector<2x128xf32>
    %cst_42 = arith.constant dense<0.000000e+00> : vector<2x128xf32>
    %203 = tpu.matmul %182, %1, %cst_42 {dimension_numbers = #tpu.dot_dimension_numbers<[1], [0], [0], [1], [0, 0, 1, 1], [], []>} : vector<2x32xf32>, vector<32x128xf32>, vector<2x128xf32> -> vector<2x128xf32>
    %204 = arith.addf %202, %203 : vector<2x128xf32>
    %205 = arith.negf %204 : vector<2x128xf32>
    %206 = math.exp %205 : vector<2x128xf32>
    %cst_43 = arith.constant 1.000000e+00 : f32
    %207 = vector.broadcast %cst_43 : f32 to vector<2x128xf32>
    %208 = arith.addf %207, %206 : vector<2x128xf32>
    %209 = arith.divf %207, %208 : vector<2x128xf32>
    %210 = math.tanh %204 : vector<2x128xf32>
    %211 = vector.extract_strided_slice %209 {offsets = [0, 0], sizes = [2, 32], strides = [1, 1]} : vector<2x128xf32> to vector<2x32xf32>
    %212 = vector.extract_strided_slice %209 {offsets = [0, 32], sizes = [2, 32], strides = [1, 1]} : vector<2x128xf32> to vector<2x32xf32>
    %213 = vector.extract_strided_slice %210 {offsets = [0, 64], sizes = [2, 32], strides = [1, 1]} : vector<2x128xf32> to vector<2x32xf32>
    %214 = vector.extract_strided_slice %209 {offsets = [0, 96], sizes = [2, 32], strides = [1, 1]} : vector<2x128xf32> to vector<2x32xf32>
    %215 = arith.mulf %212, %180 : vector<2x32xf32>
    %216 = arith.mulf %211, %213 : vector<2x32xf32>
    %217 = arith.addf %215, %216 : vector<2x32xf32>
    %218 = math.tanh %217 : vector<2x32xf32>
    %219 = arith.mulf %214, %218 : vector<2x32xf32>
    %cst_44 = arith.constant dense<0.000000e+00> : vector<2x128xf32>
    %220 = tpu.matmul %219, %2, %cst_44 {dimension_numbers = #tpu.dot_dimension_numbers<[1], [0], [0], [1], [0, 0, 1, 1], [], []>} : vector<2x32xf32>, vector<32x128xf32>, vector<2x128xf32> -> vector<2x128xf32>
    %221 = arith.addf %220, %201 : vector<2x128xf32>
    %222 = arith.negf %221 : vector<2x128xf32>
    %223 = math.exp %222 : vector<2x128xf32>
    %cst_45 = arith.constant 1.000000e+00 : f32
    %224 = vector.broadcast %cst_45 : f32 to vector<2x128xf32>
    %225 = arith.addf %224, %223 : vector<2x128xf32>
    %226 = arith.divf %224, %225 : vector<2x128xf32>
    %227 = math.tanh %221 : vector<2x128xf32>
    %228 = vector.extract_strided_slice %226 {offsets = [0, 0], sizes = [2, 32], strides = [1, 1]} : vector<2x128xf32> to vector<2x32xf32>
    %229 = vector.extract_strided_slice %226 {offsets = [0, 32], sizes = [2, 32], strides = [1, 1]} : vector<2x128xf32> to vector<2x32xf32>
    %230 = vector.extract_strided_slice %227 {offsets = [0, 64], sizes = [2, 32], strides = [1, 1]} : vector<2x128xf32> to vector<2x32xf32>
    %231 = vector.extract_strided_slice %226 {offsets = [0, 96], sizes = [2, 32], strides = [1, 1]} : vector<2x128xf32> to vector<2x32xf32>
    %232 = arith.mulf %229, %197 : vector<2x32xf32>
    %233 = arith.mulf %228, %230 : vector<2x32xf32>
    %234 = arith.addf %232, %233 : vector<2x32xf32>
    %235 = math.tanh %234 : vector<2x32xf32>
    %236 = arith.mulf %231, %235 : vector<2x32xf32>
    %cst_46 = arith.constant dense<0.000000e+00> : vector<2x128xf32>
    %237 = tpu.matmul %236, %3, %cst_46 {dimension_numbers = #tpu.dot_dimension_numbers<[1], [0], [0], [1], [0, 0, 1, 1], [], []>} : vector<2x32xf32>, vector<32x128xf32>, vector<2x128xf32> -> vector<2x128xf32>
    %238 = arith.addf %237, %7 : vector<2x128xf32>
    %239 = vector.extract_strided_slice %13 {offsets = [12, 0], sizes = [2, 128], strides = [1, 1]} : vector<32x128xf32> to vector<2x128xf32>
    %cst_47 = arith.constant dense<0.000000e+00> : vector<2x128xf32>
    %240 = tpu.matmul %219, %1, %cst_47 {dimension_numbers = #tpu.dot_dimension_numbers<[1], [0], [0], [1], [0, 0, 1, 1], [], []>} : vector<2x32xf32>, vector<32x128xf32>, vector<2x128xf32> -> vector<2x128xf32>
    %241 = arith.addf %239, %240 : vector<2x128xf32>
    %242 = arith.negf %241 : vector<2x128xf32>
    %243 = math.exp %242 : vector<2x128xf32>
    %cst_48 = arith.constant 1.000000e+00 : f32
    %244 = vector.broadcast %cst_48 : f32 to vector<2x128xf32>
    %245 = arith.addf %244, %243 : vector<2x128xf32>
    %246 = arith.divf %244, %245 : vector<2x128xf32>
    %247 = math.tanh %241 : vector<2x128xf32>
    %248 = vector.extract_strided_slice %246 {offsets = [0, 0], sizes = [2, 32], strides = [1, 1]} : vector<2x128xf32> to vector<2x32xf32>
    %249 = vector.extract_strided_slice %246 {offsets = [0, 32], sizes = [2, 32], strides = [1, 1]} : vector<2x128xf32> to vector<2x32xf32>
    %250 = vector.extract_strided_slice %247 {offsets = [0, 64], sizes = [2, 32], strides = [1, 1]} : vector<2x128xf32> to vector<2x32xf32>
    %251 = vector.extract_strided_slice %246 {offsets = [0, 96], sizes = [2, 32], strides = [1, 1]} : vector<2x128xf32> to vector<2x32xf32>
    %252 = arith.mulf %249, %217 : vector<2x32xf32>
    %253 = arith.mulf %248, %250 : vector<2x32xf32>
    %254 = arith.addf %252, %253 : vector<2x32xf32>
    %255 = math.tanh %254 : vector<2x32xf32>
    %256 = arith.mulf %251, %255 : vector<2x32xf32>
    %cst_49 = arith.constant dense<0.000000e+00> : vector<2x128xf32>
    %257 = tpu.matmul %256, %2, %cst_49 {dimension_numbers = #tpu.dot_dimension_numbers<[1], [0], [0], [1], [0, 0, 1, 1], [], []>} : vector<2x32xf32>, vector<32x128xf32>, vector<2x128xf32> -> vector<2x128xf32>
    %258 = arith.addf %257, %238 : vector<2x128xf32>
    %259 = arith.negf %258 : vector<2x128xf32>
    %260 = math.exp %259 : vector<2x128xf32>
    %cst_50 = arith.constant 1.000000e+00 : f32
    %261 = vector.broadcast %cst_50 : f32 to vector<2x128xf32>
    %262 = arith.addf %261, %260 : vector<2x128xf32>
    %263 = arith.divf %261, %262 : vector<2x128xf32>
    %264 = math.tanh %258 : vector<2x128xf32>
    %265 = vector.extract_strided_slice %263 {offsets = [0, 0], sizes = [2, 32], strides = [1, 1]} : vector<2x128xf32> to vector<2x32xf32>
    %266 = vector.extract_strided_slice %263 {offsets = [0, 32], sizes = [2, 32], strides = [1, 1]} : vector<2x128xf32> to vector<2x32xf32>
    %267 = vector.extract_strided_slice %264 {offsets = [0, 64], sizes = [2, 32], strides = [1, 1]} : vector<2x128xf32> to vector<2x32xf32>
    %268 = vector.extract_strided_slice %263 {offsets = [0, 96], sizes = [2, 32], strides = [1, 1]} : vector<2x128xf32> to vector<2x32xf32>
    %269 = arith.mulf %266, %234 : vector<2x32xf32>
    %270 = arith.mulf %265, %267 : vector<2x32xf32>
    %271 = arith.addf %269, %270 : vector<2x32xf32>
    %272 = math.tanh %271 : vector<2x32xf32>
    %273 = arith.mulf %268, %272 : vector<2x32xf32>
    %cst_51 = arith.constant dense<0.000000e+00> : vector<2x128xf32>
    %274 = tpu.matmul %273, %3, %cst_51 {dimension_numbers = #tpu.dot_dimension_numbers<[1], [0], [0], [1], [0, 0, 1, 1], [], []>} : vector<2x32xf32>, vector<32x128xf32>, vector<2x128xf32> -> vector<2x128xf32>
    %275 = arith.addf %274, %7 : vector<2x128xf32>
    %276 = vector.extract_strided_slice %13 {offsets = [14, 0], sizes = [2, 128], strides = [1, 1]} : vector<32x128xf32> to vector<2x128xf32>
    %cst_52 = arith.constant dense<0.000000e+00> : vector<2x128xf32>
    %277 = tpu.matmul %256, %1, %cst_52 {dimension_numbers = #tpu.dot_dimension_numbers<[1], [0], [0], [1], [0, 0, 1, 1], [], []>} : vector<2x32xf32>, vector<32x128xf32>, vector<2x128xf32> -> vector<2x128xf32>
    %278 = arith.addf %276, %277 : vector<2x128xf32>
    %279 = arith.negf %278 : vector<2x128xf32>
    %280 = math.exp %279 : vector<2x128xf32>
    %cst_53 = arith.constant 1.000000e+00 : f32
    %281 = vector.broadcast %cst_53 : f32 to vector<2x128xf32>
    %282 = arith.addf %281, %280 : vector<2x128xf32>
    %283 = arith.divf %281, %282 : vector<2x128xf32>
    %284 = math.tanh %278 : vector<2x128xf32>
    %285 = vector.extract_strided_slice %283 {offsets = [0, 0], sizes = [2, 32], strides = [1, 1]} : vector<2x128xf32> to vector<2x32xf32>
    %286 = vector.extract_strided_slice %283 {offsets = [0, 32], sizes = [2, 32], strides = [1, 1]} : vector<2x128xf32> to vector<2x32xf32>
    %287 = vector.extract_strided_slice %284 {offsets = [0, 64], sizes = [2, 32], strides = [1, 1]} : vector<2x128xf32> to vector<2x32xf32>
    %288 = vector.extract_strided_slice %283 {offsets = [0, 96], sizes = [2, 32], strides = [1, 1]} : vector<2x128xf32> to vector<2x32xf32>
    %289 = arith.mulf %286, %254 : vector<2x32xf32>
    %290 = arith.mulf %285, %287 : vector<2x32xf32>
    %291 = arith.addf %289, %290 : vector<2x32xf32>
    %292 = math.tanh %291 : vector<2x32xf32>
    %293 = arith.mulf %288, %292 : vector<2x32xf32>
    %cst_54 = arith.constant dense<0.000000e+00> : vector<2x128xf32>
    %294 = tpu.matmul %293, %2, %cst_54 {dimension_numbers = #tpu.dot_dimension_numbers<[1], [0], [0], [1], [0, 0, 1, 1], [], []>} : vector<2x32xf32>, vector<32x128xf32>, vector<2x128xf32> -> vector<2x128xf32>
    %295 = arith.addf %294, %275 : vector<2x128xf32>
    %296 = arith.negf %295 : vector<2x128xf32>
    %297 = math.exp %296 : vector<2x128xf32>
    %cst_55 = arith.constant 1.000000e+00 : f32
    %298 = vector.broadcast %cst_55 : f32 to vector<2x128xf32>
    %299 = arith.addf %298, %297 : vector<2x128xf32>
    %300 = arith.divf %298, %299 : vector<2x128xf32>
    %301 = math.tanh %295 : vector<2x128xf32>
    %302 = vector.extract_strided_slice %300 {offsets = [0, 0], sizes = [2, 32], strides = [1, 1]} : vector<2x128xf32> to vector<2x32xf32>
    %303 = vector.extract_strided_slice %300 {offsets = [0, 32], sizes = [2, 32], strides = [1, 1]} : vector<2x128xf32> to vector<2x32xf32>
    %304 = vector.extract_strided_slice %301 {offsets = [0, 64], sizes = [2, 32], strides = [1, 1]} : vector<2x128xf32> to vector<2x32xf32>
    %305 = vector.extract_strided_slice %300 {offsets = [0, 96], sizes = [2, 32], strides = [1, 1]} : vector<2x128xf32> to vector<2x32xf32>
    %306 = arith.mulf %303, %271 : vector<2x32xf32>
    %307 = arith.mulf %302, %304 : vector<2x32xf32>
    %308 = arith.addf %306, %307 : vector<2x32xf32>
    %309 = math.tanh %308 : vector<2x32xf32>
    %310 = arith.mulf %305, %309 : vector<2x32xf32>
    %cst_56 = arith.constant dense<0.000000e+00> : vector<2x128xf32>
    %311 = tpu.matmul %310, %3, %cst_56 {dimension_numbers = #tpu.dot_dimension_numbers<[1], [0], [0], [1], [0, 0, 1, 1], [], []>} : vector<2x32xf32>, vector<32x128xf32>, vector<2x128xf32> -> vector<2x128xf32>
    %312 = arith.addf %311, %7 : vector<2x128xf32>
    %313 = vector.extract_strided_slice %13 {offsets = [16, 0], sizes = [2, 128], strides = [1, 1]} : vector<32x128xf32> to vector<2x128xf32>
    %cst_57 = arith.constant dense<0.000000e+00> : vector<2x128xf32>
    %314 = tpu.matmul %293, %1, %cst_57 {dimension_numbers = #tpu.dot_dimension_numbers<[1], [0], [0], [1], [0, 0, 1, 1], [], []>} : vector<2x32xf32>, vector<32x128xf32>, vector<2x128xf32> -> vector<2x128xf32>
    %315 = arith.addf %313, %314 : vector<2x128xf32>
    %316 = arith.negf %315 : vector<2x128xf32>
    %317 = math.exp %316 : vector<2x128xf32>
    %cst_58 = arith.constant 1.000000e+00 : f32
    %318 = vector.broadcast %cst_58 : f32 to vector<2x128xf32>
    %319 = arith.addf %318, %317 : vector<2x128xf32>
    %320 = arith.divf %318, %319 : vector<2x128xf32>
    %321 = math.tanh %315 : vector<2x128xf32>
    %322 = vector.extract_strided_slice %320 {offsets = [0, 0], sizes = [2, 32], strides = [1, 1]} : vector<2x128xf32> to vector<2x32xf32>
    %323 = vector.extract_strided_slice %320 {offsets = [0, 32], sizes = [2, 32], strides = [1, 1]} : vector<2x128xf32> to vector<2x32xf32>
    %324 = vector.extract_strided_slice %321 {offsets = [0, 64], sizes = [2, 32], strides = [1, 1]} : vector<2x128xf32> to vector<2x32xf32>
    %325 = vector.extract_strided_slice %320 {offsets = [0, 96], sizes = [2, 32], strides = [1, 1]} : vector<2x128xf32> to vector<2x32xf32>
    %326 = arith.mulf %323, %291 : vector<2x32xf32>
    %327 = arith.mulf %322, %324 : vector<2x32xf32>
    %328 = arith.addf %326, %327 : vector<2x32xf32>
    %329 = math.tanh %328 : vector<2x32xf32>
    %330 = arith.mulf %325, %329 : vector<2x32xf32>
    %cst_59 = arith.constant dense<0.000000e+00> : vector<2x128xf32>
    %331 = tpu.matmul %330, %2, %cst_59 {dimension_numbers = #tpu.dot_dimension_numbers<[1], [0], [0], [1], [0, 0, 1, 1], [], []>} : vector<2x32xf32>, vector<32x128xf32>, vector<2x128xf32> -> vector<2x128xf32>
    %332 = arith.addf %331, %312 : vector<2x128xf32>
    %333 = arith.negf %332 : vector<2x128xf32>
    %334 = math.exp %333 : vector<2x128xf32>
    %cst_60 = arith.constant 1.000000e+00 : f32
    %335 = vector.broadcast %cst_60 : f32 to vector<2x128xf32>
    %336 = arith.addf %335, %334 : vector<2x128xf32>
    %337 = arith.divf %335, %336 : vector<2x128xf32>
    %338 = math.tanh %332 : vector<2x128xf32>
    %339 = vector.extract_strided_slice %337 {offsets = [0, 0], sizes = [2, 32], strides = [1, 1]} : vector<2x128xf32> to vector<2x32xf32>
    %340 = vector.extract_strided_slice %337 {offsets = [0, 32], sizes = [2, 32], strides = [1, 1]} : vector<2x128xf32> to vector<2x32xf32>
    %341 = vector.extract_strided_slice %338 {offsets = [0, 64], sizes = [2, 32], strides = [1, 1]} : vector<2x128xf32> to vector<2x32xf32>
    %342 = vector.extract_strided_slice %337 {offsets = [0, 96], sizes = [2, 32], strides = [1, 1]} : vector<2x128xf32> to vector<2x32xf32>
    %343 = arith.mulf %340, %308 : vector<2x32xf32>
    %344 = arith.mulf %339, %341 : vector<2x32xf32>
    %345 = arith.addf %343, %344 : vector<2x32xf32>
    %346 = math.tanh %345 : vector<2x32xf32>
    %347 = arith.mulf %342, %346 : vector<2x32xf32>
    %c0_61 = arith.constant 0 : index
    %c0_62 = arith.constant 0 : index
    %348 = vector.load %arg10[%c0_61, %c0_62] : memref<16x32xf32, #tpu.memory_space<vmem>>, vector<2x32xf32>
    tpu.vector_store %arg10[%c0_61, %c0_62], %347 {strides = array<i32>} : memref<16x32xf32, #tpu.memory_space<vmem>>, vector<2x32xf32>,
    %cst_63 = arith.constant dense<0.000000e+00> : vector<2x128xf32>
    %349 = tpu.matmul %347, %3, %cst_63 {dimension_numbers = #tpu.dot_dimension_numbers<[1], [0], [0], [1], [0, 0, 1, 1], [], []>} : vector<2x32xf32>, vector<32x128xf32>, vector<2x128xf32> -> vector<2x128xf32>
    %350 = arith.addf %349, %7 : vector<2x128xf32>
    %351 = vector.extract_strided_slice %13 {offsets = [18, 0], sizes = [2, 128], strides = [1, 1]} : vector<32x128xf32> to vector<2x128xf32>
    %cst_64 = arith.constant dense<0.000000e+00> : vector<2x128xf32>
    %352 = tpu.matmul %330, %1, %cst_64 {dimension_numbers = #tpu.dot_dimension_numbers<[1], [0], [0], [1], [0, 0, 1, 1], [], []>} : vector<2x32xf32>, vector<32x128xf32>, vector<2x128xf32> -> vector<2x128xf32>
    %353 = arith.addf %351, %352 : vector<2x128xf32>
    %354 = arith.negf %353 : vector<2x128xf32>
    %355 = math.exp %354 : vector<2x128xf32>
    %cst_65 = arith.constant 1.000000e+00 : f32
    %356 = vector.broadcast %cst_65 : f32 to vector<2x128xf32>
    %357 = arith.addf %356, %355 : vector<2x128xf32>
    %358 = arith.divf %356, %357 : vector<2x128xf32>
    %359 = math.tanh %353 : vector<2x128xf32>
    %360 = vector.extract_strided_slice %358 {offsets = [0, 0], sizes = [2, 32], strides = [1, 1]} : vector<2x128xf32> to vector<2x32xf32>
    %361 = vector.extract_strided_slice %358 {offsets = [0, 32], sizes = [2, 32], strides = [1, 1]} : vector<2x128xf32> to vector<2x32xf32>
    %362 = vector.extract_strided_slice %359 {offsets = [0, 64], sizes = [2, 32], strides = [1, 1]} : vector<2x128xf32> to vector<2x32xf32>
    %363 = vector.extract_strided_slice %358 {offsets = [0, 96], sizes = [2, 32], strides = [1, 1]} : vector<2x128xf32> to vector<2x32xf32>
    %364 = arith.mulf %361, %328 : vector<2x32xf32>
    %365 = arith.mulf %360, %362 : vector<2x32xf32>
    %366 = arith.addf %364, %365 : vector<2x32xf32>
    %367 = math.tanh %366 : vector<2x32xf32>
    %368 = arith.mulf %363, %367 : vector<2x32xf32>
    %cst_66 = arith.constant dense<0.000000e+00> : vector<2x128xf32>
    %369 = tpu.matmul %368, %2, %cst_66 {dimension_numbers = #tpu.dot_dimension_numbers<[1], [0], [0], [1], [0, 0, 1, 1], [], []>} : vector<2x32xf32>, vector<32x128xf32>, vector<2x128xf32> -> vector<2x128xf32>
    %370 = arith.addf %369, %350 : vector<2x128xf32>
    %371 = arith.negf %370 : vector<2x128xf32>
    %372 = math.exp %371 : vector<2x128xf32>
    %cst_67 = arith.constant 1.000000e+00 : f32
    %373 = vector.broadcast %cst_67 : f32 to vector<2x128xf32>
    %374 = arith.addf %373, %372 : vector<2x128xf32>
    %375 = arith.divf %373, %374 : vector<2x128xf32>
    %376 = math.tanh %370 : vector<2x128xf32>
    %377 = vector.extract_strided_slice %375 {offsets = [0, 0], sizes = [2, 32], strides = [1, 1]} : vector<2x128xf32> to vector<2x32xf32>
    %378 = vector.extract_strided_slice %375 {offsets = [0, 32], sizes = [2, 32], strides = [1, 1]} : vector<2x128xf32> to vector<2x32xf32>
    %379 = vector.extract_strided_slice %376 {offsets = [0, 64], sizes = [2, 32], strides = [1, 1]} : vector<2x128xf32> to vector<2x32xf32>
    %380 = vector.extract_strided_slice %375 {offsets = [0, 96], sizes = [2, 32], strides = [1, 1]} : vector<2x128xf32> to vector<2x32xf32>
    %381 = arith.mulf %378, %345 : vector<2x32xf32>
    %382 = arith.mulf %377, %379 : vector<2x32xf32>
    %383 = arith.addf %381, %382 : vector<2x32xf32>
    %384 = math.tanh %383 : vector<2x32xf32>
    %385 = arith.mulf %380, %384 : vector<2x32xf32>
    %c2 = arith.constant 2 : index
    %c0_68 = arith.constant 0 : index
    %386 = vector.load %arg10[%c2, %c0_68] : memref<16x32xf32, #tpu.memory_space<vmem>>, vector<2x32xf32>
    tpu.vector_store %arg10[%c2, %c0_68], %385 {strides = array<i32>} : memref<16x32xf32, #tpu.memory_space<vmem>>, vector<2x32xf32>,
    %cst_69 = arith.constant dense<0.000000e+00> : vector<2x128xf32>
    %387 = tpu.matmul %385, %3, %cst_69 {dimension_numbers = #tpu.dot_dimension_numbers<[1], [0], [0], [1], [0, 0, 1, 1], [], []>} : vector<2x32xf32>, vector<32x128xf32>, vector<2x128xf32> -> vector<2x128xf32>
    %388 = arith.addf %387, %7 : vector<2x128xf32>
    %389 = vector.extract_strided_slice %13 {offsets = [20, 0], sizes = [2, 128], strides = [1, 1]} : vector<32x128xf32> to vector<2x128xf32>
    %cst_70 = arith.constant dense<0.000000e+00> : vector<2x128xf32>
    %390 = tpu.matmul %368, %1, %cst_70 {dimension_numbers = #tpu.dot_dimension_numbers<[1], [0], [0], [1], [0, 0, 1, 1], [], []>} : vector<2x32xf32>, vector<32x128xf32>, vector<2x128xf32> -> vector<2x128xf32>
    %391 = arith.addf %389, %390 : vector<2x128xf32>
    %392 = arith.negf %391 : vector<2x128xf32>
    %393 = math.exp %392 : vector<2x128xf32>
    %cst_71 = arith.constant 1.000000e+00 : f32
    %394 = vector.broadcast %cst_71 : f32 to vector<2x128xf32>
    %395 = arith.addf %394, %393 : vector<2x128xf32>
    %396 = arith.divf %394, %395 : vector<2x128xf32>
    %397 = math.tanh %391 : vector<2x128xf32>
    %398 = vector.extract_strided_slice %396 {offsets = [0, 0], sizes = [2, 32], strides = [1, 1]} : vector<2x128xf32> to vector<2x32xf32>
    %399 = vector.extract_strided_slice %396 {offsets = [0, 32], sizes = [2, 32], strides = [1, 1]} : vector<2x128xf32> to vector<2x32xf32>
    %400 = vector.extract_strided_slice %397 {offsets = [0, 64], sizes = [2, 32], strides = [1, 1]} : vector<2x128xf32> to vector<2x32xf32>
    %401 = vector.extract_strided_slice %396 {offsets = [0, 96], sizes = [2, 32], strides = [1, 1]} : vector<2x128xf32> to vector<2x32xf32>
    %402 = arith.mulf %399, %366 : vector<2x32xf32>
    %403 = arith.mulf %398, %400 : vector<2x32xf32>
    %404 = arith.addf %402, %403 : vector<2x32xf32>
    %405 = math.tanh %404 : vector<2x32xf32>
    %406 = arith.mulf %401, %405 : vector<2x32xf32>
    %cst_72 = arith.constant dense<0.000000e+00> : vector<2x128xf32>
    %407 = tpu.matmul %406, %2, %cst_72 {dimension_numbers = #tpu.dot_dimension_numbers<[1], [0], [0], [1], [0, 0, 1, 1], [], []>} : vector<2x32xf32>, vector<32x128xf32>, vector<2x128xf32> -> vector<2x128xf32>
    %408 = arith.addf %407, %388 : vector<2x128xf32>
    %409 = arith.negf %408 : vector<2x128xf32>
    %410 = math.exp %409 : vector<2x128xf32>
    %cst_73 = arith.constant 1.000000e+00 : f32
    %411 = vector.broadcast %cst_73 : f32 to vector<2x128xf32>
    %412 = arith.addf %411, %410 : vector<2x128xf32>
    %413 = arith.divf %411, %412 : vector<2x128xf32>
    %414 = math.tanh %408 : vector<2x128xf32>
    %415 = vector.extract_strided_slice %413 {offsets = [0, 0], sizes = [2, 32], strides = [1, 1]} : vector<2x128xf32> to vector<2x32xf32>
    %416 = vector.extract_strided_slice %413 {offsets = [0, 32], sizes = [2, 32], strides = [1, 1]} : vector<2x128xf32> to vector<2x32xf32>
    %417 = vector.extract_strided_slice %414 {offsets = [0, 64], sizes = [2, 32], strides = [1, 1]} : vector<2x128xf32> to vector<2x32xf32>
    %418 = vector.extract_strided_slice %413 {offsets = [0, 96], sizes = [2, 32], strides = [1, 1]} : vector<2x128xf32> to vector<2x32xf32>
    %419 = arith.mulf %416, %383 : vector<2x32xf32>
    %420 = arith.mulf %415, %417 : vector<2x32xf32>
    %421 = arith.addf %419, %420 : vector<2x32xf32>
    %422 = math.tanh %421 : vector<2x32xf32>
    %423 = arith.mulf %418, %422 : vector<2x32xf32>
    %c4 = arith.constant 4 : index
    %c0_74 = arith.constant 0 : index
    %424 = vector.load %arg10[%c4, %c0_74] : memref<16x32xf32, #tpu.memory_space<vmem>>, vector<2x32xf32>
    tpu.vector_store %arg10[%c4, %c0_74], %423 {strides = array<i32>} : memref<16x32xf32, #tpu.memory_space<vmem>>, vector<2x32xf32>,
    %cst_75 = arith.constant dense<0.000000e+00> : vector<2x128xf32>
    %425 = tpu.matmul %423, %3, %cst_75 {dimension_numbers = #tpu.dot_dimension_numbers<[1], [0], [0], [1], [0, 0, 1, 1], [], []>} : vector<2x32xf32>, vector<32x128xf32>, vector<2x128xf32> -> vector<2x128xf32>
    %426 = arith.addf %425, %7 : vector<2x128xf32>
    %427 = vector.extract_strided_slice %13 {offsets = [22, 0], sizes = [2, 128], strides = [1, 1]} : vector<32x128xf32> to vector<2x128xf32>
    %cst_76 = arith.constant dense<0.000000e+00> : vector<2x128xf32>
    %428 = tpu.matmul %406, %1, %cst_76 {dimension_numbers = #tpu.dot_dimension_numbers<[1], [0], [0], [1], [0, 0, 1, 1], [], []>} : vector<2x32xf32>, vector<32x128xf32>, vector<2x128xf32> -> vector<2x128xf32>
    %429 = arith.addf %427, %428 : vector<2x128xf32>
    %430 = arith.negf %429 : vector<2x128xf32>
    %431 = math.exp %430 : vector<2x128xf32>
    %cst_77 = arith.constant 1.000000e+00 : f32
    %432 = vector.broadcast %cst_77 : f32 to vector<2x128xf32>
    %433 = arith.addf %432, %431 : vector<2x128xf32>
    %434 = arith.divf %432, %433 : vector<2x128xf32>
    %435 = math.tanh %429 : vector<2x128xf32>
    %436 = vector.extract_strided_slice %434 {offsets = [0, 0], sizes = [2, 32], strides = [1, 1]} : vector<2x128xf32> to vector<2x32xf32>
    %437 = vector.extract_strided_slice %434 {offsets = [0, 32], sizes = [2, 32], strides = [1, 1]} : vector<2x128xf32> to vector<2x32xf32>
    %438 = vector.extract_strided_slice %435 {offsets = [0, 64], sizes = [2, 32], strides = [1, 1]} : vector<2x128xf32> to vector<2x32xf32>
    %439 = vector.extract_strided_slice %434 {offsets = [0, 96], sizes = [2, 32], strides = [1, 1]} : vector<2x128xf32> to vector<2x32xf32>
    %440 = arith.mulf %437, %404 : vector<2x32xf32>
    %441 = arith.mulf %436, %438 : vector<2x32xf32>
    %442 = arith.addf %440, %441 : vector<2x32xf32>
    %443 = math.tanh %442 : vector<2x32xf32>
    %444 = arith.mulf %439, %443 : vector<2x32xf32>
    %cst_78 = arith.constant dense<0.000000e+00> : vector<2x128xf32>
    %445 = tpu.matmul %444, %2, %cst_78 {dimension_numbers = #tpu.dot_dimension_numbers<[1], [0], [0], [1], [0, 0, 1, 1], [], []>} : vector<2x32xf32>, vector<32x128xf32>, vector<2x128xf32> -> vector<2x128xf32>
    %446 = arith.addf %445, %426 : vector<2x128xf32>
    %447 = arith.negf %446 : vector<2x128xf32>
    %448 = math.exp %447 : vector<2x128xf32>
    %cst_79 = arith.constant 1.000000e+00 : f32
    %449 = vector.broadcast %cst_79 : f32 to vector<2x128xf32>
    %450 = arith.addf %449, %448 : vector<2x128xf32>
    %451 = arith.divf %449, %450 : vector<2x128xf32>
    %452 = math.tanh %446 : vector<2x128xf32>
    %453 = vector.extract_strided_slice %451 {offsets = [0, 0], sizes = [2, 32], strides = [1, 1]} : vector<2x128xf32> to vector<2x32xf32>
    %454 = vector.extract_strided_slice %451 {offsets = [0, 32], sizes = [2, 32], strides = [1, 1]} : vector<2x128xf32> to vector<2x32xf32>
    %455 = vector.extract_strided_slice %452 {offsets = [0, 64], sizes = [2, 32], strides = [1, 1]} : vector<2x128xf32> to vector<2x32xf32>
    %456 = vector.extract_strided_slice %451 {offsets = [0, 96], sizes = [2, 32], strides = [1, 1]} : vector<2x128xf32> to vector<2x32xf32>
    %457 = arith.mulf %454, %421 : vector<2x32xf32>
    %458 = arith.mulf %453, %455 : vector<2x32xf32>
    %459 = arith.addf %457, %458 : vector<2x32xf32>
    %460 = math.tanh %459 : vector<2x32xf32>
    %461 = arith.mulf %456, %460 : vector<2x32xf32>
    %c6 = arith.constant 6 : index
    %c0_80 = arith.constant 0 : index
    %462 = vector.load %arg10[%c6, %c0_80] : memref<16x32xf32, #tpu.memory_space<vmem>>, vector<2x32xf32>
    tpu.vector_store %arg10[%c6, %c0_80], %461 {strides = array<i32>} : memref<16x32xf32, #tpu.memory_space<vmem>>, vector<2x32xf32>,
    %cst_81 = arith.constant dense<0.000000e+00> : vector<2x128xf32>
    %463 = tpu.matmul %461, %3, %cst_81 {dimension_numbers = #tpu.dot_dimension_numbers<[1], [0], [0], [1], [0, 0, 1, 1], [], []>} : vector<2x32xf32>, vector<32x128xf32>, vector<2x128xf32> -> vector<2x128xf32>
    %464 = arith.addf %463, %7 : vector<2x128xf32>
    %465 = vector.extract_strided_slice %13 {offsets = [24, 0], sizes = [2, 128], strides = [1, 1]} : vector<32x128xf32> to vector<2x128xf32>
    %cst_82 = arith.constant dense<0.000000e+00> : vector<2x128xf32>
    %466 = tpu.matmul %444, %1, %cst_82 {dimension_numbers = #tpu.dot_dimension_numbers<[1], [0], [0], [1], [0, 0, 1, 1], [], []>} : vector<2x32xf32>, vector<32x128xf32>, vector<2x128xf32> -> vector<2x128xf32>
    %467 = arith.addf %465, %466 : vector<2x128xf32>
    %468 = arith.negf %467 : vector<2x128xf32>
    %469 = math.exp %468 : vector<2x128xf32>
    %cst_83 = arith.constant 1.000000e+00 : f32
    %470 = vector.broadcast %cst_83 : f32 to vector<2x128xf32>
    %471 = arith.addf %470, %469 : vector<2x128xf32>
    %472 = arith.divf %470, %471 : vector<2x128xf32>
    %473 = math.tanh %467 : vector<2x128xf32>
    %474 = vector.extract_strided_slice %472 {offsets = [0, 0], sizes = [2, 32], strides = [1, 1]} : vector<2x128xf32> to vector<2x32xf32>
    %475 = vector.extract_strided_slice %472 {offsets = [0, 32], sizes = [2, 32], strides = [1, 1]} : vector<2x128xf32> to vector<2x32xf32>
    %476 = vector.extract_strided_slice %473 {offsets = [0, 64], sizes = [2, 32], strides = [1, 1]} : vector<2x128xf32> to vector<2x32xf32>
    %477 = vector.extract_strided_slice %472 {offsets = [0, 96], sizes = [2, 32], strides = [1, 1]} : vector<2x128xf32> to vector<2x32xf32>
    %478 = arith.mulf %475, %442 : vector<2x32xf32>
    %479 = arith.mulf %474, %476 : vector<2x32xf32>
    %480 = arith.addf %478, %479 : vector<2x32xf32>
    %481 = math.tanh %480 : vector<2x32xf32>
    %482 = arith.mulf %477, %481 : vector<2x32xf32>
    %cst_84 = arith.constant dense<0.000000e+00> : vector<2x128xf32>
    %483 = tpu.matmul %482, %2, %cst_84 {dimension_numbers = #tpu.dot_dimension_numbers<[1], [0], [0], [1], [0, 0, 1, 1], [], []>} : vector<2x32xf32>, vector<32x128xf32>, vector<2x128xf32> -> vector<2x128xf32>
    %484 = arith.addf %483, %464 : vector<2x128xf32>
    %485 = arith.negf %484 : vector<2x128xf32>
    %486 = math.exp %485 : vector<2x128xf32>
    %cst_85 = arith.constant 1.000000e+00 : f32
    %487 = vector.broadcast %cst_85 : f32 to vector<2x128xf32>
    %488 = arith.addf %487, %486 : vector<2x128xf32>
    %489 = arith.divf %487, %488 : vector<2x128xf32>
    %490 = math.tanh %484 : vector<2x128xf32>
    %491 = vector.extract_strided_slice %489 {offsets = [0, 0], sizes = [2, 32], strides = [1, 1]} : vector<2x128xf32> to vector<2x32xf32>
    %492 = vector.extract_strided_slice %489 {offsets = [0, 32], sizes = [2, 32], strides = [1, 1]} : vector<2x128xf32> to vector<2x32xf32>
    %493 = vector.extract_strided_slice %490 {offsets = [0, 64], sizes = [2, 32], strides = [1, 1]} : vector<2x128xf32> to vector<2x32xf32>
    %494 = vector.extract_strided_slice %489 {offsets = [0, 96], sizes = [2, 32], strides = [1, 1]} : vector<2x128xf32> to vector<2x32xf32>
    %495 = arith.mulf %492, %459 : vector<2x32xf32>
    %496 = arith.mulf %491, %493 : vector<2x32xf32>
    %497 = arith.addf %495, %496 : vector<2x32xf32>
    %498 = math.tanh %497 : vector<2x32xf32>
    %499 = arith.mulf %494, %498 : vector<2x32xf32>
    %c8 = arith.constant 8 : index
    %c0_86 = arith.constant 0 : index
    %500 = vector.load %arg10[%c8, %c0_86] : memref<16x32xf32, #tpu.memory_space<vmem>>, vector<2x32xf32>
    tpu.vector_store %arg10[%c8, %c0_86], %499 {strides = array<i32>} : memref<16x32xf32, #tpu.memory_space<vmem>>, vector<2x32xf32>,
    %cst_87 = arith.constant dense<0.000000e+00> : vector<2x128xf32>
    %501 = tpu.matmul %499, %3, %cst_87 {dimension_numbers = #tpu.dot_dimension_numbers<[1], [0], [0], [1], [0, 0, 1, 1], [], []>} : vector<2x32xf32>, vector<32x128xf32>, vector<2x128xf32> -> vector<2x128xf32>
    %502 = arith.addf %501, %7 : vector<2x128xf32>
    %503 = vector.extract_strided_slice %13 {offsets = [26, 0], sizes = [2, 128], strides = [1, 1]} : vector<32x128xf32> to vector<2x128xf32>
    %cst_88 = arith.constant dense<0.000000e+00> : vector<2x128xf32>
    %504 = tpu.matmul %482, %1, %cst_88 {dimension_numbers = #tpu.dot_dimension_numbers<[1], [0], [0], [1], [0, 0, 1, 1], [], []>} : vector<2x32xf32>, vector<32x128xf32>, vector<2x128xf32> -> vector<2x128xf32>
    %505 = arith.addf %503, %504 : vector<2x128xf32>
    %506 = arith.negf %505 : vector<2x128xf32>
    %507 = math.exp %506 : vector<2x128xf32>
    %cst_89 = arith.constant 1.000000e+00 : f32
    %508 = vector.broadcast %cst_89 : f32 to vector<2x128xf32>
    %509 = arith.addf %508, %507 : vector<2x128xf32>
    %510 = arith.divf %508, %509 : vector<2x128xf32>
    %511 = math.tanh %505 : vector<2x128xf32>
    %512 = vector.extract_strided_slice %510 {offsets = [0, 0], sizes = [2, 32], strides = [1, 1]} : vector<2x128xf32> to vector<2x32xf32>
    %513 = vector.extract_strided_slice %510 {offsets = [0, 32], sizes = [2, 32], strides = [1, 1]} : vector<2x128xf32> to vector<2x32xf32>
    %514 = vector.extract_strided_slice %511 {offsets = [0, 64], sizes = [2, 32], strides = [1, 1]} : vector<2x128xf32> to vector<2x32xf32>
    %515 = vector.extract_strided_slice %510 {offsets = [0, 96], sizes = [2, 32], strides = [1, 1]} : vector<2x128xf32> to vector<2x32xf32>
    %516 = arith.mulf %513, %480 : vector<2x32xf32>
    %517 = arith.mulf %512, %514 : vector<2x32xf32>
    %518 = arith.addf %516, %517 : vector<2x32xf32>
    %519 = math.tanh %518 : vector<2x32xf32>
    %520 = arith.mulf %515, %519 : vector<2x32xf32>
    %cst_90 = arith.constant dense<0.000000e+00> : vector<2x128xf32>
    %521 = tpu.matmul %520, %2, %cst_90 {dimension_numbers = #tpu.dot_dimension_numbers<[1], [0], [0], [1], [0, 0, 1, 1], [], []>} : vector<2x32xf32>, vector<32x128xf32>, vector<2x128xf32> -> vector<2x128xf32>
    %522 = arith.addf %521, %502 : vector<2x128xf32>
    %523 = arith.negf %522 : vector<2x128xf32>
    %524 = math.exp %523 : vector<2x128xf32>
    %cst_91 = arith.constant 1.000000e+00 : f32
    %525 = vector.broadcast %cst_91 : f32 to vector<2x128xf32>
    %526 = arith.addf %525, %524 : vector<2x128xf32>
    %527 = arith.divf %525, %526 : vector<2x128xf32>
    %528 = math.tanh %522 : vector<2x128xf32>
    %529 = vector.extract_strided_slice %527 {offsets = [0, 0], sizes = [2, 32], strides = [1, 1]} : vector<2x128xf32> to vector<2x32xf32>
    %530 = vector.extract_strided_slice %527 {offsets = [0, 32], sizes = [2, 32], strides = [1, 1]} : vector<2x128xf32> to vector<2x32xf32>
    %531 = vector.extract_strided_slice %528 {offsets = [0, 64], sizes = [2, 32], strides = [1, 1]} : vector<2x128xf32> to vector<2x32xf32>
    %532 = vector.extract_strided_slice %527 {offsets = [0, 96], sizes = [2, 32], strides = [1, 1]} : vector<2x128xf32> to vector<2x32xf32>
    %533 = arith.mulf %530, %497 : vector<2x32xf32>
    %534 = arith.mulf %529, %531 : vector<2x32xf32>
    %535 = arith.addf %533, %534 : vector<2x32xf32>
    %536 = math.tanh %535 : vector<2x32xf32>
    %537 = arith.mulf %532, %536 : vector<2x32xf32>
    %c10 = arith.constant 10 : index
    %c0_92 = arith.constant 0 : index
    %538 = vector.load %arg10[%c10, %c0_92] : memref<16x32xf32, #tpu.memory_space<vmem>>, vector<2x32xf32>
    tpu.vector_store %arg10[%c10, %c0_92], %537 {strides = array<i32>} : memref<16x32xf32, #tpu.memory_space<vmem>>, vector<2x32xf32>,
    %cst_93 = arith.constant dense<0.000000e+00> : vector<2x128xf32>
    %539 = tpu.matmul %537, %3, %cst_93 {dimension_numbers = #tpu.dot_dimension_numbers<[1], [0], [0], [1], [0, 0, 1, 1], [], []>} : vector<2x32xf32>, vector<32x128xf32>, vector<2x128xf32> -> vector<2x128xf32>
    %540 = arith.addf %539, %7 : vector<2x128xf32>
    %541 = vector.extract_strided_slice %13 {offsets = [28, 0], sizes = [2, 128], strides = [1, 1]} : vector<32x128xf32> to vector<2x128xf32>
    %cst_94 = arith.constant dense<0.000000e+00> : vector<2x128xf32>
    %542 = tpu.matmul %520, %1, %cst_94 {dimension_numbers = #tpu.dot_dimension_numbers<[1], [0], [0], [1], [0, 0, 1, 1], [], []>} : vector<2x32xf32>, vector<32x128xf32>, vector<2x128xf32> -> vector<2x128xf32>
    %543 = arith.addf %541, %542 : vector<2x128xf32>
    %544 = arith.negf %543 : vector<2x128xf32>
    %545 = math.exp %544 : vector<2x128xf32>
    %cst_95 = arith.constant 1.000000e+00 : f32
    %546 = vector.broadcast %cst_95 : f32 to vector<2x128xf32>
    %547 = arith.addf %546, %545 : vector<2x128xf32>
    %548 = arith.divf %546, %547 : vector<2x128xf32>
    %549 = math.tanh %543 : vector<2x128xf32>
    %550 = vector.extract_strided_slice %548 {offsets = [0, 0], sizes = [2, 32], strides = [1, 1]} : vector<2x128xf32> to vector<2x32xf32>
    %551 = vector.extract_strided_slice %548 {offsets = [0, 32], sizes = [2, 32], strides = [1, 1]} : vector<2x128xf32> to vector<2x32xf32>
    %552 = vector.extract_strided_slice %549 {offsets = [0, 64], sizes = [2, 32], strides = [1, 1]} : vector<2x128xf32> to vector<2x32xf32>
    %553 = vector.extract_strided_slice %548 {offsets = [0, 96], sizes = [2, 32], strides = [1, 1]} : vector<2x128xf32> to vector<2x32xf32>
    %554 = arith.mulf %551, %518 : vector<2x32xf32>
    %555 = arith.mulf %550, %552 : vector<2x32xf32>
    %556 = arith.addf %554, %555 : vector<2x32xf32>
    %557 = math.tanh %556 : vector<2x32xf32>
    %558 = arith.mulf %553, %557 : vector<2x32xf32>
    %cst_96 = arith.constant dense<0.000000e+00> : vector<2x128xf32>
    %559 = tpu.matmul %558, %2, %cst_96 {dimension_numbers = #tpu.dot_dimension_numbers<[1], [0], [0], [1], [0, 0, 1, 1], [], []>} : vector<2x32xf32>, vector<32x128xf32>, vector<2x128xf32> -> vector<2x128xf32>
    %560 = arith.addf %559, %540 : vector<2x128xf32>
    %561 = arith.negf %560 : vector<2x128xf32>
    %562 = math.exp %561 : vector<2x128xf32>
    %cst_97 = arith.constant 1.000000e+00 : f32
    %563 = vector.broadcast %cst_97 : f32 to vector<2x128xf32>
    %564 = arith.addf %563, %562 : vector<2x128xf32>
    %565 = arith.divf %563, %564 : vector<2x128xf32>
    %566 = math.tanh %560 : vector<2x128xf32>
    %567 = vector.extract_strided_slice %565 {offsets = [0, 0], sizes = [2, 32], strides = [1, 1]} : vector<2x128xf32> to vector<2x32xf32>
    %568 = vector.extract_strided_slice %565 {offsets = [0, 32], sizes = [2, 32], strides = [1, 1]} : vector<2x128xf32> to vector<2x32xf32>
    %569 = vector.extract_strided_slice %566 {offsets = [0, 64], sizes = [2, 32], strides = [1, 1]} : vector<2x128xf32> to vector<2x32xf32>
    %570 = vector.extract_strided_slice %565 {offsets = [0, 96], sizes = [2, 32], strides = [1, 1]} : vector<2x128xf32> to vector<2x32xf32>
    %571 = arith.mulf %568, %535 : vector<2x32xf32>
    %572 = arith.mulf %567, %569 : vector<2x32xf32>
    %573 = arith.addf %571, %572 : vector<2x32xf32>
    %574 = math.tanh %573 : vector<2x32xf32>
    %575 = arith.mulf %570, %574 : vector<2x32xf32>
    %c12 = arith.constant 12 : index
    %c0_98 = arith.constant 0 : index
    %576 = vector.load %arg10[%c12, %c0_98] : memref<16x32xf32, #tpu.memory_space<vmem>>, vector<2x32xf32>
    tpu.vector_store %arg10[%c12, %c0_98], %575 {strides = array<i32>} : memref<16x32xf32, #tpu.memory_space<vmem>>, vector<2x32xf32>,
    %cst_99 = arith.constant dense<0.000000e+00> : vector<2x128xf32>
    %577 = tpu.matmul %575, %3, %cst_99 {dimension_numbers = #tpu.dot_dimension_numbers<[1], [0], [0], [1], [0, 0, 1, 1], [], []>} : vector<2x32xf32>, vector<32x128xf32>, vector<2x128xf32> -> vector<2x128xf32>
    %578 = arith.addf %577, %7 : vector<2x128xf32>
    %579 = vector.extract_strided_slice %13 {offsets = [30, 0], sizes = [2, 128], strides = [1, 1]} : vector<32x128xf32> to vector<2x128xf32>
    %cst_100 = arith.constant dense<0.000000e+00> : vector<2x128xf32>
    %580 = tpu.matmul %558, %1, %cst_100 {dimension_numbers = #tpu.dot_dimension_numbers<[1], [0], [0], [1], [0, 0, 1, 1], [], []>} : vector<2x32xf32>, vector<32x128xf32>, vector<2x128xf32> -> vector<2x128xf32>
    %581 = arith.addf %579, %580 : vector<2x128xf32>
    %582 = arith.negf %581 : vector<2x128xf32>
    %583 = math.exp %582 : vector<2x128xf32>
    %cst_101 = arith.constant 1.000000e+00 : f32
    %584 = vector.broadcast %cst_101 : f32 to vector<2x128xf32>
    %585 = arith.addf %584, %583 : vector<2x128xf32>
    %586 = arith.divf %584, %585 : vector<2x128xf32>
    %587 = math.tanh %581 : vector<2x128xf32>
    %588 = vector.extract_strided_slice %586 {offsets = [0, 0], sizes = [2, 32], strides = [1, 1]} : vector<2x128xf32> to vector<2x32xf32>
    %589 = vector.extract_strided_slice %586 {offsets = [0, 32], sizes = [2, 32], strides = [1, 1]} : vector<2x128xf32> to vector<2x32xf32>
    %590 = vector.extract_strided_slice %587 {offsets = [0, 64], sizes = [2, 32], strides = [1, 1]} : vector<2x128xf32> to vector<2x32xf32>
    %591 = vector.extract_strided_slice %586 {offsets = [0, 96], sizes = [2, 32], strides = [1, 1]} : vector<2x128xf32> to vector<2x32xf32>
    %592 = arith.mulf %589, %556 : vector<2x32xf32>
    %593 = arith.mulf %588, %590 : vector<2x32xf32>
    %594 = arith.addf %592, %593 : vector<2x32xf32>
    %595 = math.tanh %594 : vector<2x32xf32>
    %596 = arith.mulf %591, %595 : vector<2x32xf32>
    %cst_102 = arith.constant dense<0.000000e+00> : vector<2x128xf32>
    %597 = tpu.matmul %596, %2, %cst_102 {dimension_numbers = #tpu.dot_dimension_numbers<[1], [0], [0], [1], [0, 0, 1, 1], [], []>} : vector<2x32xf32>, vector<32x128xf32>, vector<2x128xf32> -> vector<2x128xf32>
    %598 = arith.addf %597, %578 : vector<2x128xf32>
    %599 = arith.negf %598 : vector<2x128xf32>
    %600 = math.exp %599 : vector<2x128xf32>
    %cst_103 = arith.constant 1.000000e+00 : f32
    %601 = vector.broadcast %cst_103 : f32 to vector<2x128xf32>
    %602 = arith.addf %601, %600 : vector<2x128xf32>
    %603 = arith.divf %601, %602 : vector<2x128xf32>
    %604 = math.tanh %598 : vector<2x128xf32>
    %605 = vector.extract_strided_slice %603 {offsets = [0, 0], sizes = [2, 32], strides = [1, 1]} : vector<2x128xf32> to vector<2x32xf32>
    %606 = vector.extract_strided_slice %603 {offsets = [0, 32], sizes = [2, 32], strides = [1, 1]} : vector<2x128xf32> to vector<2x32xf32>
    %607 = vector.extract_strided_slice %604 {offsets = [0, 64], sizes = [2, 32], strides = [1, 1]} : vector<2x128xf32> to vector<2x32xf32>
    %608 = vector.extract_strided_slice %603 {offsets = [0, 96], sizes = [2, 32], strides = [1, 1]} : vector<2x128xf32> to vector<2x32xf32>
    %609 = arith.mulf %606, %573 : vector<2x32xf32>
    %610 = arith.mulf %605, %607 : vector<2x32xf32>
    %611 = arith.addf %609, %610 : vector<2x32xf32>
    %612 = math.tanh %611 : vector<2x32xf32>
    %613 = arith.mulf %608, %612 : vector<2x32xf32>
    %c14 = arith.constant 14 : index
    %c0_104 = arith.constant 0 : index
    %614 = vector.load %arg10[%c14, %c0_104] : memref<16x32xf32, #tpu.memory_space<vmem>>, vector<2x32xf32>
    tpu.vector_store %arg10[%c14, %c0_104], %613 {strides = array<i32>} : memref<16x32xf32, #tpu.memory_space<vmem>>, vector<2x32xf32>,
    %c0_105 = arith.constant 0 : index
    %c0_106 = arith.constant 0 : index
    %615 = vector.load %arg10[%c0_105, %c0_106] : memref<16x32xf32, #tpu.memory_space<vmem>>, vector<16x32xf32>
    %cst_107 = arith.constant dense<0.000000e+00> : vector<16x8xf32>
    %616 = tpu.matmul %615, %4, %cst_107 {dimension_numbers = #tpu.dot_dimension_numbers<[1], [0], [0], [1], [0, 0, 1, 1], [], []>} : vector<16x32xf32>, vector<32x8xf32>, vector<16x8xf32> -> vector<16x8xf32>
    %c0_108 = arith.constant 0 : index
    %c0_109 = arith.constant 0 : index
    %617 = vector.load %arg8[%c0_108, %c0_109] : memref<1x8xf32, #tpu.memory_space<vmem>>, vector<1x8xf32>
    %618 = vector.shape_cast %617 : vector<1x8xf32> to vector<1x8xf32>
    %619 = vector.broadcast %618 : vector<1x8xf32> to vector<16x8xf32>
    %620 = arith.addf %616, %619 : vector<16x8xf32>
    %c0_110 = arith.constant 0 : index
    %c0_111 = arith.constant 0 : index
    %621 = vector.load %arg9[%c0_110, %c0_111] : memref<16x8xf32, #tpu.memory_space<vmem>>, vector<16x8xf32>
    tpu.vector_store %arg9[%c0_110, %c0_111], %620 {strides = array<i32>} : memref<16x8xf32, #tpu.memory_space<vmem>>, vector<16x8xf32>,
    return
  }
}

</mosaic_0001>

<bundles_post_ra>
// kernel: tpu_custom_call.1
= control target key start
LH: loop header
LB: loop body
LE: loop exit
PB: predicated region body
PF: predicated region fallthrough
CT: control target
= control target key end

     0   :  { %14 = vsyncpa [#allocation4], 0  ;;  %s6206_s30 = smov [#allocation3]   ;;  %s7004_s0 = inlined_call_operand.vmem [shape: f32[32,8], index: 0, kind: input, shape index: {}]   ;;  %s7005_s1 = inlined_call_operand.hbm [shape: f32[8,128], index: 1, kind: input, shape index: {}]   ;;  %s7006_s2 = inlined_call_operand.vmem [shape: f32[32,128], index: 2, kind: input, shape index: {}]   ;;  %s7007_s3 = inlined_call_operand.vmem [shape: f32[1,128], index: 3, kind: input, shape index: {}]   ;;  %s7008_s4 = inlined_call_operand.vmem [shape: f32[32,128], index: 4, kind: input, shape index: {}]   ;;  %s7009_s5 = inlined_call_operand.vmem [shape: f32[32,128], index: 5, kind: input, shape index: {}]   ;;  %s7010_s6 = inlined_call_operand.vmem [shape: f32[1,128], index: 6, kind: input, shape index: {}]   ;;  %s7011_s7 = inlined_call_operand.vmem [shape: f32[32,8], index: 7, kind: input, shape index: {}]   ;;  %s7012_s8 = inlined_call_operand.vmem [shape: f32[1,8], index: 8, kind: input, shape index: {}]   ;;  %s7013_s9 = inlined_call_operand.vmem [shape: f32[16,8], index: 9, kind: output, shape index: {}]  }
   0x1   :  { %s23_s10 = sshll.u32 %s6206_s30, 4  ;;  %s6182_s13 = scalar_lea.hbm %s7005_s1, 128  ;;  %s24_s10 = int_to_ptr.vmem [resolvable:$true] %s23_s10 }
   0x2   :  { %p6183_p0 = scmp.ne.s32.totalorder %s7005_s1, %s6182_s13  ;;  %p6186_p1 = scmp.lt.u32.totalorder %s6182_s13, %s7005_s1 }
   0x4   :  { %p6188_p2 = pnand %p6186_p1, %p6183_p0 }
   0x6   :  { %6191 = shalt.err (!%p6188_p2)
}
   0x7   :  { %s6192_s18 = scalar_lea.vmem %s24_s10, 128  ;;  %p6197_p4 = scmp.lt.s32.totalorder %s24_s10, %s24_s10 }
   0x8   :  { %p6193_p3 = scmp.ne.s32.totalorder %s24_s10, %s6192_s18  ;;  %p6198_p5 = scmp.lt.s32.totalorder %s6192_s18, %s6192_s18 }
   0xa   :  { %p6199_p6 = por %p6198_p5, %p6197_p4 }
   0xc   :  { %p6200_p7 = pnand %p6199_p6, %p6193_p3 }
   0xe   :  { %6203 = shalt.err (!%p6200_p7)
}
   0xf   :  { %26 = dma.hbm_to_vmem [thread:$0]  %s7005_s1, 128, %s24_s10, [#allocation4]  }
  0x10   :  { %6204 = dma.done.wait [#allocation4], 128  }
  0x11   :  { %6205 = vsyncadd [#allocation4], 4294967168  ;;  %v6207_v0 = vmov 0.0|0.0   ;;  %vm6208_vm0 = vmmov 0   ;;  %v6209_v1 = vmov 0.0   ;;  %vm79_vm1 = vcmask 64512  }
  0x12   :  { %5575 = vmatprep.subr.bf16.mxu1 %v6207_v0  ;;  %5044 = vmatprep.mubr.msk.f32.mxu1 %vm6208_vm0, %v6209_v1  ;;  %v44_v2 = vld [vmem:[#allocation3] sm:$0xff]  ;;  %v68_v3 = vld [vmem:[%s7004_s0] sm:$0xff]  ;;  %v69_v4 = vld [vmem:[%s7004_s0 + $0x8] sm:$0xff]  ;;  %s6210_s15 = smov 64   ;;  %vm177_vm2 = vcmask 261120   ;;  %vm2649_vm3 = vcmask 254976  }
  0x13   :  { %5028 = vmatprep.subr.mxu0 %v44_v2  ;;  %5030 = vmatprep.mubr.msk.f32.mxu0 %vm79_vm1, %v68_v3  ;;  %v45_v5 = vld [vmem:[%s7006_s2] sm:$0xff]  ;;  %v46_v6 = vld [vmem:[%s7006_s2 + $0x8] sm:$0xff]  ;;  %v70_v7 = vld [vmem:[%s7004_s0 + $0x10] sm:$0xff] }
  0x14   :  { %5029 = vmatpush3.msra.mxu0 %v44_v2  ;;  %v6293_v8 = vpack.c.bf16 %v46_v6, %v45_v5  ;;  %v47_v9 = vld [vmem:[%s7006_s2 + $0x10] sm:$0xff]  ;;  %v48_v10 = vld [vmem:[%s7006_s2 + $0x18] sm:$0xff]  ;;  %v4691_v13 = vld [vmem:[%s7007_s3] ss:$0 sm:$0xff]  ;;  %s6211_s3 = smov 32  }
  0x15   :  { %5031 = vmatmul.mubr.msk.f32.vlgmr.msra.gmra.mrb[0].mxu0 %vm79_vm1, %v69_v4  ;;  %5581 = vmatprep.subr.bf16.mxu0 %v6207_v0  ;;  %v71_v11 = vld [vmem:[%s7004_s0 + $0x18] sm:$0xff]  ;;  %v6308_v12 = vpack.c.bf16 %v48_v10, %v47_v9  ;;  %v53_v35 = vld [vmem:[%s7009_s5] sm:$0xff]  ;;  %v54_v36 = vld [vmem:[%s7009_s5 + $0x8] sm:$0xff] }
  0x16   :  { %5583 = vmatpush3.bf16.msra.mxu0 %v6293_v8  ;;  %5033 = vmatprep.mubr.msk.f32.mxu0 %vm79_vm1, %v70_v7  ;;  %v55_v37 = vld [vmem:[%s7009_s5 + $0x10] sm:$0xff]  ;;  %v6345_v38 = vpack.c.bf16 %v54_v36, %v53_v35  ;;  %v56_v39 = vld [vmem:[%s7009_s5 + $0x18] sm:$0xff]  ;;  %v49_v41 = vld [vmem:[%s7008_s4] sm:$0xff] }
  0x17   :  { %5584 = vmatprep.subr.bf16.mxu0 %v6207_v0  ;;  %v6351_v40 = vpack.c.bf16 %v56_v39, %v55_v37  ;;  %v50_v42 = vld [vmem:[%s7008_s4 + $0x8] sm:$0xff]  ;;  %v51_v44 = vld [vmem:[%s7008_s4 + $0x10] sm:$0xff]  ;;  %v52_v45 = vld [vmem:[%s7008_s4 + $0x18] sm:$0xff] }
  0x18   :  { %5577 = vmatpush3.bf16.msra.mxu1 %v6345_v38  ;;  %v6363_v43 = vpack.c.bf16 %v50_v42, %v49_v41  ;;  %v6377_v47 = vpack.c.bf16 %v52_v45, %v51_v44  ;;  %v6402_v51 = vld [vmem:[%s7010_s6] ss:$0 sm:$0xff] }
  0x19   :  { %5034 = vmatmul.mubr.msk.f32.gmra.mrb[2].mxu0 %vm79_vm1, %v71_v11  ;;  %5578 = vmatprep.subr.bf16.mxu1 %v6207_v0 }
  0x1a   :  { %5586 = vmatpush3.bf16.msra.mxu0 %v6308_v12  ;;  %5055 = vmatprep.mubr.msk.f32.mxu0 %vm6208_vm0, %v6209_v1 }
  0x1b   :  { %5593 = vmatprep.subr.bf16.mxu0 %v6207_v0 }
  0x1c   :  { %5580 = vmatpush3.bf16.msra.mxu1 %v6351_v40 }
  0x1d   :  { %5056 = vmatmul.mubr.f32.vlgmr.msra.gmra.mrb[4].mxu0 %v6209_v1  ;;  %5587 = vmatprep.subr.bf16.mxu1 %v6207_v0 }
  0x1e   :  { %5077 = vmatprep.mubr.msk.f32.mxu0 %vm6208_vm0, %v6209_v1  ;;  %5595 = vmatpush3.bf16.msra.mxu0 %v6345_v38 }
  0x1f   :  { %5596 = vmatprep.subr.bf16.mxu0 %v6207_v0  ;;  %5045 = vmatmul.mubr.f32.vlgmr.msra.gmra.mrb[0].mxu1 %v6209_v1 }
  0x20   :  { %5589 = vmatpush3.bf16.msra.mxu1 %v6363_v43  ;;  %5066 = vmatprep.mubr.msk.f32.mxu1 %vm6208_vm0, %v6209_v1 }
  0x21   :  { %5590 = vmatprep.subr.bf16.mxu1 %v6207_v0 }
  0x22   :  { %5598 = vmatpush3.bf16.msra.mxu0 %v6351_v40 }
  0x23   :  { %5605 = vmatprep.subr.bf16.mxu0 %v6207_v0 }
  0x24   :  { %5592 = vmatpush3.bf16.msra.mxu1 %v6377_v47 }
  0x25   :  { %5599 = vmatprep.subr.bf16.mxu1 %v6207_v0 }
  0xe8   :  { %v5032_v14 = vpop.f32.mrb[0].mxu0 }
  0xe9   :  { %v6322_v15 = vadd.f32 %v5032_v14, %v4691_v13  ;;  %v158_v16 = vpop.f32.mrb[1].mxu0 }
  0xea   :  { %v6328_v21 = vadd.f32 %v4691_v13, %v158_v16 }
  0xec   :  { %v5035_v17 = vpop.f32.mrb[2].mxu0 }
  0xed   :  { %v6324_v18 = vadd.f32 %v5035_v17, %v4691_v13  ;;  %v168_v19 = vpop.f32.mrb[3].mxu0 }
  0xee   :  { %v6326_v20 = vadd.f32 %v4691_v13, %v168_v19 }
  0xf0   :  { %v317_v22 = vpop.f32.mrb[4].mxu0 }
  0xf1   :  { %v321_v23 = vadd.f32 %v317_v22, %v6328_v21  ;;  %v5057_v24 = vpop.f32.mrb[5].mxu0 }
  0xf3   :  { %5925 = vtanh.f32 %v321_v23  ;;  %v4696_v26 = vmul.f32 -1.442695, %v321_v23 }
  0xf5   :  { %5927 = vpow2.f32 %v4696_v26 }
  0xfd   :  { %v5926_v25 = vpop.eup %5925 }
  0xfe   :  { %331 = vrot.lane.b32.xlu0 %v5926_v25, %s6210_s15 }
  0xff   :  { %v5928_v27 = vpop.eup %5927 }
 0x100   :  { %v325_v28 = vadd.f32 1.0, %v5928_v27 }
 0x102   :  { %5929 = vrcp.f32 %v325_v28 }
 0x10c   :  { %v5930_v29 = vpop.eup %5929 }
 0x10d   :  { %v329_v32 = vmul.f32 0.0, %v5930_v29 }
 0x170   :  { %v332_v30 = vpop.permute.xlu0 %331 }
 0x171   :  { %v334_v31 = vmul.f32 %v5930_v29, %v332_v30 }
 0x173   :  { %336 = vrot.lane.b32.xlu0 %v334_v31, %s6211_s3 }
 0x1e5   :  { %v337_v33 = vpop.permute.xlu0 %336 }
 0x1e6   :  { %v6333_v34 = vadd.f32 %v337_v33, %v329_v32 }
 0x1e8   :  { %5931 = vtanh.f32 %v6333_v34  ;;  %v602_v17 = vrot.slane %v6333_v34, 6 }
 0x1f2   :  { %v5932_v46 = vpop.eup %5931 }
 0x1f3   :  { %342 = vrot.lane.b32.xlu1 %v5932_v46, %s6210_s15 }
 0x265   :  { %v343_v48 = vpop.permute.xlu1 %342 }
 0x266   :  { %v345_v49 = vmul.f32 %v5930_v29, %v343_v48 }
 0x268   :  { %347 = vrot.lane.b32.xlu1 %v345_v49, %s6211_s3 }
 0x2da   :  { %v348_v50 = vpop.permute.xlu1 %347 }
 0x2db   :  { %5067 = vmatmul.mubr.msk.f32.vlgmr.msra.gmra.mrb[0].mxu1 %vm177_vm2, %v348_v50 }
 0x2dc   :  { %5601 = vmatpush3.bf16.msra.mxu1 %v6293_v8  ;;  %5088 = vmatprep.mubr.msk.f32.mxu1 %vm6208_vm0, %v6209_v1 }
 0x2dd   :  { %5602 = vmatprep.subr.bf16.mxu1 %v6207_v0 }
 0x2e0   :  { %5604 = vmatpush3.bf16.msra.mxu1 %v6308_v12 }
 0x2e1   :  { %5611 = vmatprep.subr.bf16.mxu1 %v6207_v0 }
 0x2e3   :  { %5089 = vmatmul.mubr.msk.f32.vlgmr.msra.gmra.mrb[2].mxu1 %vm177_vm2, %v348_v50 }
 0x2e4   :  { %5613 = vmatpush3.bf16.msra.mxu1 %v6345_v38  ;;  %5110 = vmatprep.mubr.msk.f32.mxu1 %vm6208_vm0, %v6209_v1 }
 0x2e5   :  { %5614 = vmatprep.subr.bf16.mxu1 %v6207_v0 }
 0x2e8   :  { %5616 = vmatpush3.bf16.msra.mxu1 %v6351_v40 }
 0x2e9   :  { %5623 = vmatprep.subr.bf16.mxu1 %v6207_v0 }
 0x3ae   :  { %v417_v52 = vpop.f32.mrb[0].mxu1 }
 0x3af   :  { %v5871_v53 = vadd.f32 %v6402_v51, %v417_v52  ;;  %v5068_v54 = vpop.f32.mrb[1].mxu1 }
 0x3b1   :  { %5933 = vtanh.f32 %v5871_v53  ;;  %v4698_v61 = vmul.f32 -1.442695, %v5871_v53 }
 0x3b6   :  { %v586_v55 = vpop.f32.mrb[2].mxu1 }
 0x3b7   :  { %v591_v56 = vrot.slane %v586_v55, 6  ;;  %v5090_v57 = vpop.f32.mrb[3].mxu1 }
 0x3b9   :  { %v593_v58 = vadd.f32 %v591_v56, %v6328_v21 }
 0x3bb   :  { %v5934_v59 = vpop.eup %5933  ;;  %5935 = vtanh.f32 %v593_v58  ;;  %v4701_v62 = vmul.f32 -1.442695, %v593_v58 }
 0x3bc   :  { %430 = vrot.lane.b32.xlu0 %v5934_v59, %s6210_s15  ;;  %5937 = vpow2.f32 %v4698_v61 }
 0x3bd   :  { %5939 = vpow2.f32 %v4701_v62 }
 0x3c5   :  { %v5936_v60 = vpop.eup %5935 }
 0x3c6   :  { %606 = vrot.lane.b32.xlu1 %v5936_v60, %s6210_s15  ;;  %v5938_v63 = vpop.eup %5937 }
 0x3c7   :  { %v424_v2 = vadd.f32 1.0, %v5938_v63  ;;  %v5940_v3 = vpop.eup %5939 }
 0x3c8   :  { %v597_v4 = vadd.f32 1.0, %v5940_v3 }
 0x3c9   :  { %5941 = vrcp.f32 %v424_v2 }
 0x3ca   :  { %5943 = vrcp.f32 %v597_v4 }
 0x3d3   :  { %v5942_v5 = vpop.eup %5941 }
 0x3d4   :  { %v5944_v9 = vpop.eup %5943  ;;  %v428_v13 = vmul.f32 0.0, %v5942_v5 }
 0x3d5   :  { %v604_v19 = vmul.f32 %v5944_v9, %v602_v17 }
 0x42e   :  { %v431_v6 = vpop.permute.xlu0 %430 }
 0x42f   :  { %v433_v7 = vmul.f32 %v5942_v5, %v431_v6 }
 0x431   :  { %435 = vrot.lane.b32.xlu0 %v433_v7, %s6211_s3 }
 0x438   :  { %v607_v10 = vpop.permute.xlu1 %606 }
 0x439   :  { %v609_v11 = vmul.f32 %v5944_v9, %v607_v10 }
 0x43b   :  { %611 = vrot.lane.b32.xlu1 %v609_v11, %s6211_s3 }
 0x4a3   :  { %v436_v14 = vpop.permute.xlu0 %435 }
 0x4a4   :  { %v6410_v16 = vadd.f32 %v436_v14, %v428_v13 }
 0x4a6   :  { %5945 = vtanh.f32 %v6410_v16 }
 0x4ad   :  { %v612_v22 = vpop.permute.xlu1 %611 }
 0x4ae   :  { %v6414_v23 = vadd.f32 %v612_v22, %v604_v19 }
 0x4b0   :  { %v5946_v24 = vpop.eup %5945  ;;  %5947 = vtanh.f32 %v6414_v23  ;;  %v878_v62 = vrot.slane %v6414_v23, 6 }
 0x4b1   :  { %441 = vrot.lane.b32.xlu0 %v5946_v24, %s6210_s15 }
 0x4ba   :  { %v5948_v25 = vpop.eup %5947 }
 0x4bb   :  { %617 = vrot.lane.b32.xlu1 %v5948_v25, %s6210_s15 }
 0x523   :  { %v442_v26 = vpop.permute.xlu0 %441 }
 0x524   :  { %v444_v27 = vmul.f32 %v5942_v5, %v442_v26 }
 0x526   :  { %446 = vrot.lane.b32.xlu0 %v444_v27, %s6211_s3 }
 0x52d   :  { %v618_v28 = vpop.permute.xlu1 %617 }
 0x52e   :  { %v620_v29 = vmul.f32 %v5944_v9, %v618_v28 }
 0x530   :  { %v622_v30 = vrot.slane %v620_v29, 2 }
 0x532   :  { %623 = vrot.lane.b32.xlu1 %v622_v30, %s6211_s3 }
 0x598   :  { %v447_v31 = vpop.permute.xlu0 %446 }
 0x599   :  { %5078 = vmatmul.mubr.msk.f32.vlgmr.msra.gmra.mrb[6].mxu0 %vm177_vm2, %v447_v31 }
 0x59a   :  { %5607 = vmatpush3.bf16.msra.mxu0 %v6363_v43  ;;  %5099 = vmatprep.mubr.msk.f32.mxu0 %vm6208_vm0, %v6209_v1 }
 0x59b   :  { %5608 = vmatprep.subr.bf16.mxu0 %v6207_v0 }
 0x59e   :  { %5610 = vmatpush3.bf16.msra.mxu0 %v6377_v47 }
 0x59f   :  { %5617 = vmatprep.subr.bf16.mxu0 %v6207_v0 }
 0x5a4   :  { %v624_v32 = vpop.permute.xlu1 %623 }
 0x5a5   :  { %5100 = vmatmul.mubr.msk.f32.vlgmr.msra.gmra.mrb[6].mxu0 %vm177_vm2, %v624_v32 }
 0x5a6   :  { %5619 = vmatpush3.bf16.msra.mxu0 %v6293_v8  ;;  %5121 = vmatprep.mubr.msk.f32.mxu0 %vm6208_vm0, %v6209_v1 }
 0x5a7   :  { %5620 = vmatprep.subr.bf16.mxu0 %v6207_v0 }
 0x5aa   :  { %5622 = vmatpush3.bf16.msra.mxu0 %v6308_v12 }
 0x5ab   :  { %5629 = vmatprep.subr.bf16.mxu0 %v6207_v0 }
 0x5ad   :  { %5122 = vmatmul.mubr.msk.f32.vlgmr.msra.gmra.mrb[8].mxu0 %vm177_vm2, %v624_v32 }
 0x5ae   :  { %5631 = vmatpush3.bf16.msra.mxu0 %v6345_v38  ;;  %5143 = vmatprep.mubr.msk.f32.mxu0 %vm6208_vm0, %v6209_v1 }
 0x5af   :  { %5632 = vmatprep.subr.bf16.mxu0 %v6207_v0 }
 0x5b2   :  { %5634 = vmatpush3.bf16.msra.mxu0 %v6351_v40 }
 0x5b3   :  { %5641 = vmatprep.subr.bf16.mxu0 %v6207_v0 }
 0x678   :  { %v693_v33 = vpop.f32.mrb[6].mxu0 }
 0x679   :  { %v5872_v34 = vadd.f32 %v6402_v51, %v693_v33  ;;  %v5101_v35 = vpop.f32.mrb[7].mxu0 }
 0x67b   :  { %5949 = vtanh.f32 %v5872_v34  ;;  %v4703_v45 = vmul.f32 -1.442695, %v5872_v34 }
 0x680   :  { %v862_v36 = vpop.f32.mrb[8].mxu0 }
 0x681   :  { %v867_v37 = vrot.slane %v862_v36, 4  ;;  %v5123_v39 = vpop.f32.mrb[9].mxu0 }
 0x683   :  { %v869_v41 = vadd.f32 %v867_v37, %v6328_v21 }
 0x685   :  { %v5950_v42 = vpop.eup %5949  ;;  %5951 = vtanh.f32 %v869_v41  ;;  %v4706_v46 = vmul.f32 -1.442695, %v869_v41 }
 0x686   :  { %706 = vrot.lane.b32.xlu0 %v5950_v42, %s6210_s15  ;;  %5953 = vpow2.f32 %v4703_v45 }
 0x687   :  { %5955 = vpow2.f32 %v4706_v46 }
 0x68f   :  { %v5952_v44 = vpop.eup %5951 }
 0x690   :  { %882 = vrot.lane.b32.xlu1 %v5952_v44, %s6210_s15  ;;  %v5954_v48 = vpop.eup %5953 }
 0x691   :  { %v700_v49 = vadd.f32 1.0, %v5954_v48  ;;  %v5956_v50 = vpop.eup %5955 }
 0x692   :  { %v873_v52 = vadd.f32 1.0, %v5956_v50 }
 0x693   :  { %5957 = vrcp.f32 %v700_v49 }
 0x694   :  { %5959 = vrcp.f32 %v873_v52 }
 0x69d   :  { %v5958_v53 = vpop.eup %5957 }
 0x69e   :  { %v5960_v56 = vpop.eup %5959  ;;  %v704_v59 = vmul.f32 %v5958_v53, %v6410_v16 }
 0x69f   :  { %v880_v63 = vmul.f32 %v5960_v56, %v878_v62 }
 0x6f8   :  { %v707_v54 = vpop.permute.xlu0 %706 }
 0x6f9   :  { %v709_v55 = vmul.f32 %v5958_v53, %v707_v54 }
 0x6fb   :  { %711 = vrot.lane.b32.xlu0 %v709_v55, %s6211_s3 }
 0x702   :  { %v883_v57 = vpop.permute.xlu1 %882 }
 0x703   :  { %v885_v58 = vmul.f32 %v5960_v56, %v883_v57 }
 0x705   :  { %887 = vrot.lane.b32.xlu1 %v885_v58, %s6211_s3 }
 0x76d   :  { %v712_v60 = vpop.permute.xlu0 %711 }
 0x76e   :  { %v6449_v61 = vadd.f32 %v712_v60, %v704_v59 }
 0x770   :  { %5961 = vtanh.f32 %v6449_v61 }
 0x777   :  { %v888_v2 = vpop.permute.xlu1 %887 }
 0x778   :  { %v6453_v3 = vadd.f32 %v888_v2, %v880_v63 }
 0x77a   :  { %v5962_v4 = vpop.eup %5961  ;;  %5963 = vtanh.f32 %v6453_v3  ;;  %v1154_v45 = vrot.slane %v6453_v3, 6 }
 0x77b   :  { %717 = vrot.lane.b32.xlu0 %v5962_v4, %s6210_s15 }
 0x784   :  { %v5964_v5 = vpop.eup %5963 }
 0x785   :  { %893 = vrot.lane.b32.xlu1 %v5964_v5, %s6210_s15 }
 0x7ed   :  { %v718_v6 = vpop.permute.xlu0 %717 }
 0x7ee   :  { %v720_v7 = vmul.f32 %v5958_v53, %v718_v6 }
 0x7f0   :  { %722 = vrot.lane.b32.xlu0 %v720_v7, %s6211_s3 }
 0x7f7   :  { %v894_v9 = vpop.permute.xlu1 %893 }
 0x7f8   :  { %v896_v10 = vmul.f32 %v5960_v56, %v894_v9 }
 0x7fa   :  { %v898_v11 = vrot.slane %v896_v10, 4 }
 0x7fc   :  { %899 = vrot.lane.b32.xlu1 %v898_v11, %s6211_s3 }
 0x862   :  { %v723_v13 = vpop.permute.xlu0 %722 }
 0x863   :  { %5111 = vmatmul.mubr.msk.f32.vlgmr.msra.gmra.mrb[4].mxu1 %vm177_vm2, %v723_v13 }
 0x864   :  { %5625 = vmatpush3.bf16.msra.mxu1 %v6363_v43  ;;  %5132 = vmatprep.mubr.msk.f32.mxu1 %vm6208_vm0, %v6209_v1 }
 0x865   :  { %5626 = vmatprep.subr.bf16.mxu1 %v6207_v0 }
 0x868   :  { %5628 = vmatpush3.bf16.msra.mxu1 %v6377_v47 }
 0x869   :  { %5635 = vmatprep.subr.bf16.mxu1 %v6207_v0 }
 0x86e   :  { %v900_v14 = vpop.permute.xlu1 %899 }
 0x86f   :  { %5133 = vmatmul.mubr.msk.f32.vlgmr.msra.gmra.mrb[4].mxu1 %vm177_vm2, %v900_v14 }
 0x870   :  { %5637 = vmatpush3.bf16.msra.mxu1 %v6293_v8  ;;  %5154 = vmatprep.mubr.msk.f32.mxu1 %vm6208_vm0, %v6209_v1 }
 0x871   :  { %5638 = vmatprep.subr.bf16.mxu1 %v6207_v0 }
 0x874   :  { %5640 = vmatpush3.bf16.msra.mxu1 %v6308_v12 }
 0x875   :  { %5647 = vmatprep.subr.bf16.mxu1 %v6207_v0 }
 0x877   :  { %5155 = vmatmul.mubr.msk.f32.vlgmr.msra.gmra.mrb[6].mxu1 %vm177_vm2, %v900_v14 }
 0x878   :  { %5649 = vmatpush3.bf16.msra.mxu1 %v6345_v38  ;;  %5176 = vmatprep.mubr.msk.f32.mxu1 %vm6208_vm0, %v6209_v1 }
 0x879   :  { %5650 = vmatprep.subr.bf16.mxu1 %v6207_v0 }
 0x87c   :  { %5652 = vmatpush3.bf16.msra.mxu1 %v6351_v40 }
 0x87d   :  { %5659 = vmatprep.subr.bf16.mxu1 %v6207_v0 }
 0x942   :  { %v969_v16 = vpop.f32.mrb[4].mxu1 }
 0x943   :  { %v5873_v17 = vadd.f32 %v6402_v51, %v969_v16  ;;  %v5134_v19 = vpop.f32.mrb[5].mxu1 }
 0x945   :  { %5965 = vtanh.f32 %v5873_v17  ;;  %v4708_v28 = vmul.f32 -1.442695, %v5873_v17 }
 0x94a   :  { %v1138_v22 = vpop.f32.mrb[6].mxu1 }
 0x94b   :  { %v1143_v23 = vrot.slane %v1138_v22, 2  ;;  %v5156_v24 = vpop.f32.mrb[7].mxu1 }
 0x94d   :  { %v1145_v25 = vadd.f32 %v1143_v23, %v6328_v21 }
 0x94f   :  { %v5966_v26 = vpop.eup %5965  ;;  %5967 = vtanh.f32 %v1145_v25  ;;  %v4711_v29 = vmul.f32 -1.442695, %v1145_v25 }
 0x950   :  { %982 = vrot.lane.b32.xlu0 %v5966_v26, %s6210_s15  ;;  %5969 = vpow2.f32 %v4708_v28 }
 0x951   :  { %5971 = vpow2.f32 %v4711_v29 }
 0x959   :  { %v5968_v27 = vpop.eup %5967 }
 0x95a   :  { %1158 = vrot.lane.b32.xlu1 %v5968_v27, %s6210_s15  ;;  %v5970_v30 = vpop.eup %5969 }
 0x95b   :  { %v976_v31 = vadd.f32 1.0, %v5970_v30  ;;  %v5972_v32 = vpop.eup %5971 }
 0x95c   :  { %v1149_v33 = vadd.f32 1.0, %v5972_v32 }
 0x95d   :  { %5973 = vrcp.f32 %v976_v31 }
 0x95e   :  { %5975 = vrcp.f32 %v1149_v33 }
 0x967   :  { %v5974_v34 = vpop.eup %5973 }
 0x968   :  { %v5976_v36 = vpop.eup %5975  ;;  %v980_v41 = vmul.f32 %v5974_v34, %v6449_v61 }
 0x969   :  { %v1156_v46 = vmul.f32 %v5976_v36, %v1154_v45 }
 0x9c2   :  { %v983_v35 = vpop.permute.xlu0 %982 }
 0x9c3   :  { %v985_v21 = vmul.f32 %v5974_v34, %v983_v35 }
 0x9c5   :  { %987 = vrot.lane.b32.xlu0 %v985_v21, %s6211_s3 }
 0x9cc   :  { %v1159_v37 = vpop.permute.xlu1 %1158 }
 0x9cd   :  { %v1161_v39 = vmul.f32 %v5976_v36, %v1159_v37 }
 0x9cf   :  { %1163 = vrot.lane.b32.xlu1 %v1161_v39, %s6211_s3 }
 0xa37   :  { %v988_v42 = vpop.permute.xlu0 %987 }
 0xa38   :  { %v6488_v44 = vadd.f32 %v988_v42, %v980_v41 }
 0xa3a   :  { %5977 = vtanh.f32 %v6488_v44 }
 0xa41   :  { %v1164_v48 = vpop.permute.xlu1 %1163 }
 0xa42   :  { %v6492_v49 = vadd.f32 %v1164_v48, %v1156_v46 }
 0xa44   :  { %v5978_v50 = vpop.eup %5977  ;;  %5979 = vtanh.f32 %v6492_v49  ;;  %v1427_v27 = vrot.slane %v6492_v49, 6 }
 0xa45   :  { %993 = vrot.lane.b32.xlu0 %v5978_v50, %s6210_s15 }
 0xa4e   :  { %v5980_v52 = vpop.eup %5979 }
 0xa4f   :  { %1169 = vrot.lane.b32.xlu1 %v5980_v52, %s6210_s15 }
 0xab7   :  { %v994_v53 = vpop.permute.xlu0 %993 }
 0xab8   :  { %v996_v54 = vmul.f32 %v5974_v34, %v994_v53 }
 0xaba   :  { %998 = vrot.lane.b32.xlu0 %v996_v54, %s6211_s3 }
 0xac1   :  { %v1170_v55 = vpop.permute.xlu1 %1169 }
 0xac2   :  { %v1172_v56 = vmul.f32 %v5976_v36, %v1170_v55 }
 0xac4   :  { %v1174_v57 = vrot.slane %v1172_v56, 6 }
 0xac6   :  { %1175 = vrot.lane.b32.xlu1 %v1174_v57, %s6211_s3 }
 0xb2c   :  { %v999_v58 = vpop.permute.xlu0 %998 }
 0xb2d   :  { %5144 = vmatmul.mubr.msk.f32.vlgmr.msra.gmra.mrb[10].mxu0 %vm177_vm2, %v999_v58 }
 0xb2e   :  { %5643 = vmatpush3.bf16.msra.mxu0 %v6363_v43  ;;  %5165 = vmatprep.mubr.msk.f32.mxu0 %vm6208_vm0, %v6209_v1 }
 0xb2f   :  { %5644 = vmatprep.subr.bf16.mxu0 %v6207_v0 }
 0xb32   :  { %5646 = vmatpush3.bf16.msra.mxu0 %v6377_v47 }
 0xb33   :  { %5653 = vmatprep.subr.bf16.mxu0 %v6207_v0 }
 0xb38   :  { %v1176_v59 = vpop.permute.xlu1 %1175 }
 0xb39   :  { %5166 = vmatmul.mubr.msk.f32.vlgmr.msra.gmra.mrb[10].mxu0 %vm177_vm2, %v1176_v59 }
 0xb3a   :  { %5655 = vmatpush3.bf16.msra.mxu0 %v6293_v8  ;;  %5187 = vmatprep.mubr.msk.f32.mxu0 %vm6208_vm0, %v6209_v1 }
 0xb3b   :  { %5656 = vmatprep.subr.bf16.mxu0 %v6207_v0 }
 0xb3e   :  { %5658 = vmatpush3.bf16.msra.mxu0 %v6308_v12 }
 0xb3f   :  { %5665 = vmatprep.subr.bf16.mxu0 %v6207_v0 }
 0xb41   :  { %5188 = vmatmul.mubr.msk.f32.vlgmr.msra.gmra.mrb[12].mxu0 %vm177_vm2, %v1176_v59 }
 0xb42   :  { %5667 = vmatpush3.bf16.msra.mxu0 %v6345_v38  ;;  %5209 = vmatprep.mubr.msk.f32.mxu0 %vm6208_vm0, %v6209_v1 }
 0xb43   :  { %5668 = vmatprep.subr.bf16.mxu0 %v6207_v0 }
 0xb46   :  { %5670 = vmatpush3.bf16.msra.mxu0 %v6351_v40 }
 0xb47   :  { %5677 = vmatprep.subr.bf16.mxu0 %v6207_v0 }
 0xc0c   :  { %v1245_v60 = vpop.f32.mrb[10].mxu0 }
 0xc0d   :  { %v5874_v61 = vadd.f32 %v6402_v51, %v1245_v60  ;;  %v5167_v62 = vpop.f32.mrb[11].mxu0 }
 0xc0f   :  { %5981 = vtanh.f32 %v5874_v61  ;;  %v4713_v6 = vmul.f32 -1.442695, %v5874_v61 }
 0xc14   :  { %v1414_v63 = vpop.f32.mrb[12].mxu0 }
 0xc15   :  { %v1418_v2 = vadd.f32 %v1414_v63, %v6322_v15  ;;  %v5189_v3 = vpop.f32.mrb[13].mxu0 }
 0xc17   :  { %5983 = vtanh.f32 %v1418_v2  ;;  %v4716_v7 = vmul.f32 -1.442695, %v1418_v2 }
 0xc18   :  { %5985 = vpow2.f32 %v4713_v6 }
 0xc19   :  { %v5982_v4 = vpop.eup %5981  ;;  %5987 = vpow2.f32 %v4716_v7 }
 0xc1a   :  { %1258 = vrot.lane.b32.xlu0 %v5982_v4, %s6210_s15 }
 0xc21   :  { %v5984_v5 = vpop.eup %5983 }
 0xc22   :  { %1431 = vrot.lane.b32.xlu1 %v5984_v5, %s6210_s15  ;;  %v5986_v9 = vpop.eup %5985 }
 0xc23   :  { %v1252_v10 = vadd.f32 1.0, %v5986_v9  ;;  %v5988_v11 = vpop.eup %5987 }
 0xc24   :  { %v1422_v13 = vadd.f32 1.0, %v5988_v11 }
 0xc25   :  { %5989 = vrcp.f32 %v1252_v10 }
 0xc26   :  { %5991 = vrcp.f32 %v1422_v13 }
 0xc2f   :  { %v5990_v14 = vpop.eup %5989 }
 0xc30   :  { %v5992_v19 = vpop.eup %5991  ;;  %v1256_v24 = vmul.f32 %v5990_v14, %v6488_v44 }
 0xc31   :  { %v1429_v28 = vmul.f32 %v5992_v19, %v1427_v27 }
 0xc8c   :  { %v1259_v16 = vpop.permute.xlu0 %1258 }
 0xc8d   :  { %v1261_v17 = vmul.f32 %v5990_v14, %v1259_v16 }
 0xc8f   :  { %1263 = vrot.lane.b32.xlu0 %v1261_v17, %s6211_s3 }
 0xc94   :  { %v1432_v22 = vpop.permute.xlu1 %1431 }
 0xc95   :  { %v1434_v23 = vmul.f32 %v5992_v19, %v1432_v22 }
 0xc97   :  { %1436 = vrot.lane.b32.xlu1 %v1434_v23, %s6211_s3 }
 0xd01   :  { %v1264_v25 = vpop.permute.xlu0 %1263 }
 0xd02   :  { %v6527_v26 = vadd.f32 %v1264_v25, %v1256_v24 }
 0xd04   :  { %5993 = vtanh.f32 %v6527_v26 }
 0xd09   :  { %v1437_v29 = vpop.permute.xlu1 %1436 }
 0xd0a   :  { %v6531_v30 = vadd.f32 %v1437_v29, %v1429_v28 }
 0xd0c   :  { %5995 = vtanh.f32 %v6531_v30  ;;  %v1702_v5 = vrot.slane %v6531_v30, 6 }
 0xd0e   :  { %v5994_v31 = vpop.eup %5993 }
 0xd0f   :  { %1269 = vrot.lane.b32.xlu0 %v5994_v31, %s6210_s15 }
 0xd16   :  { %v5996_v32 = vpop.eup %5995 }
 0xd17   :  { %1442 = vrot.lane.b32.xlu1 %v5996_v32, %s6210_s15 }
 0xd81   :  { %v1270_v33 = vpop.permute.xlu0 %1269 }
 0xd82   :  { %v1272_v34 = vmul.f32 %v5990_v14, %v1270_v33 }
 0xd84   :  { %1274 = vrot.lane.b32.xlu0 %v1272_v34, %s6211_s3 }
 0xd89   :  { %v1443_v35 = vpop.permute.xlu1 %1442 }
 0xd8a   :  { %v1445_v21 = vmul.f32 %v5992_v19, %v1443_v35 }
 0xd8c   :  { %1447 = vrot.lane.b32.xlu1 %v1445_v21, %s6211_s3 }
 0xdf6   :  { %v1275_v36 = vpop.permute.xlu0 %1274 }
 0xdf7   :  { %5177 = vmatmul.mubr.msk.f32.vlgmr.msra.gmra.mrb[8].mxu1 %vm177_vm2, %v1275_v36 }
 0xdf8   :  { %5661 = vmatpush3.bf16.msra.mxu1 %v6363_v43  ;;  %5198 = vmatprep.mubr.msk.f32.mxu1 %vm6208_vm0, %v6209_v1 }
 0xdf9   :  { %5662 = vmatprep.subr.bf16.mxu1 %v6207_v0 }
 0xdfc   :  { %5664 = vmatpush3.bf16.msra.mxu1 %v6377_v47 }
 0xdfd   :  { %5671 = vmatprep.subr.bf16.mxu1 %v6207_v0 }
 0xdfe   :  { %v1448_v37 = vpop.permute.xlu1 %1447 }
 0xdff   :  { %5199 = vmatmul.mubr.msk.f32.vlgmr.msra.gmra.mrb[8].mxu1 %vm177_vm2, %v1448_v37 }
 0xe00   :  { %5673 = vmatpush3.bf16.msra.mxu1 %v6293_v8  ;;  %5220 = vmatprep.mubr.msk.f32.mxu1 %vm6208_vm0, %v6209_v1 }
 0xe01   :  { %5674 = vmatprep.subr.bf16.mxu1 %v6207_v0 }
 0xe04   :  { %5676 = vmatpush3.bf16.msra.mxu1 %v6308_v12 }
 0xe05   :  { %5683 = vmatprep.subr.bf16.mxu1 %v6207_v0 }
 0xe07   :  { %5221 = vmatmul.mubr.msk.f32.vlgmr.msra.gmra.mrb[10].mxu1 %vm177_vm2, %v1448_v37 }
 0xe08   :  { %5685 = vmatpush3.bf16.msra.mxu1 %v6345_v38  ;;  %5242 = vmatprep.mubr.msk.f32.mxu1 %vm6208_vm0, %v6209_v1 }
 0xe09   :  { %5686 = vmatprep.subr.bf16.mxu1 %v6207_v0 }
 0xe0c   :  { %5688 = vmatpush3.bf16.msra.mxu1 %v6351_v40 }
 0xe0d   :  { %5695 = vmatprep.subr.bf16.mxu1 %v6207_v0 }
 0xed2   :  { %v1517_v39 = vpop.f32.mrb[8].mxu1 }
 0xed3   :  { %v5875_v41 = vadd.f32 %v6402_v51, %v1517_v39  ;;  %v5200_v42 = vpop.f32.mrb[9].mxu1 }
 0xed5   :  { %5997 = vtanh.f32 %v5875_v41  ;;  %v4718_v52 = vmul.f32 -1.442695, %v5875_v41 }
 0xeda   :  { %v1686_v44 = vpop.f32.mrb[10].mxu1 }
 0xedb   :  { %v1691_v45 = vrot.slane %v1686_v44, 6  ;;  %v5222_v46 = vpop.f32.mrb[11].mxu1 }
 0xedd   :  { %v1693_v48 = vadd.f32 %v1691_v45, %v6322_v15 }
 0xedf   :  { %v5998_v49 = vpop.eup %5997  ;;  %5999 = vtanh.f32 %v1693_v48  ;;  %v4721_v53 = vmul.f32 -1.442695, %v1693_v48 }
 0xee0   :  { %1530 = vrot.lane.b32.xlu0 %v5998_v49, %s6210_s15  ;;  %6001 = vpow2.f32 %v4718_v52 }
 0xee1   :  { %6003 = vpow2.f32 %v4721_v53 }
 0xee9   :  { %v6000_v50 = vpop.eup %5999 }
 0xeea   :  { %1706 = vrot.lane.b32.xlu1 %v6000_v50, %s6210_s15  ;;  %v6002_v54 = vpop.eup %6001 }
 0xeeb   :  { %v1524_v55 = vadd.f32 1.0, %v6002_v54  ;;  %v6004_v56 = vpop.eup %6003 }
 0xeec   :  { %v1697_v57 = vadd.f32 1.0, %v6004_v56 }
 0xeed   :  { %6005 = vrcp.f32 %v1524_v55 }
 0xeee   :  { %6007 = vrcp.f32 %v1697_v57 }
 0xef7   :  { %v6006_v58 = vpop.eup %6005 }
 0xef8   :  { %v6008_v61 = vpop.eup %6007  ;;  %v1528_v2 = vmul.f32 %v6006_v58, %v6527_v26 }
 0xef9   :  { %v1704_v6 = vmul.f32 %v6008_v61, %v1702_v5 }
 0xf52   :  { %v1531_v59 = vpop.permute.xlu0 %1530 }
 0xf53   :  { %v1533_v60 = vmul.f32 %v6006_v58, %v1531_v59 }
 0xf55   :  { %1535 = vrot.lane.b32.xlu0 %v1533_v60, %s6211_s3 }
 0xf5c   :  { %v1707_v62 = vpop.permute.xlu1 %1706 }
 0xf5d   :  { %v1709_v63 = vmul.f32 %v6008_v61, %v1707_v62 }
 0xf5f   :  { %1711 = vrot.lane.b32.xlu1 %v1709_v63, %s6211_s3 }
 0xfc7   :  { %v1536_v3 = vpop.permute.xlu0 %1535 }
 0xfc8   :  { %v6566_v4 = vadd.f32 %v1536_v3, %v1528_v2 }
 0xfca   :  { %6009 = vtanh.f32 %v6566_v4 }
 0xfd1   :  { %v1712_v7 = vpop.permute.xlu1 %1711 }
 0xfd2   :  { %v6570_v9 = vadd.f32 %v1712_v7, %v1704_v6 }
 0xfd4   :  { %v6010_v10 = vpop.eup %6009  ;;  %6011 = vtanh.f32 %v6570_v9  ;;  %v1978_v52 = vrot.slane %v6570_v9, 6 }
 0xfd5   :  { %1541 = vrot.lane.b32.xlu0 %v6010_v10, %s6210_s15 }
 0xfde   :  { %v6012_v11 = vpop.eup %6011 }
 0xfdf   :  { %1717 = vrot.lane.b32.xlu1 %v6012_v11, %s6210_s15 }
0x1047   :  { %v1542_v13 = vpop.permute.xlu0 %1541 }
0x1048   :  { %v1544_v14 = vmul.f32 %v6006_v58, %v1542_v13 }
0x104a   :  { %1546 = vrot.lane.b32.xlu0 %v1544_v14, %s6211_s3 }
0x1051   :  { %v1718_v16 = vpop.permute.xlu1 %1717 }
0x1052   :  { %v1720_v17 = vmul.f32 %v6008_v61, %v1718_v16 }
0x1054   :  { %v1722_v19 = vrot.slane %v1720_v17, 2 }
0x1056   :  { %1723 = vrot.lane.b32.xlu1 %v1722_v19, %s6211_s3 }
0x10bc   :  { %v1547_v22 = vpop.permute.xlu0 %1546 }
0x10bd   :  { %5210 = vmatmul.mubr.msk.f32.vlgmr.msra.gmra.mrb[14].mxu0 %vm177_vm2, %v1547_v22 }
0x10be   :  { %5679 = vmatpush3.bf16.msra.mxu0 %v6363_v43  ;;  %5231 = vmatprep.mubr.msk.f32.mxu0 %vm6208_vm0, %v6209_v1 }
0x10bf   :  { %5680 = vmatprep.subr.bf16.mxu0 %v6207_v0 }
0x10c2   :  { %5682 = vmatpush3.bf16.msra.mxu0 %v6377_v47 }
0x10c3   :  { %5689 = vmatprep.subr.bf16.mxu0 %v6207_v0 }
0x10c8   :  { %v1724_v23 = vpop.permute.xlu1 %1723 }
0x10c9   :  { %5232 = vmatmul.mubr.msk.f32.vlgmr.msra.gmra.mrb[14].mxu0 %vm177_vm2, %v1724_v23 }
0x10ca   :  { %5691 = vmatpush3.bf16.msra.mxu0 %v6293_v8  ;;  %5253 = vmatprep.mubr.msk.f32.mxu0 %vm6208_vm0, %v6209_v1 }
0x10cb   :  { %5692 = vmatprep.subr.bf16.mxu0 %v6207_v0 }
0x10ce   :  { %5694 = vmatpush3.bf16.msra.mxu0 %v6308_v12 }
0x10cf   :  { %5701 = vmatprep.subr.bf16.mxu0 %v6207_v0 }
0x10d1   :  { %5254 = vmatmul.mubr.msk.f32.vlgmr.msra.gmra.mrb[16].mxu0 %vm177_vm2, %v1724_v23 }
0x10d2   :  { %5703 = vmatpush3.bf16.msra.mxu0 %v6345_v38  ;;  %5275 = vmatprep.mubr.msk.f32.mxu0 %vm6208_vm0, %v6209_v1 }
0x10d3   :  { %5704 = vmatprep.subr.bf16.mxu0 %v6207_v0 }
0x10d6   :  { %5706 = vmatpush3.bf16.msra.mxu0 %v6351_v40 }
0x10d7   :  { %5713 = vmatprep.subr.bf16.mxu0 %v6207_v0 }
0x119c   :  { %v1793_v24 = vpop.f32.mrb[14].mxu0 }
0x119d   :  { %v5876_v25 = vadd.f32 %v6402_v51, %v1793_v24  ;;  %v5233_v26 = vpop.f32.mrb[15].mxu0 }
0x119f   :  { %6013 = vtanh.f32 %v5876_v25  ;;  %v4723_v33 = vmul.f32 -1.442695, %v5876_v25 }
0x11a4   :  { %v1962_v27 = vpop.f32.mrb[16].mxu0 }
0x11a5   :  { %v1967_v28 = vrot.slane %v1962_v27, 4  ;;  %v5255_v29 = vpop.f32.mrb[17].mxu0 }
0x11a7   :  { %v1969_v30 = vadd.f32 %v1967_v28, %v6322_v15 }
0x11a9   :  { %v6014_v31 = vpop.eup %6013  ;;  %6015 = vtanh.f32 %v1969_v30  ;;  %v4726_v34 = vmul.f32 -1.442695, %v1969_v30 }
0x11aa   :  { %1806 = vrot.lane.b32.xlu0 %v6014_v31, %s6210_s15  ;;  %6017 = vpow2.f32 %v4723_v33 }
0x11ab   :  { %6019 = vpow2.f32 %v4726_v34 }
0x11b3   :  { %v6016_v32 = vpop.eup %6015 }
0x11b4   :  { %1982 = vrot.lane.b32.xlu1 %v6016_v32, %s6210_s15  ;;  %v6018_v35 = vpop.eup %6017 }
0x11b5   :  { %v1800_v21 = vadd.f32 1.0, %v6018_v35  ;;  %v6020_v36 = vpop.eup %6019 }
0x11b6   :  { %v1973_v37 = vadd.f32 1.0, %v6020_v36 }
0x11b7   :  { %6021 = vrcp.f32 %v1800_v21 }
0x11b8   :  { %6023 = vrcp.f32 %v1973_v37 }
0x11c1   :  { %v6022_v39 = vpop.eup %6021 }
0x11c2   :  { %v6024_v44 = vpop.eup %6023  ;;  %v1804_v48 = vmul.f32 %v6022_v39, %v6566_v4 }
0x11c3   :  { %v1980_v53 = vmul.f32 %v6024_v44, %v1978_v52 }
0x121c   :  { %v1807_v41 = vpop.permute.xlu0 %1806 }
0x121d   :  { %v1809_v42 = vmul.f32 %v6022_v39, %v1807_v41 }
0x121f   :  { %1811 = vrot.lane.b32.xlu0 %v1809_v42, %s6211_s3 }
0x1226   :  { %v1983_v45 = vpop.permute.xlu1 %1982 }
0x1227   :  { %v1985_v46 = vmul.f32 %v6024_v44, %v1983_v45 }
0x1229   :  { %1987 = vrot.lane.b32.xlu1 %v1985_v46, %s6211_s3 }
0x1291   :  { %v1812_v49 = vpop.permute.xlu0 %1811 }
0x1292   :  { %v6605_v50 = vadd.f32 %v1812_v49, %v1804_v48 }
0x1294   :  { %6025 = vtanh.f32 %v6605_v50 }
0x129b   :  { %v1988_v54 = vpop.permute.xlu1 %1987 }
0x129c   :  { %v6609_v55 = vadd.f32 %v1988_v54, %v1980_v53 }
0x129e   :  { %v6026_v56 = vpop.eup %6025  ;;  %6027 = vtanh.f32 %v6609_v55  ;;  %v2254_v32 = vrot.slane %v6609_v55, 6 }
0x129f   :  { %1817 = vrot.lane.b32.xlu0 %v6026_v56, %s6210_s15 }
0x12a8   :  { %v6028_v57 = vpop.eup %6027 }
0x12a9   :  { %1993 = vrot.lane.b32.xlu1 %v6028_v57, %s6210_s15 }
0x1311   :  { %v1818_v58 = vpop.permute.xlu0 %1817 }
0x1312   :  { %v1820_v59 = vmul.f32 %v6022_v39, %v1818_v58 }
0x1314   :  { %1822 = vrot.lane.b32.xlu0 %v1820_v59, %s6211_s3 }
0x131b   :  { %v1994_v60 = vpop.permute.xlu1 %1993 }
0x131c   :  { %v1996_v61 = vmul.f32 %v6024_v44, %v1994_v60 }
0x131e   :  { %v1998_v62 = vrot.slane %v1996_v61, 4 }
0x1320   :  { %1999 = vrot.lane.b32.xlu1 %v1998_v62, %s6211_s3 }
0x1386   :  { %v1823_v63 = vpop.permute.xlu0 %1822 }
0x1387   :  { %5243 = vmatmul.mubr.msk.f32.vlgmr.msra.gmra.mrb[12].mxu1 %vm177_vm2, %v1823_v63 }
0x1388   :  { %5697 = vmatpush3.bf16.msra.mxu1 %v6363_v43  ;;  %5264 = vmatprep.mubr.msk.f32.mxu1 %vm6208_vm0, %v6209_v1 }
0x1389   :  { %5698 = vmatprep.subr.bf16.mxu1 %v6207_v0 }
0x138c   :  { %5700 = vmatpush3.bf16.msra.mxu1 %v6377_v47 }
0x138d   :  { %5707 = vmatprep.subr.bf16.mxu1 %v6207_v0 }
0x1392   :  { %v2000_v2 = vpop.permute.xlu1 %1999 }
0x1393   :  { %5265 = vmatmul.mubr.msk.f32.vlgmr.msra.gmra.mrb[12].mxu1 %vm177_vm2, %v2000_v2 }
0x1394   :  { %5709 = vmatpush3.bf16.msra.mxu1 %v6293_v8  ;;  %5286 = vmatprep.mubr.msk.f32.mxu1 %vm6208_vm0, %v6209_v1 }
0x1395   :  { %5710 = vmatprep.subr.bf16.mxu1 %v6207_v0 }
0x1398   :  { %5712 = vmatpush3.bf16.msra.mxu1 %v6308_v12 }
0x1399   :  { %5719 = vmatprep.subr.bf16.mxu1 %v6207_v0 }
0x139b   :  { %5287 = vmatmul.mubr.msk.f32.vlgmr.msra.gmra.mrb[14].mxu1 %vm177_vm2, %v2000_v2 }
0x139c   :  { %5721 = vmatpush3.bf16.msra.mxu1 %v6345_v38  ;;  %5308 = vmatprep.mubr.msk.f32.mxu1 %vm6208_vm0, %v6209_v1 }
0x139d   :  { %5722 = vmatprep.subr.bf16.mxu1 %v6207_v0 }
0x13a0   :  { %5724 = vmatpush3.bf16.msra.mxu1 %v6351_v40 }
0x13a1   :  { %5731 = vmatprep.subr.bf16.mxu1 %v6207_v0 }
0x1466   :  { %v2069_v3 = vpop.f32.mrb[12].mxu1 }
0x1467   :  { %v5877_v4 = vadd.f32 %v6402_v51, %v2069_v3  ;;  %v5266_v5 = vpop.f32.mrb[13].mxu1 }
0x1469   :  { %6029 = vtanh.f32 %v5877_v4  ;;  %v4728_v14 = vmul.f32 -1.442695, %v5877_v4 }
0x146e   :  { %v2238_v6 = vpop.f32.mrb[14].mxu1 }
0x146f   :  { %v2243_v7 = vrot.slane %v2238_v6, 2  ;;  %v5288_v9 = vpop.f32.mrb[15].mxu1 }
0x1471   :  { %v2245_v10 = vadd.f32 %v2243_v7, %v6322_v15 }
0x1473   :  { %v6030_v11 = vpop.eup %6029  ;;  %6031 = vtanh.f32 %v2245_v10  ;;  %v4731_v16 = vmul.f32 -1.442695, %v2245_v10 }
0x1474   :  { %2082 = vrot.lane.b32.xlu0 %v6030_v11, %s6210_s15  ;;  %6033 = vpow2.f32 %v4728_v14 }
0x1475   :  { %6035 = vpow2.f32 %v4731_v16 }
0x147d   :  { %v6032_v13 = vpop.eup %6031 }
0x147e   :  { %2258 = vrot.lane.b32.xlu1 %v6032_v13, %s6210_s15  ;;  %v6034_v17 = vpop.eup %6033 }
0x147f   :  { %v2076_v19 = vadd.f32 1.0, %v6034_v17  ;;  %v6036_v22 = vpop.eup %6035 }
0x1480   :  { %v2249_v23 = vadd.f32 1.0, %v6036_v22 }
0x1481   :  { %6037 = vrcp.f32 %v2076_v19 }
0x1482   :  { %6039 = vrcp.f32 %v2249_v23 }
0x148b   :  { %v6038_v24 = vpop.eup %6037 }
0x148c   :  { %v6040_v26 = vpop.eup %6039  ;;  %v2080_v29 = vmul.f32 %v6038_v24, %v6605_v50 }
0x148d   :  { %v2256_v33 = vmul.f32 %v6040_v26, %v2254_v32 }
0x14e6   :  { %v2083_v25 = vpop.permute.xlu0 %2082 }
0x14e7   :  { %v2085_v15 = vmul.f32 %v6038_v24, %v2083_v25 }
0x14e9   :  { %2087 = vrot.lane.b32.xlu0 %v2085_v15, %s6211_s3 }
0x14f0   :  { %v2259_v27 = vpop.permute.xlu1 %2258 }
0x14f1   :  { %v2261_v28 = vmul.f32 %v6040_v26, %v2259_v27  ;;  %v6718_v27 = vld [vmem:[%s7010_s6] ss:$0 sm:$0xff] }
0x14f3   :  { %2263 = vrot.lane.b32.xlu1 %v2261_v28, %s6211_s3 }
0x155b   :  { %v2088_v30 = vpop.permute.xlu0 %2087 }
0x155c   :  { %v6644_v31 = vadd.f32 %v2088_v30, %v2080_v29 }
0x155e   :  { %6041 = vtanh.f32 %v6644_v31 }
0x1565   :  { %v2264_v34 = vpop.permute.xlu1 %2263 }
0x1566   :  { %v6648_v35 = vadd.f32 %v2264_v34, %v2256_v33 }
0x1568   :  { %v6042_v21 = vpop.eup %6041  ;;  %6043 = vtanh.f32 %v6648_v35  ;;  %v2527_v10 = vrot.slane %v6648_v35, 6 }
0x1569   :  { %2093 = vrot.lane.b32.xlu0 %v6042_v21, %s6210_s15 }
0x1572   :  { %v6044_v36 = vpop.eup %6043 }
0x1573   :  { %2269 = vrot.lane.b32.xlu1 %v6044_v36, %s6210_s15 }
0x15db   :  { %v2094_v37 = vpop.permute.xlu0 %2093 }
0x15dc   :  { %v2096_v39 = vmul.f32 %v6038_v24, %v2094_v37 }
0x15de   :  { %2098 = vrot.lane.b32.xlu0 %v2096_v39, %s6211_s3 }
0x15e5   :  { %v2270_v41 = vpop.permute.xlu1 %2269 }
0x15e6   :  { %v2272_v42 = vmul.f32 %v6040_v26, %v2270_v41 }
0x15e8   :  { %v2274_v44 = vrot.slane %v2272_v42, 6 }
0x15ea   :  { %2275 = vrot.lane.b32.xlu1 %v2274_v44, %s6211_s3 }
0x1650   :  { %v2099_v45 = vpop.permute.xlu0 %2098 }
0x1651   :  { %5276 = vmatmul.mubr.msk.f32.vlgmr.msra.gmra.mrb[18].mxu0 %vm177_vm2, %v2099_v45 }
0x1652   :  { %5715 = vmatpush3.bf16.msra.mxu0 %v6363_v43  ;;  %5297 = vmatprep.mubr.msk.f32.mxu0 %vm6208_vm0, %v6209_v1 }
0x1653   :  { %5716 = vmatprep.subr.bf16.mxu0 %v6207_v0 }
0x1656   :  { %5718 = vmatpush3.bf16.msra.mxu0 %v6377_v47 }
0x1657   :  { %5725 = vmatprep.subr.bf16.mxu0 %v6207_v0 }
0x165c   :  { %v2276_v46 = vpop.permute.xlu1 %2275 }
0x165d   :  { %5298 = vmatmul.mubr.msk.f32.vlgmr.msra.gmra.mrb[18].mxu0 %vm177_vm2, %v2276_v46 }
0x165e   :  { %5727 = vmatpush3.bf16.msra.mxu0 %v6293_v8  ;;  %5319 = vmatprep.mubr.msk.f32.mxu0 %vm6208_vm0, %v6209_v1 }
0x165f   :  { %5728 = vmatprep.subr.bf16.mxu0 %v6207_v0 }
0x1662   :  { %5730 = vmatpush3.bf16.msra.mxu0 %v6308_v12 }
0x1663   :  { %5737 = vmatprep.subr.bf16.mxu0 %v6207_v0 }
0x1665   :  { %5320 = vmatmul.mubr.msk.f32.vlgmr.msra.gmra.mrb[20].mxu0 %vm177_vm2, %v2276_v46 }
0x1666   :  { %5739 = vmatpush3.bf16.msra.mxu0 %v6345_v38  ;;  %5341 = vmatprep.mubr.msk.f32.mxu0 %vm6208_vm0, %v6209_v1 }
0x1667   :  { %5740 = vmatprep.subr.bf16.mxu0 %v6207_v0 }
0x166a   :  { %5742 = vmatpush3.bf16.msra.mxu0 %v6351_v40 }
0x166b   :  { %5749 = vmatprep.subr.bf16.mxu0 %v6207_v0 }
0x1730   :  { %v2345_v48 = vpop.f32.mrb[18].mxu0 }
0x1731   :  { %v5878_v49 = vadd.f32 %v6402_v51, %v2345_v48  ;;  %v5299_v50 = vpop.f32.mrb[19].mxu0 }
0x1733   :  { %6045 = vtanh.f32 %v5878_v49  ;;  %v4733_v57 = vmul.f32 -1.442695, %v5878_v49 }
0x1738   :  { %v2514_v52 = vpop.f32.mrb[20].mxu0 }
0x1739   :  { %v2518_v53 = vadd.f32 %v2514_v52, %v6326_v20  ;;  %v5321_v54 = vpop.f32.mrb[21].mxu0 }
0x173b   :  { %6047 = vtanh.f32 %v2518_v53  ;;  %v4736_v58 = vmul.f32 -1.442695, %v2518_v53 }
0x173c   :  { %6049 = vpow2.f32 %v4733_v57 }
0x173d   :  { %v6046_v55 = vpop.eup %6045  ;;  %6051 = vpow2.f32 %v4736_v58 }
0x173e   :  { %2358 = vrot.lane.b32.xlu0 %v6046_v55, %s6210_s15 }
0x1745   :  { %v6048_v56 = vpop.eup %6047 }
0x1746   :  { %2531 = vrot.lane.b32.xlu1 %v6048_v56, %s6210_s15  ;;  %v6050_v59 = vpop.eup %6049 }
0x1747   :  { %v2352_v60 = vadd.f32 1.0, %v6050_v59  ;;  %v6052_v51 = vpop.eup %6051 }
0x1748   :  { %v2522_v61 = vadd.f32 1.0, %v6052_v51 }
0x1749   :  { %6053 = vrcp.f32 %v2352_v60 }
0x174a   :  { %6055 = vrcp.f32 %v2522_v61 }
0x1753   :  { %v6054_v62 = vpop.eup %6053 }
0x1754   :  { %v6056_v3 = vpop.eup %6055  ;;  %v2356_v6 = vmul.f32 %v6054_v62, %v6644_v31 }
0x1755   :  { %v2529_v11 = vmul.f32 %v6056_v3, %v2527_v10 }
0x17b0   :  { %v2359_v63 = vpop.permute.xlu0 %2358 }
0x17b1   :  { %v2361_v2 = vmul.f32 %v6054_v62, %v2359_v63 }
0x17b3   :  { %2363 = vrot.lane.b32.xlu0 %v2361_v2, %s6211_s3 }
0x17b8   :  { %v2532_v4 = vpop.permute.xlu1 %2531 }
0x17b9   :  { %v2534_v5 = vmul.f32 %v6056_v3, %v2532_v4 }
0x17bb   :  { %2536 = vrot.lane.b32.xlu1 %v2534_v5, %s6211_s3 }
0x1825   :  { %v2364_v7 = vpop.permute.xlu0 %2363 }
0x1826   :  { %v6683_v9 = vadd.f32 %v2364_v7, %v2356_v6 }
0x1828   :  { %6057 = vtanh.f32 %v6683_v9 }
0x182d   :  { %v2537_v13 = vpop.permute.xlu1 %2536 }
0x182e   :  { %v6687_v14 = vadd.f32 %v2537_v13, %v2529_v11 }
0x1830   :  { %6059 = vtanh.f32 %v6687_v14  ;;  %v2805_v55 = vrot.slane %v6687_v14, 6 }
0x1832   :  { %v6058_v16 = vpop.eup %6057 }
0x1833   :  { %2369 = vrot.lane.b32.xlu0 %v6058_v16, %s6210_s15 }
0x183a   :  { %v6060_v17 = vpop.eup %6059 }
0x183b   :  { %2542 = vrot.lane.b32.xlu1 %v6060_v17, %s6210_s15 }
0x18a5   :  { %v2370_v19 = vpop.permute.xlu0 %2369 }
0x18a6   :  { %v2372_v22 = vmul.f32 %v6054_v62, %v2370_v19 }
0x18a8   :  { %2374 = vrot.lane.b32.xlu0 %v2372_v22, %s6211_s3 }
0x18ad   :  { %v2543_v23 = vpop.permute.xlu1 %2542 }
0x18ae   :  { %v2545_v24 = vmul.f32 %v6056_v3, %v2543_v23 }
0x18b0   :  { %2547 = vrot.lane.b32.xlu1 %v2545_v24, %s6211_s3 }
0x191a   :  { %v2375_v25 = vpop.permute.xlu0 %2374 }
0x191b   :  { %5309 = vmatmul.mubr.msk.f32.vlgmr.msra.gmra.mrb[16].mxu1 %vm177_vm2, %v2375_v25 }
0x191c   :  { %5733 = vmatpush3.bf16.msra.mxu1 %v6363_v43  ;;  %5330 = vmatprep.mubr.msk.f32.mxu1 %vm6208_vm0, %v6209_v1 }
0x191d   :  { %5734 = vmatprep.subr.bf16.mxu1 %v6207_v0 }
0x1920   :  { %5736 = vmatpush3.bf16.msra.mxu1 %v6377_v47 }
0x1921   :  { %5743 = vmatprep.subr.bf16.mxu1 %v6207_v0 }
0x1922   :  { %v2548_v15 = vpop.permute.xlu1 %2547 }
0x1923   :  { %5331 = vmatmul.mubr.msk.f32.vlgmr.msra.gmra.mrb[16].mxu1 %vm177_vm2, %v2548_v15 }
0x1924   :  { %5745 = vmatpush3.bf16.msra.mxu1 %v6293_v8  ;;  %5352 = vmatprep.mubr.msk.f32.mxu1 %vm6208_vm0, %v6209_v1 }
0x1925   :  { %5746 = vmatprep.subr.bf16.mxu1 %v6207_v0 }
0x1928   :  { %5748 = vmatpush3.bf16.msra.mxu1 %v6308_v12 }
0x1929   :  { %5755 = vmatprep.subr.bf16.mxu1 %v6207_v0 }
0x192b   :  { %5353 = vmatmul.mubr.msk.f32.vlgmr.msra.gmra.mrb[18].mxu1 %vm177_vm2, %v2548_v15 }
0x192c   :  { %5757 = vmatpush3.bf16.msra.mxu1 %v6345_v38  ;;  %5374 = vmatprep.mubr.msk.f32.mxu1 %vm6208_vm0, %v6209_v1 }
0x192d   :  { %5758 = vmatprep.subr.bf16.mxu1 %v6207_v0 }
0x1930   :  { %5760 = vmatpush3.bf16.msra.mxu1 %v6351_v40 }
0x1931   :  { %5767 = vmatprep.subr.bf16.mxu1 %v6207_v0 }
0x19f6   :  { %v2617_v26 = vpop.f32.mrb[16].mxu1 }
0x19f7   :  { %v5879_v28 = vadd.f32 %v6718_v27, %v2617_v26  ;;  %v5332_v29 = vpop.f32.mrb[17].mxu1 }
0x19f9   :  { %6061 = vtanh.f32 %v5879_v28  ;;  %v4738_v21 = vmul.f32 -1.442695, %v5879_v28 }
0x19fe   :  { %v2789_v30 = vpop.f32.mrb[18].mxu1 }
0x19ff   :  { %v2794_v31 = vrot.slane %v2789_v30, 6  ;;  %v5354_v32 = vpop.f32.mrb[19].mxu1 }
0x1a01   :  { %v2796_v33 = vadd.f32 %v2794_v31, %v6326_v20 }
0x1a03   :  { %v6062_v34 = vpop.eup %6061  ;;  %6063 = vtanh.f32 %v2796_v33  ;;  %v4741_v36 = vmul.f32 -1.442695, %v2796_v33 }
0x1a04   :  { %2630 = vrot.lane.b32.xlu0 %v6062_v34, %s6210_s15  ;;  %6065 = vpow2.f32 %v4738_v21 }
0x1a05   :  { %6067 = vpow2.f32 %v4741_v36 }
0x1a0d   :  { %v6064_v35 = vpop.eup %6063 }
0x1a0e   :  { %2809 = vrot.lane.b32.xlu1 %v6064_v35, %s6210_s15  ;;  %v6066_v37 = vpop.eup %6065 }
0x1a0f   :  { %v2624_v39 = vadd.f32 1.0, %v6066_v37  ;;  %v6068_v41 = vpop.eup %6067 }
0x1a10   :  { %v2800_v42 = vadd.f32 1.0, %v6068_v41 }
0x1a11   :  { %6069 = vrcp.f32 %v2624_v39 }
0x1a12   :  { %6071 = vrcp.f32 %v2800_v42 }
0x1a1b   :  { %v6070_v44 = vpop.eup %6069 }
0x1a1c   :  { %v6072_v48 = vpop.eup %6071  ;;  %v2628_v52 = vmul.f32 %v6070_v44, %v6683_v9 }
0x1a1d   :  { %v2807_v56 = vmul.f32 %v6072_v48, %v2805_v55 }
0x1a76   :  { %v2631_v45 = vpop.permute.xlu0 %2630 }
0x1a77   :  { %v2633_v46 = vmul.f32 %v6070_v44, %v2631_v45 }
0x1a79   :  { %2635 = vrot.lane.b32.xlu0 %v2633_v46, %s6211_s3 }
0x1a80   :  { %v2810_v49 = vpop.permute.xlu1 %2809 }
0x1a81   :  { %v2812_v50 = vmul.f32 %v6072_v48, %v2810_v49 }
0x1a83   :  { %2814 = vrot.lane.b32.xlu1 %v2812_v50, %s6211_s3 }
0x1aeb   :  { %v2636_v53 = vpop.permute.xlu0 %2635 }
0x1aec   :  { %v6727_v54 = vadd.f32 %v2636_v53, %v2628_v52 }
0x1aee   :  { %6073 = vtanh.f32 %v6727_v54 }
0x1af5   :  { %v2815_v57 = vpop.permute.xlu1 %2814 }
0x1af6   :  { %v6731_v58 = vadd.f32 %v2815_v57, %v2807_v56 }
0x1af8   :  { %v6074_v59 = vpop.eup %6073  ;;  %6075 = vtanh.f32 %v6731_v58  ;;  %v3083_v35 = vrot.slane %v6731_v58, 6 }
0x1af9   :  { %2641 = vrot.lane.b32.xlu0 %v6074_v59, %s6210_s15 }
0x1b02   :  { %v6076_v60 = vpop.eup %6075 }
0x1b03   :  { %2820 = vrot.lane.b32.xlu1 %v6076_v60, %s6210_s15 }
0x1b6b   :  { %v2642_v51 = vpop.permute.xlu0 %2641 }
0x1b6c   :  { %v2644_v61 = vmul.f32 %v6070_v44, %v2642_v51 }
0x1b6e   :  { %2646 = vrot.lane.b32.xlu0 %v2644_v61, %s6211_s3 }
0x1b75   :  { %v2821_v62 = vpop.permute.xlu1 %2820 }
0x1b76   :  { %v2823_v63 = vmul.f32 %v6072_v48, %v2821_v62 }
0x1b78   :  { %v2825_v2 = vrot.slane %v2823_v63, 2 }
0x1b7a   :  { %2826 = vrot.lane.b32.xlu1 %v2825_v2, %s6211_s3 }
0x1be0   :  { %v2647_v3 = vpop.permute.xlu0 %2646 }
0x1be1   :  { %2650 = vst.msk [vmem:[#allocation2] sm:$0x3] %vm2649_vm3, %v2647_v3  ;;  %5342 = vmatmul.mubr.msk.f32.vlgmr.msra.gmra.mrb[22].mxu0 %vm177_vm2, %v2647_v3 }
0x1be2   :  { %5751 = vmatpush3.bf16.msra.mxu0 %v6363_v43  ;;  %5363 = vmatprep.mubr.msk.f32.mxu0 %vm6208_vm0, %v6209_v1 }
0x1be3   :  { %5752 = vmatprep.subr.bf16.mxu0 %v6207_v0 }
0x1be6   :  { %5754 = vmatpush3.bf16.msra.mxu0 %v6377_v47 }
0x1be7   :  { %5761 = vmatprep.subr.bf16.mxu0 %v6207_v0 }
0x1bec   :  { %v2827_v4 = vpop.permute.xlu1 %2826 }
0x1bed   :  { %5364 = vmatmul.mubr.msk.f32.vlgmr.msra.gmra.mrb[22].mxu0 %vm177_vm2, %v2827_v4 }
0x1bee   :  { %5763 = vmatpush3.bf16.msra.mxu0 %v6293_v8  ;;  %5385 = vmatprep.mubr.msk.f32.mxu0 %vm6208_vm0, %v6209_v1 }
0x1bef   :  { %5764 = vmatprep.subr.bf16.mxu0 %v6207_v0 }
0x1bf2   :  { %5766 = vmatpush3.bf16.msra.mxu0 %v6308_v12 }
0x1bf3   :  { %5773 = vmatprep.subr.bf16.mxu0 %v6207_v0 }
0x1bf5   :  { %5386 = vmatmul.mubr.msk.f32.vlgmr.msra.gmra.mrb[24].mxu0 %vm177_vm2, %v2827_v4 }
0x1bf6   :  { %5775 = vmatpush3.bf16.msra.mxu0 %v6345_v38  ;;  %5407 = vmatprep.mubr.msk.f32.mxu0 %vm6208_vm0, %v6209_v1 }
0x1bf7   :  { %5776 = vmatprep.subr.bf16.mxu0 %v6207_v0 }
0x1bfa   :  { %5778 = vmatpush3.bf16.msra.mxu0 %v6351_v40 }
0x1bfb   :  { %5785 = vmatprep.subr.bf16.mxu0 %v6207_v0 }
0x1cc0   :  { %v2896_v5 = vpop.f32.mrb[22].mxu0 }
0x1cc1   :  { %v5880_v6 = vadd.f32 %v6718_v27, %v2896_v5  ;;  %v5365_v7 = vpop.f32.mrb[23].mxu0 }
0x1cc3   :  { %6077 = vtanh.f32 %v5880_v6  ;;  %v4743_v17 = vmul.f32 -1.442695, %v5880_v6 }
0x1cc8   :  { %v3067_v9 = vpop.f32.mrb[24].mxu0 }
0x1cc9   :  { %v3072_v10 = vrot.slane %v3067_v9, 4  ;;  %v5387_v11 = vpop.f32.mrb[25].mxu0 }
0x1ccb   :  { %v3074_v13 = vadd.f32 %v3072_v10, %v6326_v20 }
0x1ccd   :  { %v6078_v14 = vpop.eup %6077  ;;  %6079 = vtanh.f32 %v3074_v13  ;;  %v4746_v19 = vmul.f32 -1.442695, %v3074_v13 }
0x1cce   :  { %2909 = vrot.lane.b32.xlu0 %v6078_v14, %s6210_s15  ;;  %6081 = vpow2.f32 %v4743_v17 }
0x1ccf   :  { %6083 = vpow2.f32 %v4746_v19 }
0x1cd7   :  { %v6080_v16 = vpop.eup %6079 }
0x1cd8   :  { %3087 = vrot.lane.b32.xlu1 %v6080_v16, %s6210_s15  ;;  %v6082_v22 = vpop.eup %6081 }
0x1cd9   :  { %v2903_v23 = vadd.f32 1.0, %v6082_v22  ;;  %v6084_v24 = vpop.eup %6083 }
0x1cda   :  { %v3078_v25 = vadd.f32 1.0, %v6084_v24 }
0x1cdb   :  { %6085 = vrcp.f32 %v2903_v23 }
0x1cdc   :  { %6087 = vrcp.f32 %v3078_v25 }
0x1ce5   :  { %v6086_v15 = vpop.eup %6085 }
0x1ce6   :  { %v6088_v29 = vpop.eup %6087  ;;  %v2907_v32 = vmul.f32 %v6086_v15, %v6727_v54 }
0x1ce7   :  { %v3085_v21 = vmul.f32 %v6088_v29, %v3083_v35 }
0x1d40   :  { %v2910_v26 = vpop.permute.xlu0 %2909 }
0x1d41   :  { %v2912_v28 = vmul.f32 %v6086_v15, %v2910_v26 }
0x1d43   :  { %2914 = vrot.lane.b32.xlu0 %v2912_v28, %s6211_s3 }
0x1d4a   :  { %v3088_v30 = vpop.permute.xlu1 %3087 }
0x1d4b   :  { %v3090_v31 = vmul.f32 %v6088_v29, %v3088_v30 }
0x1d4d   :  { %3092 = vrot.lane.b32.xlu1 %v3090_v31, %s6211_s3 }
0x1db5   :  { %v2915_v33 = vpop.permute.xlu0 %2914 }
0x1db6   :  { %v6767_v34 = vadd.f32 %v2915_v33, %v2907_v32 }
0x1db8   :  { %6089 = vtanh.f32 %v6767_v34 }
0x1dbf   :  { %v3093_v36 = vpop.permute.xlu1 %3092 }
0x1dc0   :  { %v6771_v37 = vadd.f32 %v3093_v36, %v3085_v21 }
0x1dc2   :  { %v6090_v39 = vpop.eup %6089  ;;  %6091 = vtanh.f32 %v6771_v37  ;;  %v3361_v14 = vrot.slane %v6771_v37, 6 }
0x1dc3   :  { %2920 = vrot.lane.b32.xlu0 %v6090_v39, %s6210_s15 }
0x1dcc   :  { %v6092_v41 = vpop.eup %6091 }
0x1dcd   :  { %3098 = vrot.lane.b32.xlu1 %v6092_v41, %s6210_s15 }
0x1e35   :  { %v2921_v42 = vpop.permute.xlu0 %2920 }
0x1e36   :  { %v2923_v44 = vmul.f32 %v6086_v15, %v2921_v42 }
0x1e38   :  { %2925 = vrot.lane.b32.xlu0 %v2923_v44, %s6211_s3 }
0x1e3f   :  { %v3099_v45 = vpop.permute.xlu1 %3098 }
0x1e40   :  { %v3101_v46 = vmul.f32 %v6088_v29, %v3099_v45 }
0x1e42   :  { %v3103_v48 = vrot.slane %v3101_v46, 4 }
0x1e44   :  { %3104 = vrot.lane.b32.xlu1 %v3103_v48, %s6211_s3 }
0x1eaa   :  { %v2926_v49 = vpop.permute.xlu0 %2925 }
0x1eab   :  { %2928 = vst.msk [vmem:[#allocation2 + $0x2] sm:$0x3] %vm2649_vm3, %v2926_v49  ;;  %5375 = vmatmul.mubr.msk.f32.vlgmr.msra.gmra.mrb[20].mxu1 %vm177_vm2, %v2926_v49 }
0x1eac   :  { %5769 = vmatpush3.bf16.msra.mxu1 %v6363_v43  ;;  %5396 = vmatprep.mubr.msk.f32.mxu1 %vm6208_vm0, %v6209_v1 }
0x1ead   :  { %5770 = vmatprep.subr.bf16.mxu1 %v6207_v0 }
0x1eb0   :  { %5772 = vmatpush3.bf16.msra.mxu1 %v6377_v47 }
0x1eb1   :  { %5779 = vmatprep.subr.bf16.mxu1 %v6207_v0 }
0x1eb6   :  { %v3105_v50 = vpop.permute.xlu1 %3104 }
0x1eb7   :  { %5397 = vmatmul.mubr.msk.f32.vlgmr.msra.gmra.mrb[20].mxu1 %vm177_vm2, %v3105_v50 }
0x1eb8   :  { %5781 = vmatpush3.bf16.msra.mxu1 %v6293_v8  ;;  %5418 = vmatprep.mubr.msk.f32.mxu1 %vm6208_vm0, %v6209_v1 }
0x1eb9   :  { %5782 = vmatprep.subr.bf16.mxu1 %v6207_v0 }
0x1ebc   :  { %5784 = vmatpush3.bf16.msra.mxu1 %v6308_v12 }
0x1ebd   :  { %5791 = vmatprep.subr.bf16.mxu1 %v6207_v0 }
0x1ebf   :  { %5419 = vmatmul.mubr.msk.f32.vlgmr.msra.gmra.mrb[22].mxu1 %vm177_vm2, %v3105_v50 }
0x1ec0   :  { %5793 = vmatpush3.bf16.msra.mxu1 %v6345_v38  ;;  %5440 = vmatprep.mubr.msk.f32.mxu1 %vm6208_vm0, %v6209_v1 }
0x1ec1   :  { %5794 = vmatprep.subr.bf16.mxu1 %v6207_v0 }
0x1ec4   :  { %5796 = vmatpush3.bf16.msra.mxu1 %v6351_v40 }
0x1ec5   :  { %5803 = vmatprep.subr.bf16.mxu1 %v6207_v0 }
0x1f8a   :  { %v3174_v52 = vpop.f32.mrb[20].mxu1 }
0x1f8b   :  { %v5881_v53 = vadd.f32 %v6718_v27, %v3174_v52  ;;  %v5398_v54 = vpop.f32.mrb[21].mxu1 }
0x1f8d   :  { %6093 = vtanh.f32 %v5881_v53  ;;  %v4748_v51 = vmul.f32 -1.442695, %v5881_v53 }
0x1f92   :  { %v3345_v55 = vpop.f32.mrb[22].mxu1 }
0x1f93   :  { %v3350_v56 = vrot.slane %v3345_v55, 2  ;;  %v5420_v57 = vpop.f32.mrb[23].mxu1 }
0x1f95   :  { %v3352_v58 = vadd.f32 %v3350_v56, %v6326_v20 }
0x1f97   :  { %v6094_v59 = vpop.eup %6093  ;;  %6095 = vtanh.f32 %v3352_v58  ;;  %v4751_v61 = vmul.f32 -1.442695, %v3352_v58 }
0x1f98   :  { %3187 = vrot.lane.b32.xlu0 %v6094_v59, %s6210_s15  ;;  %6097 = vpow2.f32 %v4748_v51 }
0x1f99   :  { %6099 = vpow2.f32 %v4751_v61 }
0x1fa1   :  { %v6096_v60 = vpop.eup %6095 }
0x1fa2   :  { %3365 = vrot.lane.b32.xlu1 %v6096_v60, %s6210_s15  ;;  %v6098_v62 = vpop.eup %6097 }
0x1fa3   :  { %v3181_v63 = vadd.f32 1.0, %v6098_v62  ;;  %v6100_v2 = vpop.eup %6099 }
0x1fa4   :  { %v3356_v3 = vadd.f32 1.0, %v6100_v2 }
0x1fa5   :  { %6101 = vrcp.f32 %v3181_v63 }
0x1fa6   :  { %6103 = vrcp.f32 %v3356_v3 }
0x1faf   :  { %v6102_v4 = vpop.eup %6101 }
0x1fb0   :  { %v6104_v6 = vpop.eup %6103  ;;  %v3185_v10 = vmul.f32 %v6102_v4, %v6767_v34 }
0x1fb1   :  { %v3363_v16 = vmul.f32 %v6104_v6, %v3361_v14 }
0x200a   :  { %v3188_v5 = vpop.permute.xlu0 %3187 }
0x200b   :  { %v3190_v20 = vmul.f32 %v6102_v4, %v3188_v5 }
0x200d   :  { %3192 = vrot.lane.b32.xlu0 %v3190_v20, %s6211_s3 }
0x2014   :  { %v3366_v7 = vpop.permute.xlu1 %3365 }
0x2015   :  { %v3368_v9 = vmul.f32 %v6104_v6, %v3366_v7 }
0x2017   :  { %3370 = vrot.lane.b32.xlu1 %v3368_v9, %s6211_s3 }
0x207f   :  { %v3193_v11 = vpop.permute.xlu0 %3192 }
0x2080   :  { %v6807_v13 = vadd.f32 %v3193_v11, %v3185_v10 }
0x2082   :  { %6105 = vtanh.f32 %v6807_v13 }
0x2089   :  { %v3371_v17 = vpop.permute.xlu1 %3370 }
0x208a   :  { %v6811_v19 = vadd.f32 %v3371_v17, %v3363_v16 }
0x208c   :  { %v6106_v22 = vpop.eup %6105  ;;  %6107 = vtanh.f32 %v6811_v19  ;;  %v3636_v58 = vrot.slane %v6811_v19, 6 }
0x208d   :  { %3198 = vrot.lane.b32.xlu0 %v6106_v22, %s6210_s15 }
0x2096   :  { %v6108_v23 = vpop.eup %6107 }
0x2097   :  { %3376 = vrot.lane.b32.xlu1 %v6108_v23, %s6210_s15 }
0x20ff   :  { %v3199_v24 = vpop.permute.xlu0 %3198 }
0x2100   :  { %v3201_v25 = vmul.f32 %v6102_v4, %v3199_v24 }
0x2102   :  { %3203 = vrot.lane.b32.xlu0 %v3201_v25, %s6211_s3 }
0x2109   :  { %v3377_v15 = vpop.permute.xlu1 %3376 }
0x210a   :  { %v3379_v26 = vmul.f32 %v6104_v6, %v3377_v15 }
0x210c   :  { %v3381_v28 = vrot.slane %v3379_v26, 6 }
0x210e   :  { %3382 = vrot.lane.b32.xlu1 %v3381_v28, %s6211_s3 }
0x2174   :  { %v3204_v29 = vpop.permute.xlu0 %3203 }
0x2175   :  { %3206 = vst.msk [vmem:[#allocation2 + $0x4] sm:$0x3] %vm2649_vm3, %v3204_v29  ;;  %5408 = vmatmul.mubr.msk.f32.vlgmr.msra.gmra.mrb[26].mxu0 %vm177_vm2, %v3204_v29 }
0x2176   :  { %5787 = vmatpush3.bf16.msra.mxu0 %v6363_v43  ;;  %5429 = vmatprep.mubr.msk.f32.mxu0 %vm6208_vm0, %v6209_v1 }
0x2177   :  { %5788 = vmatprep.subr.bf16.mxu0 %v6207_v0 }
0x217a   :  { %5790 = vmatpush3.bf16.msra.mxu0 %v6377_v47 }
0x217b   :  { %5797 = vmatprep.subr.bf16.mxu0 %v6207_v0 }
0x2180   :  { %v3383_v30 = vpop.permute.xlu1 %3382 }
0x2181   :  { %5430 = vmatmul.mubr.msk.f32.vlgmr.msra.gmra.mrb[26].mxu0 %vm177_vm2, %v3383_v30 }
0x2182   :  { %5799 = vmatpush3.bf16.msra.mxu0 %v6293_v8  ;;  %5451 = vmatprep.mubr.msk.f32.mxu0 %vm6208_vm0, %v6209_v1 }
0x2183   :  { %5800 = vmatprep.subr.bf16.mxu0 %v6207_v0 }
0x2186   :  { %5802 = vmatpush3.bf16.msra.mxu0 %v6308_v12 }
0x2187   :  { %5809 = vmatprep.subr.bf16.mxu0 %v6207_v0 }
0x2189   :  { %5452 = vmatmul.mubr.msk.f32.vlgmr.msra.gmra.mrb[28].mxu0 %vm177_vm2, %v3383_v30 }
0x218a   :  { %5811 = vmatpush3.bf16.msra.mxu0 %v6345_v38  ;;  %5473 = vmatprep.mubr.msk.f32.mxu0 %vm6208_vm0, %v6209_v1 }
0x218b   :  { %5812 = vmatprep.subr.bf16.mxu0 %v6207_v0 }
0x218e   :  { %5814 = vmatpush3.bf16.msra.mxu0 %v6351_v40 }
0x218f   :  { %5821 = vmatprep.subr.bf16.mxu0 %v6207_v0 }
0x2254   :  { %v3452_v31 = vpop.f32.mrb[26].mxu0 }
0x2255   :  { %v5882_v32 = vadd.f32 %v6718_v27, %v3452_v31  ;;  %v5431_v33 = vpop.f32.mrb[27].mxu0 }
0x2257   :  { %6109 = vtanh.f32 %v5882_v32  ;;  %v4753_v39 = vmul.f32 -1.442695, %v5882_v32 }
0x225c   :  { %v3623_v34 = vpop.f32.mrb[28].mxu0 }
0x225d   :  { %v3627_v35 = vadd.f32 %v3623_v34, %v6324_v18  ;;  %v5453_v21 = vpop.f32.mrb[29].mxu0 }
0x225f   :  { %6111 = vtanh.f32 %v3627_v35  ;;  %v4756_v41 = vmul.f32 -1.442695, %v3627_v35 }
0x2260   :  { %6113 = vpow2.f32 %v4753_v39 }
0x2261   :  { %v6110_v36 = vpop.eup %6109  ;;  %6115 = vpow2.f32 %v4756_v41 }
0x2262   :  { %3465 = vrot.lane.b32.xlu0 %v6110_v36, %s6210_s15 }
0x2269   :  { %v6112_v37 = vpop.eup %6111 }
0x226a   :  { %3640 = vrot.lane.b32.xlu1 %v6112_v37, %s6210_s15  ;;  %v6114_v42 = vpop.eup %6113 }
0x226b   :  { %v3459_v44 = vadd.f32 1.0, %v6114_v42  ;;  %v6116_v45 = vpop.eup %6115 }
0x226c   :  { %v3631_v46 = vadd.f32 1.0, %v6116_v45 }
0x226d   :  { %6117 = vrcp.f32 %v3459_v44 }
0x226e   :  { %6119 = vrcp.f32 %v3631_v46 }
0x2277   :  { %v6118_v48 = vpop.eup %6117 }
0x2278   :  { %v6120_v52 = vpop.eup %6119  ;;  %v3463_v55 = vmul.f32 %v6118_v48, %v6807_v13 }
0x2279   :  { %v3638_v59 = vmul.f32 %v6120_v52, %v3636_v58 }
0x22d4   :  { %v3466_v49 = vpop.permute.xlu0 %3465 }
0x22d5   :  { %v3468_v50 = vmul.f32 %v6118_v48, %v3466_v49 }
0x22d7   :  { %3470 = vrot.lane.b32.xlu0 %v3468_v50, %s6211_s3 }
0x22dc   :  { %v3641_v53 = vpop.permute.xlu1 %3640 }
0x22dd   :  { %v3643_v54 = vmul.f32 %v6120_v52, %v3641_v53 }
0x22df   :  { %3645 = vrot.lane.b32.xlu1 %v3643_v54, %s6211_s3 }
0x2349   :  { %v3471_v56 = vpop.permute.xlu0 %3470 }
0x234a   :  { %v6847_v57 = vadd.f32 %v3471_v56, %v3463_v55 }
0x234c   :  { %6121 = vtanh.f32 %v6847_v57 }
0x2351   :  { %v3646_v60 = vpop.permute.xlu1 %3645 }
0x2352   :  { %v6851_v51 = vadd.f32 %v3646_v60, %v3638_v59 }
0x2354   :  { %6123 = vtanh.f32 %v6851_v51  ;;  %v3913_v21 = vrot.slane %v6851_v51, 6 }
0x2356   :  { %v6122_v61 = vpop.eup %6121 }
0x2357   :  { %3476 = vrot.lane.b32.xlu0 %v6122_v61, %s6210_s15 }
0x235e   :  { %v6124_v62 = vpop.eup %6123 }
0x235f   :  { %3651 = vrot.lane.b32.xlu1 %v6124_v62, %s6210_s15 }
0x23c9   :  { %v3477_v63 = vpop.permute.xlu0 %3476 }
0x23ca   :  { %v3479_v2 = vmul.f32 %v6118_v48, %v3477_v63 }
0x23cc   :  { %3481 = vrot.lane.b32.xlu0 %v3479_v2, %s6211_s3 }
0x23d1   :  { %v3652_v3 = vpop.permute.xlu1 %3651 }
0x23d2   :  { %v3654_v4 = vmul.f32 %v6120_v52, %v3652_v3 }
0x23d4   :  { %3656 = vrot.lane.b32.xlu1 %v3654_v4, %s6211_s3 }
0x243e   :  { %v3482_v5 = vpop.permute.xlu0 %3481 }
0x243f   :  { %3484 = vst.msk [vmem:[#allocation2 + $0x6] sm:$0x3] %vm2649_vm3, %v3482_v5  ;;  %5441 = vmatmul.mubr.msk.f32.vlgmr.msra.gmra.mrb[24].mxu1 %vm177_vm2, %v3482_v5 }
0x2440   :  { %5805 = vmatpush3.bf16.msra.mxu1 %v6363_v43  ;;  %5462 = vmatprep.mubr.msk.f32.mxu1 %vm6208_vm0, %v6209_v1 }
0x2441   :  { %5806 = vmatprep.subr.bf16.mxu1 %v6207_v0 }
0x2444   :  { %5808 = vmatpush3.bf16.msra.mxu1 %v6377_v47 }
0x2445   :  { %5815 = vmatprep.subr.bf16.mxu1 %v6207_v0 }
0x2446   :  { %v3657_v20 = vpop.permute.xlu1 %3656 }
0x2447   :  { %5463 = vmatmul.mubr.msk.f32.vlgmr.msra.gmra.mrb[24].mxu1 %vm177_vm2, %v3657_v20 }
0x2448   :  { %5817 = vmatpush3.bf16.msra.mxu1 %v6293_v8  ;;  %5484 = vmatprep.mubr.msk.f32.mxu1 %vm6208_vm0, %v6209_v1 }
0x2449   :  { %5818 = vmatprep.subr.bf16.mxu1 %v6207_v0 }
0x244c   :  { %5820 = vmatpush3.bf16.msra.mxu1 %v6308_v12 }
0x244d   :  { %5827 = vmatprep.subr.bf16.mxu1 %v6207_v0 }
0x244f   :  { %5485 = vmatmul.mubr.msk.f32.vlgmr.msra.gmra.mrb[26].mxu1 %vm177_vm2, %v3657_v20 }
0x2450   :  { %5829 = vmatpush3.bf16.msra.mxu1 %v6345_v38  ;;  %5506 = vmatprep.mubr.msk.f32.mxu1 %vm6208_vm0, %v6209_v1 }
0x2451   :  { %5830 = vmatprep.subr.bf16.mxu1 %v6207_v0 }
0x2454   :  { %5832 = vmatpush3.bf16.msra.mxu1 %v6351_v40 }
0x2455   :  { %5839 = vmatprep.subr.bf16.mxu1 %v6207_v0 }
0x251a   :  { %v3726_v6 = vpop.f32.mrb[24].mxu1 }
0x251b   :  { %v5883_v7 = vadd.f32 %v6718_v27, %v3726_v6  ;;  %v5464_v9 = vpop.f32.mrb[25].mxu1 }
0x251d   :  { %6125 = vtanh.f32 %v5883_v7  ;;  %v4758_v19 = vmul.f32 -1.442695, %v5883_v7 }
0x2522   :  { %v3897_v10 = vpop.f32.mrb[26].mxu1 }
0x2523   :  { %v3902_v11 = vrot.slane %v3897_v10, 6  ;;  %v5486_v13 = vpop.f32.mrb[27].mxu1 }
0x2525   :  { %v3904_v14 = vadd.f32 %v3902_v11, %v6324_v18 }
0x2527   :  { %v6126_v16 = vpop.eup %6125  ;;  %6127 = vtanh.f32 %v3904_v14  ;;  %v4761_v22 = vmul.f32 -1.442695, %v3904_v14 }
0x2528   :  { %3739 = vrot.lane.b32.xlu0 %v6126_v16, %s6210_s15  ;;  %6129 = vpow2.f32 %v4758_v19 }
0x2529   :  { %6131 = vpow2.f32 %v4761_v22 }
0x2531   :  { %v6128_v17 = vpop.eup %6127 }
0x2532   :  { %3917 = vrot.lane.b32.xlu1 %v6128_v17, %s6210_s15  ;;  %v6130_v23 = vpop.eup %6129 }
0x2533   :  { %v3733_v24 = vadd.f32 1.0, %v6130_v23  ;;  %v6132_v25 = vpop.eup %6131 }
0x2534   :  { %v3908_v15 = vadd.f32 1.0, %v6132_v25 }
0x2535   :  { %6133 = vrcp.f32 %v3733_v24 }
0x2536   :  { %6135 = vrcp.f32 %v3908_v15 }
0x253f   :  { %v6134_v26 = vpop.eup %6133 }
0x2540   :  { %v6136_v30 = vpop.eup %6135  ;;  %v3737_v33 = vmul.f32 %v6134_v26, %v6847_v57 }
0x2541   :  { %v3915_v36 = vmul.f32 %v6136_v30, %v3913_v21 }
0x259a   :  { %v3740_v28 = vpop.permute.xlu0 %3739 }
0x259b   :  { %v3742_v29 = vmul.f32 %v6134_v26, %v3740_v28 }
0x259d   :  { %3744 = vrot.lane.b32.xlu0 %v3742_v29, %s6211_s3 }
0x25a4   :  { %v3918_v31 = vpop.permute.xlu1 %3917 }
0x25a5   :  { %v3920_v32 = vmul.f32 %v6136_v30, %v3918_v31 }
0x25a7   :  { %3922 = vrot.lane.b32.xlu1 %v3920_v32, %s6211_s3 }
0x260f   :  { %v3745_v34 = vpop.permute.xlu0 %3744 }
0x2610   :  { %v6887_v35 = vadd.f32 %v3745_v34, %v3737_v33 }
0x2612   :  { %6137 = vtanh.f32 %v6887_v35 }
0x2619   :  { %v3923_v37 = vpop.permute.xlu1 %3922 }
0x261a   :  { %v6891_v39 = vadd.f32 %v3923_v37, %v3915_v36 }
0x261c   :  { %v6138_v41 = vpop.eup %6137  ;;  %6139 = vtanh.f32 %v6891_v39  ;;  %v4191_v13 = vrot.slane %v6891_v39, 6 }
0x261d   :  { %3750 = vrot.lane.b32.xlu0 %v6138_v41, %s6210_s15 }
0x2626   :  { %v6140_v42 = vpop.eup %6139 }
0x2627   :  { %3928 = vrot.lane.b32.xlu1 %v6140_v42, %s6210_s15 }
0x268f   :  { %v3751_v44 = vpop.permute.xlu0 %3750 }
0x2690   :  { %v3753_v45 = vmul.f32 %v6134_v26, %v3751_v44 }
0x2692   :  { %3755 = vrot.lane.b32.xlu0 %v3753_v45, %s6211_s3 }
0x2699   :  { %v3929_v46 = vpop.permute.xlu1 %3928 }
0x269a   :  { %v3931_v48 = vmul.f32 %v6136_v30, %v3929_v46  ;;  %v4593_v30 = vld [vmem:[#allocation2] sm:$0xff] }
0x269c   :  { %v3933_v49 = vrot.slane %v3931_v48, 2 }
0x269e   :  { %3934 = vrot.lane.b32.xlu1 %v3933_v49, %s6211_s3 }
0x2704   :  { %v3756_v50 = vpop.permute.xlu0 %3755 }
0x2705   :  { %3758 = vst.msk [vmem:[#allocation2 + $0x8] sm:$0x3] %vm2649_vm3, %v3756_v50  ;;  %5474 = vmatmul.mubr.msk.f32.vlgmr.msra.gmra.mrb[30].mxu0 %vm177_vm2, %v3756_v50 }
0x2706   :  { %5823 = vmatpush3.bf16.msra.mxu0 %v6363_v43  ;;  %5495 = vmatprep.mubr.msk.f32.mxu0 %vm6208_vm0, %v6209_v1 }
0x2707   :  { %5824 = vmatprep.subr.bf16.mxu0 %v6207_v0 }
0x270a   :  { %5826 = vmatpush3.bf16.msra.mxu0 %v6377_v47 }
0x270b   :  { %5833 = vmatprep.subr.bf16.mxu0 %v6207_v0 }
0x2710   :  { %v3935_v52 = vpop.permute.xlu1 %3934 }
0x2711   :  { %5496 = vmatmul.mubr.msk.f32.vlgmr.msra.gmra.mrb[30].mxu0 %vm177_vm2, %v3935_v52 }
0x2712   :  { %5835 = vmatpush3.bf16.msra.mxu0 %v6293_v8  ;;  %5517 = vmatprep.mubr.msk.f32.mxu0 %vm6208_vm0, %v6209_v1 }
0x2713   :  { %5836 = vmatprep.subr.bf16.mxu0 %v6207_v0 }
0x2716   :  { %5838 = vmatpush3.bf16.msra.mxu0 %v6308_v12 }
0x2717   :  { %5845 = vmatprep.subr.bf16.mxu0 %v6207_v0 }
0x2719   :  { %5518 = vmatmul.mubr.msk.f32.vlgmr.msra.gmra.mrb[32].mxu0 %vm177_vm2, %v3935_v52 }
0x271a   :  { %5847 = vmatpush3.bf16.msra.mxu0 %v6345_v38  ;;  %5539 = vmatprep.mubr.msk.f32.mxu0 %vm6208_vm0, %v6209_v1 }
0x271b   :  { %5848 = vmatprep.subr.bf16.mxu0 %v6207_v0 }
0x271e   :  { %5850 = vmatpush3.bf16.msra.mxu0 %v6351_v40 }
0x271f   :  { %5857 = vmatprep.subr.bf16.mxu0 %v6207_v0 }
0x27e4   :  { %v4004_v53 = vpop.f32.mrb[30].mxu0 }
0x27e5   :  { %v5884_v54 = vadd.f32 %v6718_v27, %v4004_v53  ;;  %v5497_v55 = vpop.f32.mrb[31].mxu0 }
0x27e7   :  { %6141 = vtanh.f32 %v5884_v54  ;;  %v4763_v40 = vmul.f32 -1.442695, %v5884_v54 }
0x27ec   :  { %v4175_v56 = vpop.f32.mrb[32].mxu0 }
0x27ed   :  { %v4180_v57 = vrot.slane %v4175_v56, 4  ;;  %v5519_v58 = vpop.f32.mrb[33].mxu0 }
0x27ef   :  { %v4182_v59 = vadd.f32 %v4180_v57, %v6324_v18 }
0x27f1   :  { %v6142_v38 = vpop.eup %6141  ;;  %6143 = vtanh.f32 %v4182_v59  ;;  %v4766_v51 = vmul.f32 -1.442695, %v4182_v59 }
0x27f2   :  { %4017 = vrot.lane.b32.xlu0 %v6142_v38, %s6210_s15  ;;  %6145 = vpow2.f32 %v4763_v40 }
0x27f3   :  { %6147 = vpow2.f32 %v4766_v51 }
0x27fb   :  { %v6144_v60 = vpop.eup %6143 }
0x27fc   :  { %4195 = vrot.lane.b32.xlu1 %v6144_v60, %s6210_s15  ;;  %v6146_v61 = vpop.eup %6145 }
0x27fd   :  { %v4011_v62 = vadd.f32 1.0, %v6146_v61  ;;  %v6148_v63 = vpop.eup %6147 }
0x27fe   :  { %v4186_v2 = vadd.f32 1.0, %v6148_v63 }
0x27ff   :  { %6149 = vrcp.f32 %v4011_v62 }
0x2800   :  { %6151 = vrcp.f32 %v4186_v2 }
0x2809   :  { %v6150_v3 = vpop.eup %6149 }
0x280a   :  { %v6152_v20 = vpop.eup %6151  ;;  %v4015_v9 = vmul.f32 %v6150_v3, %v6887_v35 }
0x280b   :  { %v4193_v14 = vmul.f32 %v6152_v20, %v4191_v13 }
0x2864   :  { %v4018_v4 = vpop.permute.xlu0 %4017 }
0x2865   :  { %v4020_v5 = vmul.f32 %v6150_v3, %v4018_v4 }
0x2867   :  { %4022 = vrot.lane.b32.xlu0 %v4020_v5, %s6211_s3 }
0x286e   :  { %v4196_v6 = vpop.permute.xlu1 %4195 }
0x286f   :  { %v4198_v7 = vmul.f32 %v6152_v20, %v4196_v6 }
0x2871   :  { %4200 = vrot.lane.b32.xlu1 %v4198_v7, %s6211_s3 }
0x28d9   :  { %v4023_v10 = vpop.permute.xlu0 %4022 }
0x28da   :  { %v6927_v11 = vadd.f32 %v4023_v10, %v4015_v9 }
0x28dc   :  { %6153 = vtanh.f32 %v6927_v11 }
0x28e3   :  { %v4201_v16 = vpop.permute.xlu1 %4200 }
0x28e4   :  { %v6931_v17 = vadd.f32 %v4201_v16, %v4193_v14  ;;  %v57_v14 = vld [vmem:[%s7011_s7] sm:$0xff]  ;;  %v58_v16 = vld [vmem:[%s7011_s7 + $0x8] sm:$0xff] }
0x28e6   :  { %v6154_v19 = vpop.eup %6153  ;;  %6155 = vtanh.f32 %v6931_v17  ;;  %v4469_v56 = vrot.slane %v6931_v17, 6  ;;  %v5863_v17 = vpack.c.bf16 %v58_v16, %v57_v14 }
0x28e7   :  { %4028 = vrot.lane.b32.xlu0 %v6154_v19, %s6210_s15  ;;  %v59_v19 = vld [vmem:[%s7011_s7 + $0x10] sm:$0xff] }
0x28f0   :  { %v6156_v22 = vpop.eup %6155 }
0x28f1   :  { %4206 = vrot.lane.b32.xlu1 %v6156_v22, %s6210_s15  ;;  %v60_v22 = vld [vmem:[%s7011_s7 + $0x18] sm:$0xff] }
0x2959   :  { %v4029_v23 = vpop.permute.xlu0 %4028 }
0x295a   :  { %v4031_v24 = vmul.f32 %v6150_v3, %v4029_v23  ;;  %v5867_v23 = vpack.c.bf16 %v60_v22, %v59_v19 }
0x295c   :  { %4033 = vrot.lane.b32.xlu0 %v4031_v24, %s6211_s3 }
0x2963   :  { %v4207_v25 = vpop.permute.xlu1 %4206 }
0x2964   :  { %v4209_v15 = vmul.f32 %v6152_v20, %v4207_v25 }
0x2966   :  { %v4211_v26 = vrot.slane %v4209_v15, 4 }
0x2968   :  { %4212 = vrot.lane.b32.xlu1 %v4211_v26, %s6211_s3 }
0x29ce   :  { %v4034_v28 = vpop.permute.xlu0 %4033 }
0x29cf   :  { %4036 = vst.msk [vmem:[#allocation2 + $0xa] sm:$0x3] %vm2649_vm3, %v4034_v28  ;;  %5507 = vmatmul.mubr.msk.f32.vlgmr.msra.gmra.mrb[28].mxu1 %vm177_vm2, %v4034_v28  ;;  %v4774_v28 = vld [vmem:[%s7012_s8] ss:$0 sm:$0xff] }
0x29d0   :  { %5841 = vmatpush3.bf16.msra.mxu1 %v6363_v43  ;;  %5528 = vmatprep.mubr.msk.f32.mxu1 %vm6208_vm0, %v6209_v1 }
0x29d1   :  { %5842 = vmatprep.subr.bf16.mxu1 %v6207_v0 }
0x29d4   :  { %5844 = vmatpush3.bf16.msra.mxu1 %v6377_v47 }
0x29d5   :  { %5851 = vmatprep.subr.bf16.mxu1 %v6207_v0 }
0x29da   :  { %v4213_v29 = vpop.permute.xlu1 %4212 }
0x29db   :  { %5529 = vmatmul.mubr.msk.f32.vlgmr.msra.gmra.mrb[28].mxu1 %vm177_vm2, %v4213_v29 }
0x29dc   :  { %5853 = vmatpush3.bf16.msra.mxu1 %v6293_v8  ;;  %5550 = vmatprep.mubr.msk.f32.mxu1 %vm6208_vm0, %v6209_v1 }
0x29dd   :  { %5854 = vmatprep.subr.bf16.mxu1 %v6207_v0 }
0x29e0   :  { %5856 = vmatpush3.bf16.msra.mxu1 %v6308_v12 }
0x29e1   :  { %5864 = vmatprep.subr.bf16.mxu1 %v5863_v17 }
0x29e3   :  { %5551 = vmatmul.mubr.msk.f32.vlgmr.msra.gmra.mrb[30].mxu1 %vm177_vm2, %v4213_v29 }
0x29e4   :  { %5572 = vmatprep.mubr.msk.f32.mxu1 %vm177_vm2, %v4593_v30  ;;  %5866 = vmatpush3.bf16.msra.mxu1 %v5863_v17 }
0x29e5   :  { %5868 = vmatprep.subr.bf16.mxu1 %v5867_v23 }
0x29e8   :  { %5870 = vmatpush3.bf16.msra.mxu1 %v5867_v23 }
0x2aae   :  { %v4282_v31 = vpop.f32.mrb[28].mxu1 }
0x2aaf   :  { %v5885_v32 = vadd.f32 %v6718_v27, %v4282_v31  ;;  %v5530_v33 = vpop.f32.mrb[29].mxu1 }
0x2ab1   :  { %6157 = vtanh.f32 %v5885_v32  ;;  %v4768_v37 = vmul.f32 -1.442695, %v5885_v32 }
0x2ab6   :  { %v4453_v34 = vpop.f32.mrb[30].mxu1 }
0x2ab7   :  { %v4458_v35 = vrot.slane %v4453_v34, 2  ;;  %v5552_v8 = vpop.f32.mrb[31].mxu1 }
0x2ab9   :  { %v4460_v21 = vadd.f32 %v4458_v35, %v6324_v18 }
0x2abb   :  { %v6158_v36 = vpop.eup %6157  ;;  %6159 = vtanh.f32 %v4460_v21  ;;  %v4771_v39 = vmul.f32 -1.442695, %v4460_v21 }
0x2abc   :  { %4295 = vrot.lane.b32.xlu0 %v6158_v36, %s6210_s15  ;;  %6161 = vpow2.f32 %v4768_v37 }
0x2abd   :  { %6163 = vpow2.f32 %v4771_v39 }
0x2ac5   :  { %v6160_v12 = vpop.eup %6159 }
0x2ac6   :  { %4473 = vrot.lane.b32.xlu1 %v6160_v12, %s6210_s15  ;;  %v6162_v41 = vpop.eup %6161 }
0x2ac7   :  { %v4289_v42 = vadd.f32 1.0, %v6162_v41  ;;  %v6164_v44 = vpop.eup %6163 }
0x2ac8   :  { %v4464_v45 = vadd.f32 1.0, %v6164_v44 }
0x2ac9   :  { %6165 = vrcp.f32 %v4289_v42 }
0x2aca   :  { %6167 = vrcp.f32 %v4464_v45 }
0x2ad3   :  { %v6166_v46 = vpop.eup %6165 }
0x2ad4   :  { %v6168_v49 = vpop.eup %6167  ;;  %v4293_v53 = vmul.f32 %v6166_v46, %v6927_v11 }
0x2ad5   :  { %v4471_v57 = vmul.f32 %v6168_v49, %v4469_v56 }
0x2b2e   :  { %v4296_v48 = vpop.permute.xlu0 %4295 }
0x2b2f   :  { %v4298_v18 = vmul.f32 %v6166_v46, %v4296_v48 }
0x2b31   :  { %4300 = vrot.lane.b32.xlu0 %v4298_v18, %s6211_s3 }
0x2b38   :  { %v4474_v50 = vpop.permute.xlu1 %4473 }
0x2b39   :  { %v4476_v52 = vmul.f32 %v6168_v49, %v4474_v50 }
0x2b3b   :  { %4478 = vrot.lane.b32.xlu1 %v4476_v52, %s6211_s3 }
0x2ba3   :  { %v4301_v54 = vpop.permute.xlu0 %4300 }
0x2ba4   :  { %v4303_v55 = vadd.f32 %v4301_v54, %v4293_v53 }
0x2ba6   :  { %6169 = vtanh.f32 %v4303_v55 }
0x2bad   :  { %v4479_v58 = vpop.permute.xlu1 %4478 }
0x2bae   :  { %v4481_v59 = vadd.f32 %v4479_v58, %v4471_v57 }
0x2bb0   :  { %v6170_v38 = vpop.eup %6169  ;;  %6171 = vtanh.f32 %v4481_v59 }
0x2bb1   :  { %4306 = vrot.lane.b32.xlu0 %v6170_v38, %s6210_s15 }
0x2bba   :  { %v6172_v60 = vpop.eup %6171 }
0x2bbb   :  { %4484 = vrot.lane.b32.xlu1 %v6172_v60, %s6210_s15 }
0x2c23   :  { %v4307_v40 = vpop.permute.xlu0 %4306 }
0x2c24   :  { %v4309_v51 = vmul.f32 %v6166_v46, %v4307_v40 }
0x2c26   :  { %4311 = vrot.lane.b32.xlu0 %v4309_v51, %s6211_s3 }
0x2c2d   :  { %v4485_v61 = vpop.permute.xlu1 %4484 }
0x2c2e   :  { %v4487_v62 = vmul.f32 %v6168_v49, %v4485_v61 }
0x2c30   :  { %v4489_v63 = vrot.slane %v4487_v62, 6 }
0x2c32   :  { %4490 = vrot.lane.b32.xlu1 %v4489_v63, %s6211_s3 }
0x2c98   :  { %v4312_v2 = vpop.permute.xlu0 %4311 }
0x2c99   :  { %4314 = vst.msk [vmem:[#allocation2 + $0xc] sm:$0x3] %vm2649_vm3, %v4312_v2  ;;  %5540 = vmatmul.mubr.msk.f32.vlgmr.msra.gmra.mrb[34].mxu0 %vm177_vm2, %v4312_v2 }
0x2c9a   :  { %5859 = vmatpush3.bf16.msra.mxu0 %v6363_v43  ;;  %5561 = vmatprep.mubr.msk.f32.mxu0 %vm6208_vm0, %v6209_v1 }
0x2c9b   :  { %5860 = vmatprep.subr.bf16.mxu0 %v6207_v0 }
0x2c9e   :  { %5862 = vmatpush3.bf16.msra.mxu0 %v6377_v47 }
0x2ca4   :  { %v4491_v3 = vpop.permute.xlu1 %4490 }
0x2ca5   :  { %5562 = vmatmul.mubr.msk.f32.vlgmr.msra.gmra.mrb[34].mxu0 %vm177_vm2, %v4491_v3 }
0x2d78   :  { %v4560_v4 = vpop.f32.mrb[34].mxu0 }
0x2d79   :  { %v5886_v5 = vadd.f32 %v6718_v27, %v4560_v4  ;;  %v5563_v20 = vpop.f32.mrb[35].mxu0 }
0x2d7b   :  { %6173 = vtanh.f32 %v5886_v5  ;;  %v4773_v7 = vmul.f32 -1.442695, %v5886_v5 }
0x2d7d   :  { %6175 = vpow2.f32 %v4773_v7 }
0x2d85   :  { %v6174_v6 = vpop.eup %6173 }
0x2d86   :  { %4573 = vrot.lane.b32.xlu0 %v6174_v6, %s6210_s15 }
0x2d87   :  { %v6176_v43 = vpop.eup %6175 }
0x2d88   :  { %v4567_v9 = vadd.f32 1.0, %v6176_v43 }
0x2d8a   :  { %6177 = vrcp.f32 %v4567_v9 }
0x2d94   :  { %v6178_v1 = vpop.eup %6177 }
0x2d95   :  { %v4571_v47 = vmul.f32 %v6178_v1, %v4303_v55 }
0x2df8   :  { %v4574_v0 = vpop.permute.xlu0 %4573 }
0x2df9   :  { %v4576_v10 = vmul.f32 %v6178_v1, %v4574_v0 }
0x2dfb   :  { %4578 = vrot.lane.b32.xlu1 %v4576_v10, %s6211_s3 }
0x2e6d   :  { %v4579_v11 = vpop.permute.xlu1 %4578 }
0x2e6e   :  { %v4581_v13 = vadd.f32 %v4579_v11, %v4571_v47 }
0x2e70   :  { %6179 = vtanh.f32 %v4581_v13 }
0x2e7a   :  { %v6180_v27 = vpop.eup %6179 }
0x2e7b   :  { %4584 = vrot.lane.b32.xlu0 %v6180_v27, %s6210_s15 }
0x2eed   :  { %v4585_v24 = vpop.permute.xlu0 %4584 }
0x2eee   :  { %v4587_v25 = vmul.f32 %v6178_v1, %v4585_v24 }
0x2ef0   :  { %4589 = vrot.lane.b32.xlu1 %v4587_v25, %s6211_s3 }
0x2f62   :  { %v4590_v15 = vpop.permute.xlu1 %4589 }
0x2f63   :  { %4592 = vst.msk [vmem:[#allocation2 + $0xe] sm:$0x3] %vm2649_vm3, %v4590_v15 }
0x2f6a   :  { %v4594_v26 = vld [vmem:[#allocation2 + $0x8] sm:$0xff] }
0x2f6b   :  { %5573 = vmatmul.mubr.msk.f32.vlgmr.msra.gmra.mrb[32].mxu1 %vm177_vm2, %v4594_v26 }
0x303e   :  { %v5574_v29 = vpop.f32.mrb[32].mxu1 }
0x303f   :  { %v4680_v30 = vadd.f32 %v5574_v29, %v4774_v28  ;;  %v4674_v31 = vpop.f32.mrb[33].mxu1 }
0x3040   :  { %v4675_v32 = vadd.f32 %v4774_v28, %v4674_v31 }
0x3041   :  { %4684 = vst.msk [vmem:[%s7013_s9 + $0x8] sm:$0xff] %vm79_vm1, %v4680_v30 }
0x3042   :  { %4683 = vst.msk [vmem:[%s7013_s9] sm:$0xff] %vm79_vm1, %v4675_v32 }
0x3043   :  { %4689 = vsyncpa [#allocation4], 1 }

</bundles_post_ra>
